<compile_context>
chip_gen: v6e
topology: v6e:2x2x1
jax: 0.10.0
libtpu: 0.0.40
codegen_flags: <defaults>
</compile_context>

<pallas_src>
import math

import jax
import jax.numpy as jnp
from jax.experimental import pallas as pl
from jax.experimental.pallas import tpu as pltpu

# ----------------------------- model config ---------------------------------
B = 2             # batch
N_FRAMES = 2      # frames per video
C_IN = 3          # image channels
IMG = 16          # image size
PATCH = 8         # patch size
NP = (IMG // PATCH) ** 2            # 4 patches per frame
PATCH_DIM = C_IN * PATCH * PATCH    # 192
TV = NP + 1                         # 5 vision tokens per frame (cls + patches)
DV = 32           # vision width
HV = 4            # vision heads
DHV = DV // HV
LV = 2            # vision layers

T_TXT = 8         # text sequence length
DT = 32           # text hidden
HT = 4
DHT = DT // HT
FF = 128          # text FFN width
LT = 2            # text decoder layers
VOCAB = 128
T_MAX = 16
TE = N_FRAMES * TV                  # encoder (video) tokens seen by decoder

PAD_ID = 0
BOS_ID = 1
PROMPT_LEN = 4
LABEL_SMOOTHING = 0.1               # as in BLIP's BertLMHeadModel loss
IGNORE_INDEX = -100
NEG_INF = -1e9
LANE = 128


# -------------------------- in-kernel building blocks ------------------------
def _layernorm(x, g, b, eps):
    """LayerNorm over the last dim, f32 statistics. g/b: (1, D)."""
    x = x.astype(jnp.float32)
    mu = jnp.mean(x, axis=-1, keepdims=True)
    var = jnp.mean(jnp.square(x - mu), axis=-1, keepdims=True)
    return (x - mu) * jax.lax.rsqrt(var + eps) * g + b


def _linear(x, w, b):
    """x @ w + b with bf16 MXU operands and f32 accumulation. b: (1, N) f32."""
    y = jnp.dot(x.astype(jnp.bfloat16), w.astype(jnp.bfloat16),
                preferred_element_type=jnp.float32)
    return y + b


def _mha(q, k, v, bias, wo, bo, n_heads, dh):
    """Multi-head attention with ONE fused output projection.

    q: (Tq, H*dh), k/v: (Tk, H*dh) f32; bias: (Tq, Tk) additive f32 or None;
    wo: (H*dh, Dout) bf16; bo: (1, Dout) f32.
    Returns (Tq, Dout) f32 = concat_h(attn_h) @ W_o + b_o.
    """
    scale = 1.0 / math.sqrt(dh)
    heads = []
    for h in range(n_heads):                       # tiny static head count
        sl = slice(h * dh, (h + 1) * dh)
        qh = q[:, sl].astype(jnp.bfloat16)
        kh = k[:, sl].astype(jnp.bfloat16)
        vh = v[:, sl].astype(jnp.bfloat16)
        s = jnp.einsum("qd,kd->qk", qh, kh,
                       preferred_element_type=jnp.float32) * scale
        if bias is not None:
            s = s + bias
        s = s - jnp.max(s, axis=-1, keepdims=True)
        e = jnp.exp(s)
        p = e * pl.reciprocal(jnp.sum(e, axis=-1, keepdims=True), approx=True)
        heads.append(jnp.einsum("qk,kd->qd", p.astype(jnp.bfloat16), vh,
                                preferred_element_type=jnp.float32))
    o = jnp.concatenate(heads, axis=-1)            # (Tq, H*dh) f32
    return jnp.dot(o.astype(jnp.bfloat16), wo.astype(jnp.bfloat16),
                   preferred_element_type=jnp.float32) + bo


def _pack_rows(vecs, num_rows, width=LANE):
    """Pack a list of (L, w_i) f32 vectors into one (L, num_rows, width) slab."""
    rows = [jnp.pad(v.astype(jnp.float32),
                    ((0, 0), (0, width - v.shape[-1])))[:, None, :]
            for v in vecs]
    out = jnp.concatenate(rows, axis=1)
    if out.shape[1] < num_rows:
        out = jnp.pad(out, ((0, 0), (0, num_rows - out.shape[1]), (0, 0)))
    return out


# ------------------------------ fused ViT kernel -----------------------------
def _make_vit_kernel(fpg):
    def kernel(patches_ref, pw_ref, base_ref, vecs_ref,
               qkvw_ref, projw_ref, fc1w_ref, fc2w_ref, fln_ref, o_ref):
        """One grid step = (frame group, vit layer). Activation lives in o_ref."""
        l = pl.program_id(1)

        @pl.when(l == 0)
        def _embed():
            # row 0 of patches is a zero "cls" row; base folds cls + pos + bias
            for f in range(fpg):
                tok = jnp.dot(patches_ref[f], pw_ref[...],
                              preferred_element_type=jnp.float32)   # (TV, DV)
                o_ref[f] = tok + base_ref[...]

        # packed per-layer vectors: one (8, 128) f32 load per step
        vv = vecs_ref[l]
        ln1_g, ln1_b = vv[0:1, :DV], vv[1:2, :DV]
        qkv_b = vv[2:3, :3 * DV]
        proj_b = vv[3:4, :DV]
        ln2_g, ln2_b = vv[4:5, :DV], vv[5:6, :DV]
        fc1_b = vv[6:7, :4 * DV]
        fc2_b = vv[7:8, :DV]
        qkv_w = qkvw_ref[l]
        proj_w = projw_ref[l]
        fc1_w = fc1w_ref[l]
        fc2_w = fc2w_ref[l]

        for f in range(fpg):                       # static frame loop
            h = o_ref[f]                           # (TV, DV) f32
            # pre-LN self attention (no mask) + fused output proj + residual
            xn = _layernorm(h, ln1_g, ln1_b, 1e-6)
            qkv = _linear(xn, qkv_w, qkv_b)        # (TV, 3*DV)
            h = h + _mha(qkv[:, :DV], qkv[:, DV:2 * DV], qkv[:, 2 * DV:],
                         None, proj_w, proj_b, HV, DHV)
            # pre-LN MLP + residual
            xn = _layernorm(h, ln2_g, ln2_b, 1e-6)
            m = jax.nn.gelu(_linear(xn, fc1_w, fc1_b), approximate=True)
            h = h + _linear(m, fc2_w, fc2_b)
            o_ref[f] = h

        @pl.when(l == LV - 1)
        def _final_ln():
            for f in range(fpg):
                o_ref[f] = _layernorm(o_ref[f], fln_ref[0:1, :],
                                      fln_ref[1:2, :], 1e-6)
    return kernel


def vit_encode(vit, patches):
    """patches: (BN, NP, PATCH_DIM) f32 -> (BN, TV, DV) f32 video embeddings."""
    BN = patches.shape[0]
    g = 2 if BN % 2 == 0 else 1        # 2-wide parallel axis for v7x megacore
    fpg = BN // g

    # Fold cls token, positional embedding and patch-embed bias into one base.
    base = jnp.concatenate([vit["cls"] + vit["pos"][0:1],
                            vit["pos"][1:] + vit["patch_b"]], axis=0)  # (TV, DV)
    patches_ext = jnp.concatenate(
        [jnp.zeros((BN, 1, PATCH_DIM), jnp.float32), patches],
        axis=1).astype(jnp.bfloat16)                                   # (BN, TV, PD)

    vecs = _pack_rows([vit["ln1_g"], vit["ln1_b"], vit["qkv_b"], vit["proj_b"],
                       vit["ln2_g"], vit["ln2_b"], vit["fc1_b"], vit["fc2_b"]],
                      num_rows=8)                                      # (LV, 8, 128)
    fln = jnp.concatenate([vit["ln_f_g"], vit["ln_f_b"]], axis=0)      # (2, DV)

    frame_map = lambda gi, li: (gi, 0, 0)
    c2 = lambda gi, li: (0, 0)
    c3 = lambda gi, li: (0, 0, 0)

    in_specs = [
        pl.BlockSpec((fpg, TV, PATCH_DIM), frame_map),   # patches (+ zero cls row)
        pl.BlockSpec((PATCH_DIM, DV), c2),               # patch_w (bf16), resident
        pl.BlockSpec((TV, DV), c2),                      # base, resident
        pl.BlockSpec((LV, 8, LANE), c3),                 # packed LN/bias vectors
        pl.BlockSpec((LV, DV, 3 * DV), c3),              # qkv_w, resident
        pl.BlockSpec((LV, DV, DV), c3),                  # proj_w (full), resident
        pl.BlockSpec((LV, DV, 4 * DV), c3),              # fc1_w, resident
        pl.BlockSpec((LV, 4 * DV, DV), c3),              # fc2_w, resident
        pl.BlockSpec((2, DV), c2),                       # final LN (g; b)
    ]

    return pl.pallas_call(
        _make_vit_kernel(fpg),
        out_shape=jax.ShapeDtypeStruct((BN, TV, DV), jnp.float32),
        grid=(g, LV),
        in_specs=in_specs,
        out_specs=pl.BlockSpec((fpg, TV, DV), frame_map),
        compiler_params=pltpu.CompilerParams(
            dimension_semantics=("parallel", "arbitrary")),
    )(patches_ext, vit["patch_w"], base, vecs,
      vit["qkv_w"], vit["proj_w"], vit["fc1_w"], vit["fc2_w"], fln)


# --------------------------- fused decoder + loss kernel ----------------------
def _make_decoder_kernel(batch):
    BT = batch * T_TXT

    def kernel(emb_ref, am_ref, enc_ref, onehot_ref, evec_ref, lvec_ref,
               qkvw_ref, ow_ref, cqw_ref, ckvw_ref, cow_ref,
               f1w_ref, f2w_ref, hdw_ref, decw_ref,
               loss_ref, x_acc, bias_acc):
        """One grid step = one decoder layer; all sequences processed together."""
        l = pl.program_id(0)
        ev = evec_ref[...]                                  # (8, 128)

        @pl.when(l == 0)
        def _init():
            x_acc[...] = _layernorm(emb_ref[...], ev[0:1, :DT], ev[1:2, :DT],
                                    1e-12)
            # causal + key-padding additive bias, built once and reused per layer
            rows = jax.lax.broadcasted_iota(jnp.int32, (T_TXT, T_TXT), 0)
            cols = jax.lax.broadcasted_iota(jnp.int32, (T_TXT, T_TXT), 1)
            causal = rows >= cols
            for b in range(batch):
                keep = jnp.logical_and(causal, am_ref[b:b + 1, :] > 0.5)
                bias_acc[b] = jnp.where(keep, 0.0, NEG_INF).astype(jnp.float32)

        lv = lvec_ref[l]                                    # (16, 128)
        x = x_acc[...]                                      # (BT, DT) f32

        # --- causal self-attention + fused output proj + residual + post-LN
        qkv = _linear(x, qkvw_ref[l], lv[0:1, :3 * DT])     # (BT, 3*DT)
        ow, o_b = ow_ref[l], lv[1:2, :DT]
        a_rows = []
        for b in range(batch):                              # per-sequence mask
            r = slice(b * T_TXT, (b + 1) * T_TXT)
            a_rows.append(_mha(qkv[r, :DT], qkv[r, DT:2 * DT], qkv[r, 2 * DT:],
                               bias_acc[b], ow, o_b, HT, DHT))
        a = jnp.concatenate(a_rows, axis=0)                 # (BT, DT)
        x = _layernorm(x + a, lv[2:3, :DT], lv[3:4, :DT], 1e-12)

        # --- cross-attention to video tokens (encoder mask all ones -> no bias)
        qc = _linear(x, cqw_ref[l], lv[4:5, :DT])           # (BT, DT)
        ckvw, ckv_b = ckvw_ref[l], lv[5:6, :2 * DT]
        cow, co_b = cow_ref[l], lv[6:7, :DT]
        c_rows = []
        for b in range(batch):
            r = slice(b * T_TXT, (b + 1) * T_TXT)
            kvb = _linear(enc_ref[b], ckvw, ckv_b)          # (TE, 2*DT)
            c_rows.append(_mha(qc[r, :], kvb[:, :DT], kvb[:, DT:], None,
                               cow, co_b, HT, DHT))
        c = jnp.concatenate(c_rows, axis=0)
        x = _layernorm(x + c, lv[7:8, :DT], lv[8:9, :DT], 1e-12)

        # --- FFN + residual + post-LN
        m = jax.nn.gelu(_linear(x, f1w_ref[l], lv[9:10, :FF]), approximate=True)
        x = _layernorm(x + _linear(m, f2w_ref[l], lv[10:11, :DT]),
                       lv[11:12, :DT], lv[12:13, :DT], 1e-12)
        x_acc[...] = x

        # --- LM head + label-smoothed masked CE after the last layer only.
        # (Relies on the output block index being constant across the layer axis.)
        @pl.when(l == LT - 1)
        def _head_and_loss():
            h = jax.nn.gelu(_linear(x, hdw_ref[...], ev[2:3, :DT]),
                            approximate=True)
            h = _layernorm(h, ev[3:4, :DT], ev[4:5, :DT], 1e-12)
            logits = _linear(h, decw_ref[...], ev[5:6, :VOCAB])   # (BT, VOCAB)
            mx = jnp.max(logits, axis=-1, keepdims=True)
            z = logits - mx
            lse = jnp.log(jnp.sum(jnp.exp(z), axis=-1, keepdims=True))
            logp = z - lse
            oh = onehot_ref[...]                                  # (BT, VOCAB)
            valid = jnp.sum(oh, axis=-1, keepdims=True)           # 1. valid / 0. ignored
            nll = -jnp.sum(oh * logp, axis=-1, keepdims=True)
            smooth = -jnp.mean(logp, axis=-1, keepdims=True)
            per_tok = (1.0 - LABEL_SMOOTHING) * nll + LABEL_SMOOTHING * smooth
            lanes = jax.lax.broadcasted_iota(jnp.int32, (BT, LANE), 1)
            contrib = jnp.where(lanes == 0, per_tok * valid,
                                jnp.where(lanes == 1, valid, 0.0))
            loss_ref[...] = jnp.sum(contrib, axis=0, keepdims=True)  # (1, 128)
    return kernel


def decoder_loss(bert, emb, am, enc, onehot):
    """Fused causal BERT decoder + LM head + CE. Returns a (1, 128) row:
    lane 0 = summed loss, lane 1 = number of valid label tokens."""
    batch = am.shape[0]

    lvecs = _pack_rows([bert["qkv_b"], bert["o_b"],
                        bert["attn_ln_g"], bert["attn_ln_b"],
                        bert["cq_b"], bert["ckv_b"], bert["co_b"],
                        bert["cross_ln_g"], bert["cross_ln_b"],
                        bert["ff1_b"], bert["ff2_b"],
                        bert["ff_ln_g"], bert["ff_ln_b"]],
                       num_rows=16)                               # (LT, 16, 128)
    evec = _pack_rows([bert["emb_ln_g"], bert["emb_ln_b"], bert["head_dense_b"],
                       bert["head_ln_g"], bert["head_ln_b"], bert["head_dec_b"]],
                      num_rows=8)[0]                              # (8, 128)

    c2 = lambda li: (0, 0)
    c3 = lambda li: (0, 0, 0)
    in_specs = [
        pl.BlockSpec((batch * T_TXT, DT), c2),        # emb (word + pos), flattened
        pl.BlockSpec((batch, T_TXT), c2),             # attention mask
        pl.BlockSpec((batch, TE, DV), c3),            # video embeds
        pl.BlockSpec((batch * T_TXT, VOCAB), c2),     # one-hot shifted labels
        pl.BlockSpec((8, LANE), c2),                  # packed non-layer vectors
        pl.BlockSpec((LT, 16, LANE), c3),             # packed per-layer vectors
        pl.BlockSpec((LT, DT, 3 * DT), c3),           # qkv_w, resident
        pl.BlockSpec((LT, DT, DT), c3),               # o_w  (full), resident
        pl.BlockSpec((LT, DT, DT), c3),               # cq_w, resident
        pl.BlockSpec((LT, DV, 2 * DT), c3),           # ckv_w, resident
        pl.BlockSpec((LT, DT, DT), c3),               # co_w (full), resident
        pl.BlockSpec((LT, DT, FF), c3),               # ff1_w, resident
        pl.BlockSpec((LT, FF, DT), c3),               # ff2_w, resident
        pl.BlockSpec((DT, DT), c2),                   # head_dense_w
        pl.BlockSpec((DT, VOCAB), c2),                # head_dec_w
    ]

    return pl.pallas_call(
        _make_decoder_kernel(batch),
        out_shape=jax.ShapeDtypeStruct((1, LANE), jnp.float32),
        grid=(LT,),
        in_specs=in_specs,
        out_specs=pl.BlockSpec((1, LANE), c2),
        scratch_shapes=[pltpu.VMEM((batch * T_TXT, DT), jnp.float32),
                        pltpu.VMEM((batch, T_TXT, T_TXT), jnp.float32)],
        compiler_params=pltpu.CompilerParams(
            dimension_semantics=("arbitrary",)),
    )(emb, am, enc, onehot, evec, lvecs,
      bert["qkv_w"], bert["o_w"], bert["cq_w"], bert["ckv_w"], bert["co_w"],
      bert["ff1_w"], bert["ff2_w"], bert["head_dense_w"], bert["head_dec_w"])


# ----------------------------- parameter init --------------------------------
def init_params(key):
    keys = iter(jax.random.split(key, 64))
    WD = jnp.bfloat16   # storage dtype for matmul weights (MXU operands)

    def nrm(shape, dtype=jnp.float32, scale=0.02):
        return (scale * jax.random.normal(next(keys), shape,
                                          jnp.float32)).astype(dtype)

    def ones(shape):
        return jnp.ones(shape, jnp.float32)

    def zeros(shape):
        return jnp.zeros(shape, jnp.float32)

    vit = dict(
        patch_w=nrm((PATCH_DIM, DV), WD), patch_b=zeros((1, DV)),
        cls=nrm((1, DV)), pos=nrm((TV, DV)),
        ln1_g=ones((LV, DV)), ln1_b=zeros((LV, DV)),
        qkv_w=nrm((LV, DV, 3 * DV), WD), qkv_b=zeros((LV, 3 * DV)),
        proj_w=nrm((LV, DV, DV), WD), proj_b=zeros((LV, DV)),
        ln2_g=ones((LV, DV)), ln2_b=zeros((LV, DV)),
        fc1_w=nrm((LV, DV, 4 * DV), WD), fc1_b=zeros((LV, 4 * DV)),
        fc2_w=nrm((LV, 4 * DV, DV), WD), fc2_b=zeros((LV, DV)),
        ln_f_g=ones((1, DV)), ln_f_b=zeros((1, DV)),
    )
    bert = dict(
        word_emb=nrm((VOCAB, DT)),
        pos_emb=nrm((T_MAX, DT)),
        emb_ln_g=ones((1, DT)), emb_ln_b=zeros((1, DT)),
        qkv_w=nrm((LT, DT, 3 * DT), WD), qkv_b=zeros((LT, 3 * DT)),
        o_w=nrm((LT, DT, DT), WD), o_b=zeros((LT, DT)),
        attn_ln_g=ones((LT, DT)), attn_ln_b=zeros((LT, DT)),
        cq_w=nrm((LT, DT, DT), WD), cq_b=zeros((LT, DT)),
        ckv_w=nrm((LT, DV, 2 * DT), WD), ckv_b=zeros((LT, 2 * DT)),
        co_w=nrm((LT, DT, DT), WD), co_b=zeros((LT, DT)),
        cross_ln_g=ones((LT, DT)), cross_ln_b=zeros((LT, DT)),
        ff1_w=nrm((LT, DT, FF), WD), ff1_b=zeros((LT, FF)),
        ff2_w=nrm((LT, FF, DT), WD), ff2_b=zeros((LT, DT)),
        ff_ln_g=ones((LT, DT)), ff_ln_b=zeros((LT, DT)),
        head_dense_w=nrm((DT, DT), WD), head_dense_b=zeros((1, DT)),
        head_ln_g=ones((1, DT)), head_ln_b=zeros((1, DT)),
        head_dec_w=nrm((DT, VOCAB), WD), head_dec_b=zeros((1, VOCAB)),
    )
    return dict(vit=vit, bert=bert)


# ----------------------------- model forward ---------------------------------
def patchify(x, p):
    """NCHW -> (BN, num_patches, C*p*p) with (C, ph, pw) feature order."""
    BN, C, H, W = x.shape
    x = x.reshape(BN, C, H // p, p, W // p, p)
    x = x.transpose(0, 2, 4, 1, 3, 5)
    return x.reshape(BN, (H // p) * (W // p), C * p * p)


def blip_video_caption_forward(params, video, input_ids, attention_mask):
    """Mirrors BLIP_Video_Caption.forward: returns the LM loss."""
    Bv, Nf, C, H, W = video.shape
    video_flat = video.reshape(Bv * Nf, C, H, W)
    patches = patchify(video_flat, PATCH)                         # (BN, NP, PD)
    video_embeds = vit_encode(params["vit"], patches)             # (BN, TV, DV)
    video_embeds = video_embeds.reshape(Bv, Nf * TV, DV)
    # video_atts is all ones -> the cross-attention mask is a no-op, so it is
    # skipped entirely inside the fused decoder kernel.

    decoder_targets = jnp.where(input_ids == PAD_ID, IGNORE_INDEX, input_ids)
    decoder_targets = decoder_targets.at[:, :PROMPT_LEN].set(IGNORE_INDEX)
    # shift: logits at position t predict targets at t+1; last position unused
    labels = jnp.concatenate(
        [decoder_targets[:, 1:],
         jnp.full((Bv, 1), IGNORE_INDEX, decoder_targets.dtype)], axis=1)
    # one-hot labels (lane-dense, zero rows for ignored positions)
    onehot = jax.nn.one_hot(labels, VOCAB, dtype=jnp.float32)
    onehot = onehot.reshape(Bv * T_TXT, VOCAB)

    bert = params["bert"]
    # TODO(synk): HF BertTokenizer / beam-search generate() have no Pallas
    # equivalent; token ids are synthetic and the embedding gather stays in XLA.
    emb = (jnp.take(bert["word_emb"], input_ids, axis=0)
           + bert["pos_emb"][None, :T_TXT]).reshape(Bv * T_TXT, DT)
    am = attention_mask.astype(jnp.float32)                       # (B, T)

    loss_row = decoder_loss(bert, emb, am, video_embeds, onehot)  # (1, 128)
    return loss_row[0, 0] / jnp.maximum(loss_row[0, 1], 1.0)


# ----------------------------- main -------------------------------------------
if __name__ == "__main__":
    key = jax.random.PRNGKey(0)
    k_param, k_video, k_text = jax.random.split(key, 3)

    params = init_params(k_param)

    # video: (B, N, C, W, H) as in the PyTorch module (NCHW per frame)
    video = jax.random.normal(k_video, (B, N_FRAMES, C_IN, IMG, IMG),
                              dtype=jnp.float32)

    # synthetic caption token ids (tokenizer replaced, see TODO above)
    input_ids = jax.random.randint(k_text, (B, T_TXT), 2, VOCAB, dtype=jnp.int32)
    input_ids = input_ids.at[:, 0].set(BOS_ID)      # text.input_ids[:, 0] = bos
    input_ids = input_ids.at[1, -2:].set(PAD_ID)    # some padding
    attention_mask = (input_ids != PAD_ID).astype(jnp.int32)

    loss = jax.jit(blip_video_caption_forward)(params, video, input_ids,
                                               attention_mask)
    loss = jax.block_until_ready(loss)
    assert jnp.isfinite(loss), f"non-finite loss: {loss}"
    print("KERNEL_OK")
</pallas_src>

<mosaic_0001>
module attributes {stable_mosaic.version = 11 : i64} {
  func.func @kernel(%arg0: i32, %arg1: i32, %arg2: memref<2x5x192xbf16, #tpu.memory_space<vmem>>, %arg3: memref<192x32xbf16, #tpu.memory_space<vmem>>, %arg4: memref<5x32xf32, #tpu.memory_space<vmem>>, %arg5: memref<2x8x128xf32, #tpu.memory_space<vmem>>, %arg6: memref<2x32x96xbf16, #tpu.memory_space<vmem>>, %arg7: memref<2x32x32xbf16, #tpu.memory_space<vmem>>, %arg8: memref<2x32x128xbf16, #tpu.memory_space<vmem>>, %arg9: memref<2x128x32xbf16, #tpu.memory_space<vmem>>, %arg10: memref<2x32xf32, #tpu.memory_space<vmem>>, %arg11: memref<2x5x32xf32, #tpu.memory_space<vmem>>) attributes {dimension_semantics = [#tpu.dimension_semantics<parallel>, #tpu.dimension_semantics<arbitrary>], iteration_bounds = array<i64: 2, 2>, scalar_prefetch = 0 : i64, scratch_operands = 0 : i64, tpu.core_type = #tpu.core_type<tc>, window_params = [{transform_indices = @transform_0, window_bounds = array<i64: 2, 5, 192>}, {pipeline_mode = #tpu.pipeline_mode<synchronous>, transform_indices = @transform_1, window_bounds = array<i64: 192, 32>}, {pipeline_mode = #tpu.pipeline_mode<synchronous>, transform_indices = @transform_2, window_bounds = array<i64: 5, 32>}, {pipeline_mode = #tpu.pipeline_mode<synchronous>, transform_indices = @transform_3, window_bounds = array<i64: 2, 8, 128>}, {pipeline_mode = #tpu.pipeline_mode<synchronous>, transform_indices = @transform_4, window_bounds = array<i64: 2, 32, 96>}, {pipeline_mode = #tpu.pipeline_mode<synchronous>, transform_indices = @transform_5, window_bounds = array<i64: 2, 32, 32>}, {pipeline_mode = #tpu.pipeline_mode<synchronous>, transform_indices = @transform_6, window_bounds = array<i64: 2, 32, 128>}, {pipeline_mode = #tpu.pipeline_mode<synchronous>, transform_indices = @transform_7, window_bounds = array<i64: 2, 128, 32>}, {pipeline_mode = #tpu.pipeline_mode<synchronous>, transform_indices = @transform_8, window_bounds = array<i64: 2, 32>}, {transform_indices = @transform_9, window_bounds = array<i64: 2, 5, 32>}]} {
    %c0_i32 = arith.constant 0 : i32
    %0 = arith.cmpi eq, %arg1, %c0_i32 : i32
    %1 = arith.extui %0 : i1 to i32
    %c0_i32_0 = arith.constant 0 : i32
    %2 = arith.cmpi ne, %1, %c0_i32_0 : i32
    scf.if %2 {
      %c0_97 = arith.constant 0 : index
      %c0_98 = arith.constant 0 : index
      %c0_99 = arith.constant 0 : index
      %365 = vector.load %arg2[%c0_97, %c0_98, %c0_99] : memref<2x5x192xbf16, #tpu.memory_space<vmem>>, vector<1x5x192xbf16>
      %366 = vector.shape_cast %365 : vector<1x5x192xbf16> to vector<5x192xbf16>
      %c0_100 = arith.constant 0 : index
      %c0_101 = arith.constant 0 : index
      %367 = vector.load %arg3[%c0_100, %c0_101] : memref<192x32xbf16, #tpu.memory_space<vmem>>, vector<192x32xbf16>
      %cst_102 = arith.constant dense<0.000000e+00> : vector<5x32xf32>
      %368 = tpu.matmul %366, %367, %cst_102 {dimension_numbers = #tpu.dot_dimension_numbers<[1], [0], [0], [1], [0, 0, 1, 1], [], []>} : vector<5x192xbf16>, vector<192x32xbf16>, vector<5x32xf32> -> vector<5x32xf32>
      %c0_103 = arith.constant 0 : index
      %c0_104 = arith.constant 0 : index
      %369 = vector.load %arg4[%c0_103, %c0_104] : memref<5x32xf32, #tpu.memory_space<vmem>>, vector<5x32xf32>
      %370 = arith.addf %368, %369 : vector<5x32xf32>
      %c0_105 = arith.constant 0 : index
      %c0_106 = arith.constant 0 : index
      %c0_107 = arith.constant 0 : index
      %371 = vector.load %arg11[%c0_105, %c0_106, %c0_107] : memref<2x5x32xf32, #tpu.memory_space<vmem>>, vector<1x5x32xf32>
      %372 = vector.shape_cast %371 : vector<1x5x32xf32> to vector<5x32xf32>
      %373 = vector.shape_cast %370 : vector<5x32xf32> to vector<1x5x32xf32>
      tpu.vector_store %arg11[%c0_105, %c0_106, %c0_107], %373 {strides = array<i32>} : memref<2x5x32xf32, #tpu.memory_space<vmem>>, vector<1x5x32xf32>,
      %c1_108 = arith.constant 1 : index
      %c0_109 = arith.constant 0 : index
      %c0_110 = arith.constant 0 : index
      %374 = vector.load %arg2[%c1_108, %c0_109, %c0_110] : memref<2x5x192xbf16, #tpu.memory_space<vmem>>, vector<1x5x192xbf16>
      %375 = vector.shape_cast %374 : vector<1x5x192xbf16> to vector<5x192xbf16>
      %c0_111 = arith.constant 0 : index
      %c0_112 = arith.constant 0 : index
      %376 = vector.load %arg3[%c0_111, %c0_112] : memref<192x32xbf16, #tpu.memory_space<vmem>>, vector<192x32xbf16>
      %cst_113 = arith.constant dense<0.000000e+00> : vector<5x32xf32>
      %377 = tpu.matmul %375, %376, %cst_113 {dimension_numbers = #tpu.dot_dimension_numbers<[1], [0], [0], [1], [0, 0, 1, 1], [], []>} : vector<5x192xbf16>, vector<192x32xbf16>, vector<5x32xf32> -> vector<5x32xf32>
      %c0_114 = arith.constant 0 : index
      %c0_115 = arith.constant 0 : index
      %378 = vector.load %arg4[%c0_114, %c0_115] : memref<5x32xf32, #tpu.memory_space<vmem>>, vector<5x32xf32>
      %379 = arith.addf %377, %378 : vector<5x32xf32>
      %c1_116 = arith.constant 1 : index
      %c0_117 = arith.constant 0 : index
      %c0_118 = arith.constant 0 : index
      %380 = vector.load %arg11[%c1_116, %c0_117, %c0_118] : memref<2x5x32xf32, #tpu.memory_space<vmem>>, vector<1x5x32xf32>
      %381 = vector.shape_cast %380 : vector<1x5x32xf32> to vector<5x32xf32>
      %382 = vector.shape_cast %379 : vector<5x32xf32> to vector<1x5x32xf32>
      tpu.vector_store %arg11[%c1_116, %c0_117, %c0_118], %382 {strides = array<i32>} : memref<2x5x32xf32, #tpu.memory_space<vmem>>, vector<1x5x32xf32>,
    } else {
    }
    %3 = arith.index_cast %arg1 : i32 to index
    %c0 = arith.constant 0 : index
    %c0_1 = arith.constant 0 : index
    %4 = vector.load %arg5[%3, %c0, %c0_1] : memref<2x8x128xf32, #tpu.memory_space<vmem>>, vector<1x8x128xf32>
    %5 = vector.shape_cast %4 : vector<1x8x128xf32> to vector<8x128xf32>
    %6 = vector.extract_strided_slice %5 {offsets = [0, 0], sizes = [1, 32], strides = [1, 1]} : vector<8x128xf32> to vector<1x32xf32>
    %7 = vector.extract_strided_slice %5 {offsets = [1, 0], sizes = [1, 32], strides = [1, 1]} : vector<8x128xf32> to vector<1x32xf32>
    %8 = vector.extract_strided_slice %5 {offsets = [2, 0], sizes = [1, 96], strides = [1, 1]} : vector<8x128xf32> to vector<1x96xf32>
    %9 = vector.extract_strided_slice %5 {offsets = [3, 0], sizes = [1, 32], strides = [1, 1]} : vector<8x128xf32> to vector<1x32xf32>
    %10 = vector.extract_strided_slice %5 {offsets = [4, 0], sizes = [1, 32], strides = [1, 1]} : vector<8x128xf32> to vector<1x32xf32>
    %11 = vector.extract_strided_slice %5 {offsets = [5, 0], sizes = [1, 32], strides = [1, 1]} : vector<8x128xf32> to vector<1x32xf32>
    %12 = vector.extract_strided_slice %5 {offsets = [6, 0], sizes = [1, 128], strides = [1, 1]} : vector<8x128xf32> to vector<1x128xf32>
    %13 = vector.extract_strided_slice %5 {offsets = [7, 0], sizes = [1, 32], strides = [1, 1]} : vector<8x128xf32> to vector<1x32xf32>
    %14 = arith.index_cast %arg1 : i32 to index
    %c0_2 = arith.constant 0 : index
    %c0_3 = arith.constant 0 : index
    %15 = vector.load %arg6[%14, %c0_2, %c0_3] : memref<2x32x96xbf16, #tpu.memory_space<vmem>>, vector<1x32x96xbf16>
    %16 = vector.shape_cast %15 : vector<1x32x96xbf16> to vector<32x96xbf16>
    %17 = arith.index_cast %arg1 : i32 to index
    %c0_4 = arith.constant 0 : index
    %c0_5 = arith.constant 0 : index
    %18 = vector.load %arg7[%17, %c0_4, %c0_5] : memref<2x32x32xbf16, #tpu.memory_space<vmem>>, vector<1x32x32xbf16>
    %19 = vector.shape_cast %18 : vector<1x32x32xbf16> to vector<32x32xbf16>
    %20 = arith.index_cast %arg1 : i32 to index
    %c0_6 = arith.constant 0 : index
    %c0_7 = arith.constant 0 : index
    %21 = vector.load %arg8[%20, %c0_6, %c0_7] : memref<2x32x128xbf16, #tpu.memory_space<vmem>>, vector<1x32x128xbf16>
    %22 = vector.shape_cast %21 : vector<1x32x128xbf16> to vector<32x128xbf16>
    %23 = arith.index_cast %arg1 : i32 to index
    %c0_8 = arith.constant 0 : index
    %c0_9 = arith.constant 0 : index
    %24 = vector.load %arg9[%23, %c0_8, %c0_9] : memref<2x128x32xbf16, #tpu.memory_space<vmem>>, vector<1x128x32xbf16>
    %25 = vector.shape_cast %24 : vector<1x128x32xbf16> to vector<128x32xbf16>
    %c0_10 = arith.constant 0 : index
    %c0_11 = arith.constant 0 : index
    %c0_12 = arith.constant 0 : index
    %26 = vector.load %arg11[%c0_10, %c0_11, %c0_12] : memref<2x5x32xf32, #tpu.memory_space<vmem>>, vector<1x5x32xf32>
    %27 = vector.shape_cast %26 : vector<1x5x32xf32> to vector<5x32xf32>
    %cst = arith.constant dense<0.000000e+00> : vector<5xf32>
    %28 = vector.multi_reduction <add>, %27, %cst [1] : vector<5x32xf32> to vector<5xf32>
    %29 = vector.shape_cast %28 : vector<5xf32> to vector<5x1xf32>
    %cst_13 = arith.constant 3.200000e+01 : f32
    %30 = vector.broadcast %cst_13 : f32 to vector<5x1xf32>
    %31 = arith.divf %29, %30 : vector<5x1xf32>
    %32 = vector.broadcast %31 : vector<5x1xf32> to vector<5x32xf32>
    %33 = arith.subf %27, %32 : vector<5x32xf32>
    %34 = arith.mulf %33, %33 : vector<5x32xf32>
    %cst_14 = arith.constant dense<0.000000e+00> : vector<5xf32>
    %35 = vector.multi_reduction <add>, %34, %cst_14 [1] : vector<5x32xf32> to vector<5xf32>
    %36 = vector.shape_cast %35 : vector<5xf32> to vector<5x1xf32>
    %cst_15 = arith.constant 3.200000e+01 : f32
    %37 = vector.broadcast %cst_15 : f32 to vector<5x1xf32>
    %38 = arith.divf %36, %37 : vector<5x1xf32>
    %39 = vector.broadcast %31 : vector<5x1xf32> to vector<5x32xf32>
    %40 = arith.subf %27, %39 : vector<5x32xf32>
    %cst_16 = arith.constant 9.99999997E-7 : f32
    %41 = vector.broadcast %cst_16 : f32 to vector<5x1xf32>
    %42 = arith.addf %38, %41 : vector<5x1xf32>
    %43 = math.rsqrt %42 : vector<5x1xf32>
    %44 = vector.broadcast %43 : vector<5x1xf32> to vector<5x32xf32>
    %45 = arith.mulf %40, %44 : vector<5x32xf32>
    %46 = vector.broadcast %6 : vector<1x32xf32> to vector<5x32xf32>
    %47 = arith.mulf %45, %46 : vector<5x32xf32>
    %48 = vector.broadcast %7 : vector<1x32xf32> to vector<5x32xf32>
    %49 = arith.addf %47, %48 : vector<5x32xf32>
    %50 = arith.truncf %49 : vector<5x32xf32> to vector<5x32xbf16>
    %cst_17 = arith.constant dense<0.000000e+00> : vector<5x96xf32>
    %51 = tpu.matmul %50, %16, %cst_17 {dimension_numbers = #tpu.dot_dimension_numbers<[1], [0], [0], [1], [0, 0, 1, 1], [], []>} : vector<5x32xbf16>, vector<32x96xbf16>, vector<5x96xf32> -> vector<5x96xf32>
    %52 = vector.broadcast %8 : vector<1x96xf32> to vector<5x96xf32>
    %53 = arith.addf %51, %52 : vector<5x96xf32>
    %54 = vector.extract_strided_slice %53 {offsets = [0, 0], sizes = [5, 32], strides = [1, 1]} : vector<5x96xf32> to vector<5x32xf32>
    %55 = vector.extract_strided_slice %53 {offsets = [0, 32], sizes = [5, 32], strides = [1, 1]} : vector<5x96xf32> to vector<5x32xf32>
    %56 = vector.extract_strided_slice %53 {offsets = [0, 64], sizes = [5, 32], strides = [1, 1]} : vector<5x96xf32> to vector<5x32xf32>
    %57 = vector.extract_strided_slice %54 {offsets = [0, 0], sizes = [5, 8], strides = [1, 1]} : vector<5x32xf32> to vector<5x8xf32>
    %58 = arith.truncf %57 : vector<5x8xf32> to vector<5x8xbf16>
    %59 = vector.extract_strided_slice %55 {offsets = [0, 0], sizes = [5, 8], strides = [1, 1]} : vector<5x32xf32> to vector<5x8xf32>
    %60 = arith.truncf %59 : vector<5x8xf32> to vector<5x8xbf16>
    %61 = vector.extract_strided_slice %56 {offsets = [0, 0], sizes = [5, 8], strides = [1, 1]} : vector<5x32xf32> to vector<5x8xf32>
    %62 = arith.truncf %61 : vector<5x8xf32> to vector<5x8xbf16>
    "tpu.trace_start"() <{level = 10 : i32, message = "qd,kd->qk"}> : () -> ()
    %cst_18 = arith.constant dense<0.000000e+00> : vector<5x5xf32>
    %63 = tpu.matmul %58, %60, %cst_18 {dimension_numbers = #tpu.dot_dimension_numbers<[1], [1], [0], [0], [0, 0, 1, 0], [], []>} : vector<5x8xbf16>, vector<5x8xbf16>, vector<5x5xf32> -> vector<5x5xf32>
    "tpu.trace_stop"() : () -> ()
    %cst_19 = arith.constant 0.353553385 : f32
    %64 = vector.broadcast %cst_19 : f32 to vector<5x5xf32>
    %65 = arith.mulf %63, %64 : vector<5x5xf32>
    %cst_20 = arith.constant dense<0xFF800000> : vector<5xf32>
    %66 = vector.multi_reduction <maximumf>, %65, %cst_20 [1] : vector<5x5xf32> to vector<5xf32>
    %67 = vector.shape_cast %66 : vector<5xf32> to vector<5x1xf32>
    %68 = vector.broadcast %67 : vector<5x1xf32> to vector<5x5xf32>
    %69 = arith.subf %65, %68 : vector<5x5xf32>
    %70 = math.exp %69 : vector<5x5xf32>
    %cst_21 = arith.constant dense<0.000000e+00> : vector<5xf32>
    %71 = vector.multi_reduction <add>, %70, %cst_21 [1] : vector<5x5xf32> to vector<5xf32>
    %72 = vector.shape_cast %71 : vector<5xf32> to vector<5x1xf32>
    %73 = tpu.reciprocal %72 {approx = true} : vector<5x1xf32> -> vector<5x1xf32>
    %74 = vector.broadcast %73 : vector<5x1xf32> to vector<5x5xf32>
    %75 = arith.mulf %70, %74 : vector<5x5xf32>
    %76 = arith.truncf %75 : vector<5x5xf32> to vector<5x5xbf16>
    "tpu.trace_start"() <{level = 10 : i32, message = "qk,kd->qd"}> : () -> ()
    %cst_22 = arith.constant dense<0.000000e+00> : vector<5x8xf32>
    %77 = tpu.matmul %76, %62, %cst_22 {dimension_numbers = #tpu.dot_dimension_numbers<[1], [0], [0], [1], [0, 0, 1, 1], [], []>} : vector<5x5xbf16>, vector<5x8xbf16>, vector<5x8xf32> -> vector<5x8xf32>
    "tpu.trace_stop"() : () -> ()
    %78 = vector.extract_strided_slice %54 {offsets = [0, 8], sizes = [5, 8], strides = [1, 1]} : vector<5x32xf32> to vector<5x8xf32>
    %79 = arith.truncf %78 : vector<5x8xf32> to vector<5x8xbf16>
    %80 = vector.extract_strided_slice %55 {offsets = [0, 8], sizes = [5, 8], strides = [1, 1]} : vector<5x32xf32> to vector<5x8xf32>
    %81 = arith.truncf %80 : vector<5x8xf32> to vector<5x8xbf16>
    %82 = vector.extract_strided_slice %56 {offsets = [0, 8], sizes = [5, 8], strides = [1, 1]} : vector<5x32xf32> to vector<5x8xf32>
    %83 = arith.truncf %82 : vector<5x8xf32> to vector<5x8xbf16>
    "tpu.trace_start"() <{level = 10 : i32, message = "qd,kd->qk"}> : () -> ()
    %cst_23 = arith.constant dense<0.000000e+00> : vector<5x5xf32>
    %84 = tpu.matmul %79, %81, %cst_23 {dimension_numbers = #tpu.dot_dimension_numbers<[1], [1], [0], [0], [0, 0, 1, 0], [], []>} : vector<5x8xbf16>, vector<5x8xbf16>, vector<5x5xf32> -> vector<5x5xf32>
    "tpu.trace_stop"() : () -> ()
    %cst_24 = arith.constant 0.353553385 : f32
    %85 = vector.broadcast %cst_24 : f32 to vector<5x5xf32>
    %86 = arith.mulf %84, %85 : vector<5x5xf32>
    %cst_25 = arith.constant dense<0xFF800000> : vector<5xf32>
    %87 = vector.multi_reduction <maximumf>, %86, %cst_25 [1] : vector<5x5xf32> to vector<5xf32>
    %88 = vector.shape_cast %87 : vector<5xf32> to vector<5x1xf32>
    %89 = vector.broadcast %88 : vector<5x1xf32> to vector<5x5xf32>
    %90 = arith.subf %86, %89 : vector<5x5xf32>
    %91 = math.exp %90 : vector<5x5xf32>
    %cst_26 = arith.constant dense<0.000000e+00> : vector<5xf32>
    %92 = vector.multi_reduction <add>, %91, %cst_26 [1] : vector<5x5xf32> to vector<5xf32>
    %93 = vector.shape_cast %92 : vector<5xf32> to vector<5x1xf32>
    %94 = tpu.reciprocal %93 {approx = true} : vector<5x1xf32> -> vector<5x1xf32>
    %95 = vector.broadcast %94 : vector<5x1xf32> to vector<5x5xf32>
    %96 = arith.mulf %91, %95 : vector<5x5xf32>
    %97 = arith.truncf %96 : vector<5x5xf32> to vector<5x5xbf16>
    "tpu.trace_start"() <{level = 10 : i32, message = "qk,kd->qd"}> : () -> ()
    %cst_27 = arith.constant dense<0.000000e+00> : vector<5x8xf32>
    %98 = tpu.matmul %97, %83, %cst_27 {dimension_numbers = #tpu.dot_dimension_numbers<[1], [0], [0], [1], [0, 0, 1, 1], [], []>} : vector<5x5xbf16>, vector<5x8xbf16>, vector<5x8xf32> -> vector<5x8xf32>
    "tpu.trace_stop"() : () -> ()
    %99 = vector.extract_strided_slice %54 {offsets = [0, 16], sizes = [5, 8], strides = [1, 1]} : vector<5x32xf32> to vector<5x8xf32>
    %100 = arith.truncf %99 : vector<5x8xf32> to vector<5x8xbf16>
    %101 = vector.extract_strided_slice %55 {offsets = [0, 16], sizes = [5, 8], strides = [1, 1]} : vector<5x32xf32> to vector<5x8xf32>
    %102 = arith.truncf %101 : vector<5x8xf32> to vector<5x8xbf16>
    %103 = vector.extract_strided_slice %56 {offsets = [0, 16], sizes = [5, 8], strides = [1, 1]} : vector<5x32xf32> to vector<5x8xf32>
    %104 = arith.truncf %103 : vector<5x8xf32> to vector<5x8xbf16>
    "tpu.trace_start"() <{level = 10 : i32, message = "qd,kd->qk"}> : () -> ()
    %cst_28 = arith.constant dense<0.000000e+00> : vector<5x5xf32>
    %105 = tpu.matmul %100, %102, %cst_28 {dimension_numbers = #tpu.dot_dimension_numbers<[1], [1], [0], [0], [0, 0, 1, 0], [], []>} : vector<5x8xbf16>, vector<5x8xbf16>, vector<5x5xf32> -> vector<5x5xf32>
    "tpu.trace_stop"() : () -> ()
    %cst_29 = arith.constant 0.353553385 : f32
    %106 = vector.broadcast %cst_29 : f32 to vector<5x5xf32>
    %107 = arith.mulf %105, %106 : vector<5x5xf32>
    %cst_30 = arith.constant dense<0xFF800000> : vector<5xf32>
    %108 = vector.multi_reduction <maximumf>, %107, %cst_30 [1] : vector<5x5xf32> to vector<5xf32>
    %109 = vector.shape_cast %108 : vector<5xf32> to vector<5x1xf32>
    %110 = vector.broadcast %109 : vector<5x1xf32> to vector<5x5xf32>
    %111 = arith.subf %107, %110 : vector<5x5xf32>
    %112 = math.exp %111 : vector<5x5xf32>
    %cst_31 = arith.constant dense<0.000000e+00> : vector<5xf32>
    %113 = vector.multi_reduction <add>, %112, %cst_31 [1] : vector<5x5xf32> to vector<5xf32>
    %114 = vector.shape_cast %113 : vector<5xf32> to vector<5x1xf32>
    %115 = tpu.reciprocal %114 {approx = true} : vector<5x1xf32> -> vector<5x1xf32>
    %116 = vector.broadcast %115 : vector<5x1xf32> to vector<5x5xf32>
    %117 = arith.mulf %112, %116 : vector<5x5xf32>
    %118 = arith.truncf %117 : vector<5x5xf32> to vector<5x5xbf16>
    "tpu.trace_start"() <{level = 10 : i32, message = "qk,kd->qd"}> : () -> ()
    %cst_32 = arith.constant dense<0.000000e+00> : vector<5x8xf32>
    %119 = tpu.matmul %118, %104, %cst_32 {dimension_numbers = #tpu.dot_dimension_numbers<[1], [0], [0], [1], [0, 0, 1, 1], [], []>} : vector<5x5xbf16>, vector<5x8xbf16>, vector<5x8xf32> -> vector<5x8xf32>
    "tpu.trace_stop"() : () -> ()
    %120 = vector.extract_strided_slice %54 {offsets = [0, 24], sizes = [5, 8], strides = [1, 1]} : vector<5x32xf32> to vector<5x8xf32>
    %121 = arith.truncf %120 : vector<5x8xf32> to vector<5x8xbf16>
    %122 = vector.extract_strided_slice %55 {offsets = [0, 24], sizes = [5, 8], strides = [1, 1]} : vector<5x32xf32> to vector<5x8xf32>
    %123 = arith.truncf %122 : vector<5x8xf32> to vector<5x8xbf16>
    %124 = vector.extract_strided_slice %56 {offsets = [0, 24], sizes = [5, 8], strides = [1, 1]} : vector<5x32xf32> to vector<5x8xf32>
    %125 = arith.truncf %124 : vector<5x8xf32> to vector<5x8xbf16>
    "tpu.trace_start"() <{level = 10 : i32, message = "qd,kd->qk"}> : () -> ()
    %cst_33 = arith.constant dense<0.000000e+00> : vector<5x5xf32>
    %126 = tpu.matmul %121, %123, %cst_33 {dimension_numbers = #tpu.dot_dimension_numbers<[1], [1], [0], [0], [0, 0, 1, 0], [], []>} : vector<5x8xbf16>, vector<5x8xbf16>, vector<5x5xf32> -> vector<5x5xf32>
    "tpu.trace_stop"() : () -> ()
    %cst_34 = arith.constant 0.353553385 : f32
    %127 = vector.broadcast %cst_34 : f32 to vector<5x5xf32>
    %128 = arith.mulf %126, %127 : vector<5x5xf32>
    %cst_35 = arith.constant dense<0xFF800000> : vector<5xf32>
    %129 = vector.multi_reduction <maximumf>, %128, %cst_35 [1] : vector<5x5xf32> to vector<5xf32>
    %130 = vector.shape_cast %129 : vector<5xf32> to vector<5x1xf32>
    %131 = vector.broadcast %130 : vector<5x1xf32> to vector<5x5xf32>
    %132 = arith.subf %128, %131 : vector<5x5xf32>
    %133 = math.exp %132 : vector<5x5xf32>
    %cst_36 = arith.constant dense<0.000000e+00> : vector<5xf32>
    %134 = vector.multi_reduction <add>, %133, %cst_36 [1] : vector<5x5xf32> to vector<5xf32>
    %135 = vector.shape_cast %134 : vector<5xf32> to vector<5x1xf32>
    %136 = tpu.reciprocal %135 {approx = true} : vector<5x1xf32> -> vector<5x1xf32>
    %137 = vector.broadcast %136 : vector<5x1xf32> to vector<5x5xf32>
    %138 = arith.mulf %133, %137 : vector<5x5xf32>
    %139 = arith.truncf %138 : vector<5x5xf32> to vector<5x5xbf16>
    "tpu.trace_start"() <{level = 10 : i32, message = "qk,kd->qd"}> : () -> ()
    %cst_37 = arith.constant dense<0.000000e+00> : vector<5x8xf32>
    %140 = tpu.matmul %139, %125, %cst_37 {dimension_numbers = #tpu.dot_dimension_numbers<[1], [0], [0], [1], [0, 0, 1, 1], [], []>} : vector<5x5xbf16>, vector<5x8xbf16>, vector<5x8xf32> -> vector<5x8xf32>
    "tpu.trace_stop"() : () -> ()
    %141 = tpu.concatenate %77, %98, %119, %140 in 1 : vector<5x8xf32>, vector<5x8xf32>, vector<5x8xf32>, vector<5x8xf32> -> vector<5x32xf32>
    %142 = arith.truncf %141 : vector<5x32xf32> to vector<5x32xbf16>
    %cst_38 = arith.constant dense<0.000000e+00> : vector<5x32xf32>
    %143 = tpu.matmul %142, %19, %cst_38 {dimension_numbers = #tpu.dot_dimension_numbers<[1], [0], [0], [1], [0, 0, 1, 1], [], []>} : vector<5x32xbf16>, vector<32x32xbf16>, vector<5x32xf32> -> vector<5x32xf32>
    %144 = vector.broadcast %9 : vector<1x32xf32> to vector<5x32xf32>
    %145 = arith.addf %143, %144 : vector<5x32xf32>
    %146 = arith.addf %27, %145 : vector<5x32xf32>
    %cst_39 = arith.constant dense<0.000000e+00> : vector<5xf32>
    %147 = vector.multi_reduction <add>, %146, %cst_39 [1] : vector<5x32xf32> to vector<5xf32>
    %148 = vector.shape_cast %147 : vector<5xf32> to vector<5x1xf32>
    %cst_40 = arith.constant 3.200000e+01 : f32
    %149 = vector.broadcast %cst_40 : f32 to vector<5x1xf32>
    %150 = arith.divf %148, %149 : vector<5x1xf32>
    %151 = vector.broadcast %150 : vector<5x1xf32> to vector<5x32xf32>
    %152 = arith.subf %146, %151 : vector<5x32xf32>
    %153 = arith.mulf %152, %152 : vector<5x32xf32>
    %cst_41 = arith.constant dense<0.000000e+00> : vector<5xf32>
    %154 = vector.multi_reduction <add>, %153, %cst_41 [1] : vector<5x32xf32> to vector<5xf32>
    %155 = vector.shape_cast %154 : vector<5xf32> to vector<5x1xf32>
    %cst_42 = arith.constant 3.200000e+01 : f32
    %156 = vector.broadcast %cst_42 : f32 to vector<5x1xf32>
    %157 = arith.divf %155, %156 : vector<5x1xf32>
    %158 = vector.broadcast %150 : vector<5x1xf32> to vector<5x32xf32>
    %159 = arith.subf %146, %158 : vector<5x32xf32>
    %cst_43 = arith.constant 9.99999997E-7 : f32
    %160 = vector.broadcast %cst_43 : f32 to vector<5x1xf32>
    %161 = arith.addf %157, %160 : vector<5x1xf32>
    %162 = math.rsqrt %161 : vector<5x1xf32>
    %163 = vector.broadcast %162 : vector<5x1xf32> to vector<5x32xf32>
    %164 = arith.mulf %159, %163 : vector<5x32xf32>
    %165 = vector.broadcast %10 : vector<1x32xf32> to vector<5x32xf32>
    %166 = arith.mulf %164, %165 : vector<5x32xf32>
    %167 = vector.broadcast %11 : vector<1x32xf32> to vector<5x32xf32>
    %168 = arith.addf %166, %167 : vector<5x32xf32>
    %169 = arith.truncf %168 : vector<5x32xf32> to vector<5x32xbf16>
    %cst_44 = arith.constant dense<0.000000e+00> : vector<5x128xf32>
    %170 = tpu.matmul %169, %22, %cst_44 {dimension_numbers = #tpu.dot_dimension_numbers<[1], [0], [0], [1], [0, 0, 1, 1], [], []>} : vector<5x32xbf16>, vector<32x128xbf16>, vector<5x128xf32> -> vector<5x128xf32>
    %171 = vector.broadcast %12 : vector<1x128xf32> to vector<5x128xf32>
    %172 = arith.addf %170, %171 : vector<5x128xf32>
    %173 = arith.mulf %172, %172 : vector<5x128xf32>
    %174 = arith.mulf %172, %173 : vector<5x128xf32>
    %cst_45 = arith.constant 4.471500e-02 : f32
    %175 = vector.broadcast %cst_45 : f32 to vector<5x128xf32>
    %176 = arith.mulf %175, %174 : vector<5x128xf32>
    %177 = arith.addf %172, %176 : vector<5x128xf32>
    %cst_46 = arith.constant 0.797884583 : f32
    %178 = vector.broadcast %cst_46 : f32 to vector<5x128xf32>
    %179 = arith.mulf %178, %177 : vector<5x128xf32>
    %180 = math.tanh %179 : vector<5x128xf32>
    %cst_47 = arith.constant 1.000000e+00 : f32
    %181 = vector.broadcast %cst_47 : f32 to vector<5x128xf32>
    %182 = arith.addf %181, %180 : vector<5x128xf32>
    %cst_48 = arith.constant 5.000000e-01 : f32
    %183 = vector.broadcast %cst_48 : f32 to vector<5x128xf32>
    %184 = arith.mulf %183, %182 : vector<5x128xf32>
    %185 = arith.mulf %172, %184 : vector<5x128xf32>
    %186 = arith.truncf %185 : vector<5x128xf32> to vector<5x128xbf16>
    %cst_49 = arith.constant dense<0.000000e+00> : vector<5x32xf32>
    %187 = tpu.matmul %186, %25, %cst_49 {dimension_numbers = #tpu.dot_dimension_numbers<[1], [0], [0], [1], [0, 0, 1, 1], [], []>} : vector<5x128xbf16>, vector<128x32xbf16>, vector<5x32xf32> -> vector<5x32xf32>
    %188 = vector.broadcast %13 : vector<1x32xf32> to vector<5x32xf32>
    %189 = arith.addf %187, %188 : vector<5x32xf32>
    %190 = arith.addf %146, %189 : vector<5x32xf32>
    %c0_50 = arith.constant 0 : index
    %c0_51 = arith.constant 0 : index
    %c0_52 = arith.constant 0 : index
    %191 = vector.load %arg11[%c0_50, %c0_51, %c0_52] : memref<2x5x32xf32, #tpu.memory_space<vmem>>, vector<1x5x32xf32>
    %192 = vector.shape_cast %191 : vector<1x5x32xf32> to vector<5x32xf32>
    %193 = vector.shape_cast %190 : vector<5x32xf32> to vector<1x5x32xf32>
    tpu.vector_store %arg11[%c0_50, %c0_51, %c0_52], %193 {strides = array<i32>} : memref<2x5x32xf32, #tpu.memory_space<vmem>>, vector<1x5x32xf32>,
    %c1 = arith.constant 1 : index
    %c0_53 = arith.constant 0 : index
    %c0_54 = arith.constant 0 : index
    %194 = vector.load %arg11[%c1, %c0_53, %c0_54] : memref<2x5x32xf32, #tpu.memory_space<vmem>>, vector<1x5x32xf32>
    %195 = vector.shape_cast %194 : vector<1x5x32xf32> to vector<5x32xf32>
    %cst_55 = arith.constant dense<0.000000e+00> : vector<5xf32>
    %196 = vector.multi_reduction <add>, %195, %cst_55 [1] : vector<5x32xf32> to vector<5xf32>
    %197 = vector.shape_cast %196 : vector<5xf32> to vector<5x1xf32>
    %cst_56 = arith.constant 3.200000e+01 : f32
    %198 = vector.broadcast %cst_56 : f32 to vector<5x1xf32>
    %199 = arith.divf %197, %198 : vector<5x1xf32>
    %200 = vector.broadcast %199 : vector<5x1xf32> to vector<5x32xf32>
    %201 = arith.subf %195, %200 : vector<5x32xf32>
    %202 = arith.mulf %201, %201 : vector<5x32xf32>
    %cst_57 = arith.constant dense<0.000000e+00> : vector<5xf32>
    %203 = vector.multi_reduction <add>, %202, %cst_57 [1] : vector<5x32xf32> to vector<5xf32>
    %204 = vector.shape_cast %203 : vector<5xf32> to vector<5x1xf32>
    %cst_58 = arith.constant 3.200000e+01 : f32
    %205 = vector.broadcast %cst_58 : f32 to vector<5x1xf32>
    %206 = arith.divf %204, %205 : vector<5x1xf32>
    %207 = vector.broadcast %199 : vector<5x1xf32> to vector<5x32xf32>
    %208 = arith.subf %195, %207 : vector<5x32xf32>
    %cst_59 = arith.constant 9.99999997E-7 : f32
    %209 = vector.broadcast %cst_59 : f32 to vector<5x1xf32>
    %210 = arith.addf %206, %209 : vector<5x1xf32>
    %211 = math.rsqrt %210 : vector<5x1xf32>
    %212 = vector.broadcast %211 : vector<5x1xf32> to vector<5x32xf32>
    %213 = arith.mulf %208, %212 : vector<5x32xf32>
    %214 = vector.broadcast %6 : vector<1x32xf32> to vector<5x32xf32>
    %215 = arith.mulf %213, %214 : vector<5x32xf32>
    %216 = vector.broadcast %7 : vector<1x32xf32> to vector<5x32xf32>
    %217 = arith.addf %215, %216 : vector<5x32xf32>
    %218 = arith.truncf %217 : vector<5x32xf32> to vector<5x32xbf16>
    %cst_60 = arith.constant dense<0.000000e+00> : vector<5x96xf32>
    %219 = tpu.matmul %218, %16, %cst_60 {dimension_numbers = #tpu.dot_dimension_numbers<[1], [0], [0], [1], [0, 0, 1, 1], [], []>} : vector<5x32xbf16>, vector<32x96xbf16>, vector<5x96xf32> -> vector<5x96xf32>
    %220 = vector.broadcast %8 : vector<1x96xf32> to vector<5x96xf32>
    %221 = arith.addf %219, %220 : vector<5x96xf32>
    %222 = vector.extract_strided_slice %221 {offsets = [0, 0], sizes = [5, 32], strides = [1, 1]} : vector<5x96xf32> to vector<5x32xf32>
    %223 = vector.extract_strided_slice %221 {offsets = [0, 32], sizes = [5, 32], strides = [1, 1]} : vector<5x96xf32> to vector<5x32xf32>
    %224 = vector.extract_strided_slice %221 {offsets = [0, 64], sizes = [5, 32], strides = [1, 1]} : vector<5x96xf32> to vector<5x32xf32>
    %225 = vector.extract_strided_slice %222 {offsets = [0, 0], sizes = [5, 8], strides = [1, 1]} : vector<5x32xf32> to vector<5x8xf32>
    %226 = arith.truncf %225 : vector<5x8xf32> to vector<5x8xbf16>
    %227 = vector.extract_strided_slice %223 {offsets = [0, 0], sizes = [5, 8], strides = [1, 1]} : vector<5x32xf32> to vector<5x8xf32>
    %228 = arith.truncf %227 : vector<5x8xf32> to vector<5x8xbf16>
    %229 = vector.extract_strided_slice %224 {offsets = [0, 0], sizes = [5, 8], strides = [1, 1]} : vector<5x32xf32> to vector<5x8xf32>
    %230 = arith.truncf %229 : vector<5x8xf32> to vector<5x8xbf16>
    "tpu.trace_start"() <{level = 10 : i32, message = "qd,kd->qk"}> : () -> ()
    %cst_61 = arith.constant dense<0.000000e+00> : vector<5x5xf32>
    %231 = tpu.matmul %226, %228, %cst_61 {dimension_numbers = #tpu.dot_dimension_numbers<[1], [1], [0], [0], [0, 0, 1, 0], [], []>} : vector<5x8xbf16>, vector<5x8xbf16>, vector<5x5xf32> -> vector<5x5xf32>
    "tpu.trace_stop"() : () -> ()
    %cst_62 = arith.constant 0.353553385 : f32
    %232 = vector.broadcast %cst_62 : f32 to vector<5x5xf32>
    %233 = arith.mulf %231, %232 : vector<5x5xf32>
    %cst_63 = arith.constant dense<0xFF800000> : vector<5xf32>
    %234 = vector.multi_reduction <maximumf>, %233, %cst_63 [1] : vector<5x5xf32> to vector<5xf32>
    %235 = vector.shape_cast %234 : vector<5xf32> to vector<5x1xf32>
    %236 = vector.broadcast %235 : vector<5x1xf32> to vector<5x5xf32>
    %237 = arith.subf %233, %236 : vector<5x5xf32>
    %238 = math.exp %237 : vector<5x5xf32>
    %cst_64 = arith.constant dense<0.000000e+00> : vector<5xf32>
    %239 = vector.multi_reduction <add>, %238, %cst_64 [1] : vector<5x5xf32> to vector<5xf32>
    %240 = vector.shape_cast %239 : vector<5xf32> to vector<5x1xf32>
    %241 = tpu.reciprocal %240 {approx = true} : vector<5x1xf32> -> vector<5x1xf32>
    %242 = vector.broadcast %241 : vector<5x1xf32> to vector<5x5xf32>
    %243 = arith.mulf %238, %242 : vector<5x5xf32>
    %244 = arith.truncf %243 : vector<5x5xf32> to vector<5x5xbf16>
    "tpu.trace_start"() <{level = 10 : i32, message = "qk,kd->qd"}> : () -> ()
    %cst_65 = arith.constant dense<0.000000e+00> : vector<5x8xf32>
    %245 = tpu.matmul %244, %230, %cst_65 {dimension_numbers = #tpu.dot_dimension_numbers<[1], [0], [0], [1], [0, 0, 1, 1], [], []>} : vector<5x5xbf16>, vector<5x8xbf16>, vector<5x8xf32> -> vector<5x8xf32>
    "tpu.trace_stop"() : () -> ()
    %246 = vector.extract_strided_slice %222 {offsets = [0, 8], sizes = [5, 8], strides = [1, 1]} : vector<5x32xf32> to vector<5x8xf32>
    %247 = arith.truncf %246 : vector<5x8xf32> to vector<5x8xbf16>
    %248 = vector.extract_strided_slice %223 {offsets = [0, 8], sizes = [5, 8], strides = [1, 1]} : vector<5x32xf32> to vector<5x8xf32>
    %249 = arith.truncf %248 : vector<5x8xf32> to vector<5x8xbf16>
    %250 = vector.extract_strided_slice %224 {offsets = [0, 8], sizes = [5, 8], strides = [1, 1]} : vector<5x32xf32> to vector<5x8xf32>
    %251 = arith.truncf %250 : vector<5x8xf32> to vector<5x8xbf16>
    "tpu.trace_start"() <{level = 10 : i32, message = "qd,kd->qk"}> : () -> ()
    %cst_66 = arith.constant dense<0.000000e+00> : vector<5x5xf32>
    %252 = tpu.matmul %247, %249, %cst_66 {dimension_numbers = #tpu.dot_dimension_numbers<[1], [1], [0], [0], [0, 0, 1, 0], [], []>} : vector<5x8xbf16>, vector<5x8xbf16>, vector<5x5xf32> -> vector<5x5xf32>
    "tpu.trace_stop"() : () -> ()
    %cst_67 = arith.constant 0.353553385 : f32
    %253 = vector.broadcast %cst_67 : f32 to vector<5x5xf32>
    %254 = arith.mulf %252, %253 : vector<5x5xf32>
    %cst_68 = arith.constant dense<0xFF800000> : vector<5xf32>
    %255 = vector.multi_reduction <maximumf>, %254, %cst_68 [1] : vector<5x5xf32> to vector<5xf32>
    %256 = vector.shape_cast %255 : vector<5xf32> to vector<5x1xf32>
    %257 = vector.broadcast %256 : vector<5x1xf32> to vector<5x5xf32>
    %258 = arith.subf %254, %257 : vector<5x5xf32>
    %259 = math.exp %258 : vector<5x5xf32>
    %cst_69 = arith.constant dense<0.000000e+00> : vector<5xf32>
    %260 = vector.multi_reduction <add>, %259, %cst_69 [1] : vector<5x5xf32> to vector<5xf32>
    %261 = vector.shape_cast %260 : vector<5xf32> to vector<5x1xf32>
    %262 = tpu.reciprocal %261 {approx = true} : vector<5x1xf32> -> vector<5x1xf32>
    %263 = vector.broadcast %262 : vector<5x1xf32> to vector<5x5xf32>
    %264 = arith.mulf %259, %263 : vector<5x5xf32>
    %265 = arith.truncf %264 : vector<5x5xf32> to vector<5x5xbf16>
    "tpu.trace_start"() <{level = 10 : i32, message = "qk,kd->qd"}> : () -> ()
    %cst_70 = arith.constant dense<0.000000e+00> : vector<5x8xf32>
    %266 = tpu.matmul %265, %251, %cst_70 {dimension_numbers = #tpu.dot_dimension_numbers<[1], [0], [0], [1], [0, 0, 1, 1], [], []>} : vector<5x5xbf16>, vector<5x8xbf16>, vector<5x8xf32> -> vector<5x8xf32>
    "tpu.trace_stop"() : () -> ()
    %267 = vector.extract_strided_slice %222 {offsets = [0, 16], sizes = [5, 8], strides = [1, 1]} : vector<5x32xf32> to vector<5x8xf32>
    %268 = arith.truncf %267 : vector<5x8xf32> to vector<5x8xbf16>
    %269 = vector.extract_strided_slice %223 {offsets = [0, 16], sizes = [5, 8], strides = [1, 1]} : vector<5x32xf32> to vector<5x8xf32>
    %270 = arith.truncf %269 : vector<5x8xf32> to vector<5x8xbf16>
    %271 = vector.extract_strided_slice %224 {offsets = [0, 16], sizes = [5, 8], strides = [1, 1]} : vector<5x32xf32> to vector<5x8xf32>
    %272 = arith.truncf %271 : vector<5x8xf32> to vector<5x8xbf16>
    "tpu.trace_start"() <{level = 10 : i32, message = "qd,kd->qk"}> : () -> ()
    %cst_71 = arith.constant dense<0.000000e+00> : vector<5x5xf32>
    %273 = tpu.matmul %268, %270, %cst_71 {dimension_numbers = #tpu.dot_dimension_numbers<[1], [1], [0], [0], [0, 0, 1, 0], [], []>} : vector<5x8xbf16>, vector<5x8xbf16>, vector<5x5xf32> -> vector<5x5xf32>
    "tpu.trace_stop"() : () -> ()
    %cst_72 = arith.constant 0.353553385 : f32
    %274 = vector.broadcast %cst_72 : f32 to vector<5x5xf32>
    %275 = arith.mulf %273, %274 : vector<5x5xf32>
    %cst_73 = arith.constant dense<0xFF800000> : vector<5xf32>
    %276 = vector.multi_reduction <maximumf>, %275, %cst_73 [1] : vector<5x5xf32> to vector<5xf32>
    %277 = vector.shape_cast %276 : vector<5xf32> to vector<5x1xf32>
    %278 = vector.broadcast %277 : vector<5x1xf32> to vector<5x5xf32>
    %279 = arith.subf %275, %278 : vector<5x5xf32>
    %280 = math.exp %279 : vector<5x5xf32>
    %cst_74 = arith.constant dense<0.000000e+00> : vector<5xf32>
    %281 = vector.multi_reduction <add>, %280, %cst_74 [1] : vector<5x5xf32> to vector<5xf32>
    %282 = vector.shape_cast %281 : vector<5xf32> to vector<5x1xf32>
    %283 = tpu.reciprocal %282 {approx = true} : vector<5x1xf32> -> vector<5x1xf32>
    %284 = vector.broadcast %283 : vector<5x1xf32> to vector<5x5xf32>
    %285 = arith.mulf %280, %284 : vector<5x5xf32>
    %286 = arith.truncf %285 : vector<5x5xf32> to vector<5x5xbf16>
    "tpu.trace_start"() <{level = 10 : i32, message = "qk,kd->qd"}> : () -> ()
    %cst_75 = arith.constant dense<0.000000e+00> : vector<5x8xf32>
    %287 = tpu.matmul %286, %272, %cst_75 {dimension_numbers = #tpu.dot_dimension_numbers<[1], [0], [0], [1], [0, 0, 1, 1], [], []>} : vector<5x5xbf16>, vector<5x8xbf16>, vector<5x8xf32> -> vector<5x8xf32>
    "tpu.trace_stop"() : () -> ()
    %288 = vector.extract_strided_slice %222 {offsets = [0, 24], sizes = [5, 8], strides = [1, 1]} : vector<5x32xf32> to vector<5x8xf32>
    %289 = arith.truncf %288 : vector<5x8xf32> to vector<5x8xbf16>
    %290 = vector.extract_strided_slice %223 {offsets = [0, 24], sizes = [5, 8], strides = [1, 1]} : vector<5x32xf32> to vector<5x8xf32>
    %291 = arith.truncf %290 : vector<5x8xf32> to vector<5x8xbf16>
    %292 = vector.extract_strided_slice %224 {offsets = [0, 24], sizes = [5, 8], strides = [1, 1]} : vector<5x32xf32> to vector<5x8xf32>
    %293 = arith.truncf %292 : vector<5x8xf32> to vector<5x8xbf16>
    "tpu.trace_start"() <{level = 10 : i32, message = "qd,kd->qk"}> : () -> ()
    %cst_76 = arith.constant dense<0.000000e+00> : vector<5x5xf32>
    %294 = tpu.matmul %289, %291, %cst_76 {dimension_numbers = #tpu.dot_dimension_numbers<[1], [1], [0], [0], [0, 0, 1, 0], [], []>} : vector<5x8xbf16>, vector<5x8xbf16>, vector<5x5xf32> -> vector<5x5xf32>
    "tpu.trace_stop"() : () -> ()
    %cst_77 = arith.constant 0.353553385 : f32
    %295 = vector.broadcast %cst_77 : f32 to vector<5x5xf32>
    %296 = arith.mulf %294, %295 : vector<5x5xf32>
    %cst_78 = arith.constant dense<0xFF800000> : vector<5xf32>
    %297 = vector.multi_reduction <maximumf>, %296, %cst_78 [1] : vector<5x5xf32> to vector<5xf32>
    %298 = vector.shape_cast %297 : vector<5xf32> to vector<5x1xf32>
    %299 = vector.broadcast %298 : vector<5x1xf32> to vector<5x5xf32>
    %300 = arith.subf %296, %299 : vector<5x5xf32>
    %301 = math.exp %300 : vector<5x5xf32>
    %cst_79 = arith.constant dense<0.000000e+00> : vector<5xf32>
    %302 = vector.multi_reduction <add>, %301, %cst_79 [1] : vector<5x5xf32> to vector<5xf32>
    %303 = vector.shape_cast %302 : vector<5xf32> to vector<5x1xf32>
    %304 = tpu.reciprocal %303 {approx = true} : vector<5x1xf32> -> vector<5x1xf32>
    %305 = vector.broadcast %304 : vector<5x1xf32> to vector<5x5xf32>
    %306 = arith.mulf %301, %305 : vector<5x5xf32>
    %307 = arith.truncf %306 : vector<5x5xf32> to vector<5x5xbf16>
    "tpu.trace_start"() <{level = 10 : i32, message = "qk,kd->qd"}> : () -> ()
    %cst_80 = arith.constant dense<0.000000e+00> : vector<5x8xf32>
    %308 = tpu.matmul %307, %293, %cst_80 {dimension_numbers = #tpu.dot_dimension_numbers<[1], [0], [0], [1], [0, 0, 1, 1], [], []>} : vector<5x5xbf16>, vector<5x8xbf16>, vector<5x8xf32> -> vector<5x8xf32>
    "tpu.trace_stop"() : () -> ()
    %309 = tpu.concatenate %245, %266, %287, %308 in 1 : vector<5x8xf32>, vector<5x8xf32>, vector<5x8xf32>, vector<5x8xf32> -> vector<5x32xf32>
    %310 = arith.truncf %309 : vector<5x32xf32> to vector<5x32xbf16>
    %cst_81 = arith.constant dense<0.000000e+00> : vector<5x32xf32>
    %311 = tpu.matmul %310, %19, %cst_81 {dimension_numbers = #tpu.dot_dimension_numbers<[1], [0], [0], [1], [0, 0, 1, 1], [], []>} : vector<5x32xbf16>, vector<32x32xbf16>, vector<5x32xf32> -> vector<5x32xf32>
    %312 = vector.broadcast %9 : vector<1x32xf32> to vector<5x32xf32>
    %313 = arith.addf %311, %312 : vector<5x32xf32>
    %314 = arith.addf %195, %313 : vector<5x32xf32>
    %cst_82 = arith.constant dense<0.000000e+00> : vector<5xf32>
    %315 = vector.multi_reduction <add>, %314, %cst_82 [1] : vector<5x32xf32> to vector<5xf32>
    %316 = vector.shape_cast %315 : vector<5xf32> to vector<5x1xf32>
    %cst_83 = arith.constant 3.200000e+01 : f32
    %317 = vector.broadcast %cst_83 : f32 to vector<5x1xf32>
    %318 = arith.divf %316, %317 : vector<5x1xf32>
    %319 = vector.broadcast %318 : vector<5x1xf32> to vector<5x32xf32>
    %320 = arith.subf %314, %319 : vector<5x32xf32>
    %321 = arith.mulf %320, %320 : vector<5x32xf32>
    %cst_84 = arith.constant dense<0.000000e+00> : vector<5xf32>
    %322 = vector.multi_reduction <add>, %321, %cst_84 [1] : vector<5x32xf32> to vector<5xf32>
    %323 = vector.shape_cast %322 : vector<5xf32> to vector<5x1xf32>
    %cst_85 = arith.constant 3.200000e+01 : f32
    %324 = vector.broadcast %cst_85 : f32 to vector<5x1xf32>
    %325 = arith.divf %323, %324 : vector<5x1xf32>
    %326 = vector.broadcast %318 : vector<5x1xf32> to vector<5x32xf32>
    %327 = arith.subf %314, %326 : vector<5x32xf32>
    %cst_86 = arith.constant 9.99999997E-7 : f32
    %328 = vector.broadcast %cst_86 : f32 to vector<5x1xf32>
    %329 = arith.addf %325, %328 : vector<5x1xf32>
    %330 = math.rsqrt %329 : vector<5x1xf32>
    %331 = vector.broadcast %330 : vector<5x1xf32> to vector<5x32xf32>
    %332 = arith.mulf %327, %331 : vector<5x32xf32>
    %333 = vector.broadcast %10 : vector<1x32xf32> to vector<5x32xf32>
    %334 = arith.mulf %332, %333 : vector<5x32xf32>
    %335 = vector.broadcast %11 : vector<1x32xf32> to vector<5x32xf32>
    %336 = arith.addf %334, %335 : vector<5x32xf32>
    %337 = arith.truncf %336 : vector<5x32xf32> to vector<5x32xbf16>
    %cst_87 = arith.constant dense<0.000000e+00> : vector<5x128xf32>
    %338 = tpu.matmul %337, %22, %cst_87 {dimension_numbers = #tpu.dot_dimension_numbers<[1], [0], [0], [1], [0, 0, 1, 1], [], []>} : vector<5x32xbf16>, vector<32x128xbf16>, vector<5x128xf32> -> vector<5x128xf32>
    %339 = vector.broadcast %12 : vector<1x128xf32> to vector<5x128xf32>
    %340 = arith.addf %338, %339 : vector<5x128xf32>
    %341 = arith.mulf %340, %340 : vector<5x128xf32>
    %342 = arith.mulf %340, %341 : vector<5x128xf32>
    %cst_88 = arith.constant 4.471500e-02 : f32
    %343 = vector.broadcast %cst_88 : f32 to vector<5x128xf32>
    %344 = arith.mulf %343, %342 : vector<5x128xf32>
    %345 = arith.addf %340, %344 : vector<5x128xf32>
    %cst_89 = arith.constant 0.797884583 : f32
    %346 = vector.broadcast %cst_89 : f32 to vector<5x128xf32>
    %347 = arith.mulf %346, %345 : vector<5x128xf32>
    %348 = math.tanh %347 : vector<5x128xf32>
    %cst_90 = arith.constant 1.000000e+00 : f32
    %349 = vector.broadcast %cst_90 : f32 to vector<5x128xf32>
    %350 = arith.addf %349, %348 : vector<5x128xf32>
    %cst_91 = arith.constant 5.000000e-01 : f32
    %351 = vector.broadcast %cst_91 : f32 to vector<5x128xf32>
    %352 = arith.mulf %351, %350 : vector<5x128xf32>
    %353 = arith.mulf %340, %352 : vector<5x128xf32>
    %354 = arith.truncf %353 : vector<5x128xf32> to vector<5x128xbf16>
    %cst_92 = arith.constant dense<0.000000e+00> : vector<5x32xf32>
    %355 = tpu.matmul %354, %25, %cst_92 {dimension_numbers = #tpu.dot_dimension_numbers<[1], [0], [0], [1], [0, 0, 1, 1], [], []>} : vector<5x128xbf16>, vector<128x32xbf16>, vector<5x32xf32> -> vector<5x32xf32>
    %356 = vector.broadcast %13 : vector<1x32xf32> to vector<5x32xf32>
    %357 = arith.addf %355, %356 : vector<5x32xf32>
    %358 = arith.addf %314, %357 : vector<5x32xf32>
    %c1_93 = arith.constant 1 : index
    %c0_94 = arith.constant 0 : index
    %c0_95 = arith.constant 0 : index
    %359 = vector.load %arg11[%c1_93, %c0_94, %c0_95] : memref<2x5x32xf32, #tpu.memory_space<vmem>>, vector<1x5x32xf32>
    %360 = vector.shape_cast %359 : vector<1x5x32xf32> to vector<5x32xf32>
    %361 = vector.shape_cast %358 : vector<5x32xf32> to vector<1x5x32xf32>
    tpu.vector_store %arg11[%c1_93, %c0_94, %c0_95], %361 {strides = array<i32>} : memref<2x5x32xf32, #tpu.memory_space<vmem>>, vector<1x5x32xf32>,
    %c1_i32 = arith.constant 1 : i32
    %362 = arith.cmpi eq, %arg1, %c1_i32 : i32
    %363 = arith.extui %362 : i1 to i32
    %c0_i32_96 = arith.constant 0 : i32
    %364 = arith.cmpi ne, %363, %c0_i32_96 : i32
    scf.if %364 {
      %c0_97 = arith.constant 0 : index
      %c0_98 = arith.constant 0 : index
      %c0_99 = arith.constant 0 : index
      %365 = vector.load %arg11[%c0_97, %c0_98, %c0_99] : memref<2x5x32xf32, #tpu.memory_space<vmem>>, vector<1x5x32xf32>
      %366 = vector.shape_cast %365 : vector<1x5x32xf32> to vector<5x32xf32>
      %c0_100 = arith.constant 0 : index
      %c0_101 = arith.constant 0 : index
      %367 = vector.load %arg10[%c0_100, %c0_101] : memref<2x32xf32, #tpu.memory_space<vmem>>, vector<1x32xf32>
      %c1_102 = arith.constant 1 : index
      %c0_103 = arith.constant 0 : index
      %368 = vector.load %arg10[%c1_102, %c0_103] : memref<2x32xf32, #tpu.memory_space<vmem>>, vector<1x32xf32>
      %cst_104 = arith.constant dense<0.000000e+00> : vector<5xf32>
      %369 = vector.multi_reduction <add>, %366, %cst_104 [1] : vector<5x32xf32> to vector<5xf32>
      %370 = vector.shape_cast %369 : vector<5xf32> to vector<5x1xf32>
      %cst_105 = arith.constant 3.200000e+01 : f32
      %371 = vector.broadcast %cst_105 : f32 to vector<5x1xf32>
      %372 = arith.divf %370, %371 : vector<5x1xf32>
      %373 = vector.broadcast %372 : vector<5x1xf32> to vector<5x32xf32>
      %374 = arith.subf %366, %373 : vector<5x32xf32>
      %375 = arith.mulf %374, %374 : vector<5x32xf32>
      %cst_106 = arith.constant dense<0.000000e+00> : vector<5xf32>
      %376 = vector.multi_reduction <add>, %375, %cst_106 [1] : vector<5x32xf32> to vector<5xf32>
      %377 = vector.shape_cast %376 : vector<5xf32> to vector<5x1xf32>
      %cst_107 = arith.constant 3.200000e+01 : f32
      %378 = vector.broadcast %cst_107 : f32 to vector<5x1xf32>
      %379 = arith.divf %377, %378 : vector<5x1xf32>
      %380 = vector.broadcast %372 : vector<5x1xf32> to vector<5x32xf32>
      %381 = arith.subf %366, %380 : vector<5x32xf32>
      %cst_108 = arith.constant 9.99999997E-7 : f32
      %382 = vector.broadcast %cst_108 : f32 to vector<5x1xf32>
      %383 = arith.addf %379, %382 : vector<5x1xf32>
      %384 = math.rsqrt %383 : vector<5x1xf32>
      %385 = vector.broadcast %384 : vector<5x1xf32> to vector<5x32xf32>
      %386 = arith.mulf %381, %385 : vector<5x32xf32>
      %387 = vector.broadcast %367 : vector<1x32xf32> to vector<5x32xf32>
      %388 = arith.mulf %386, %387 : vector<5x32xf32>
      %389 = vector.broadcast %368 : vector<1x32xf32> to vector<5x32xf32>
      %390 = arith.addf %388, %389 : vector<5x32xf32>
      %c0_109 = arith.constant 0 : index
      %c0_110 = arith.constant 0 : index
      %c0_111 = arith.constant 0 : index
      %391 = vector.load %arg11[%c0_109, %c0_110, %c0_111] : memref<2x5x32xf32, #tpu.memory_space<vmem>>, vector<1x5x32xf32>
      %392 = vector.shape_cast %391 : vector<1x5x32xf32> to vector<5x32xf32>
      %393 = vector.shape_cast %390 : vector<5x32xf32> to vector<1x5x32xf32>
      tpu.vector_store %arg11[%c0_109, %c0_110, %c0_111], %393 {strides = array<i32>} : memref<2x5x32xf32, #tpu.memory_space<vmem>>, vector<1x5x32xf32>,
      %c1_112 = arith.constant 1 : index
      %c0_113 = arith.constant 0 : index
      %c0_114 = arith.constant 0 : index
      %394 = vector.load %arg11[%c1_112, %c0_113, %c0_114] : memref<2x5x32xf32, #tpu.memory_space<vmem>>, vector<1x5x32xf32>
      %395 = vector.shape_cast %394 : vector<1x5x32xf32> to vector<5x32xf32>
      %c0_115 = arith.constant 0 : index
      %c0_116 = arith.constant 0 : index
      %396 = vector.load %arg10[%c0_115, %c0_116] : memref<2x32xf32, #tpu.memory_space<vmem>>, vector<1x32xf32>
      %c1_117 = arith.constant 1 : index
      %c0_118 = arith.constant 0 : index
      %397 = vector.load %arg10[%c1_117, %c0_118] : memref<2x32xf32, #tpu.memory_space<vmem>>, vector<1x32xf32>
      %cst_119 = arith.constant dense<0.000000e+00> : vector<5xf32>
      %398 = vector.multi_reduction <add>, %395, %cst_119 [1] : vector<5x32xf32> to vector<5xf32>
      %399 = vector.shape_cast %398 : vector<5xf32> to vector<5x1xf32>
      %cst_120 = arith.constant 3.200000e+01 : f32
      %400 = vector.broadcast %cst_120 : f32 to vector<5x1xf32>
      %401 = arith.divf %399, %400 : vector<5x1xf32>
      %402 = vector.broadcast %401 : vector<5x1xf32> to vector<5x32xf32>
      %403 = arith.subf %395, %402 : vector<5x32xf32>
      %404 = arith.mulf %403, %403 : vector<5x32xf32>
      %cst_121 = arith.constant dense<0.000000e+00> : vector<5xf32>
      %405 = vector.multi_reduction <add>, %404, %cst_121 [1] : vector<5x32xf32> to vector<5xf32>
      %406 = vector.shape_cast %405 : vector<5xf32> to vector<5x1xf32>
      %cst_122 = arith.constant 3.200000e+01 : f32
      %407 = vector.broadcast %cst_122 : f32 to vector<5x1xf32>
      %408 = arith.divf %406, %407 : vector<5x1xf32>
      %409 = vector.broadcast %401 : vector<5x1xf32> to vector<5x32xf32>
      %410 = arith.subf %395, %409 : vector<5x32xf32>
      %cst_123 = arith.constant 9.99999997E-7 : f32
      %411 = vector.broadcast %cst_123 : f32 to vector<5x1xf32>
      %412 = arith.addf %408, %411 : vector<5x1xf32>
      %413 = math.rsqrt %412 : vector<5x1xf32>
      %414 = vector.broadcast %413 : vector<5x1xf32> to vector<5x32xf32>
      %415 = arith.mulf %410, %414 : vector<5x32xf32>
      %416 = vector.broadcast %396 : vector<1x32xf32> to vector<5x32xf32>
      %417 = arith.mulf %415, %416 : vector<5x32xf32>
      %418 = vector.broadcast %397 : vector<1x32xf32> to vector<5x32xf32>
      %419 = arith.addf %417, %418 : vector<5x32xf32>
      %c1_124 = arith.constant 1 : index
      %c0_125 = arith.constant 0 : index
      %c0_126 = arith.constant 0 : index
      %420 = vector.load %arg11[%c1_124, %c0_125, %c0_126] : memref<2x5x32xf32, #tpu.memory_space<vmem>>, vector<1x5x32xf32>
      %421 = vector.shape_cast %420 : vector<1x5x32xf32> to vector<5x32xf32>
      %422 = vector.shape_cast %419 : vector<5x32xf32> to vector<1x5x32xf32>
      tpu.vector_store %arg11[%c1_124, %c0_125, %c0_126], %422 {strides = array<i32>} : memref<2x5x32xf32, #tpu.memory_space<vmem>>, vector<1x5x32xf32>,
    } else {
    }
    return
  }
  func.func @transform_0(%arg0: i32, %arg1: i32) -> (i32, i32, i32) {
    %c0_i32 = arith.constant 0 : i32
    %c0_i32_0 = arith.constant 0 : i32
    %c0_i32_1 = arith.constant 0 : i32
    return %arg0, %c0_i32, %c0_i32_0 : i32, i32, i32
  }
  func.func @transform_1(%arg0: i32, %arg1: i32) -> (i32, i32) {
    %c0_i32 = arith.constant 0 : i32
    %c0_i32_0 = arith.constant 0 : i32
    %c0_i32_1 = arith.constant 0 : i32
    return %c0_i32, %c0_i32_0 : i32, i32
  }
  func.func @transform_2(%arg0: i32, %arg1: i32) -> (i32, i32) {
    %c0_i32 = arith.constant 0 : i32
    %c0_i32_0 = arith.constant 0 : i32
    %c0_i32_1 = arith.constant 0 : i32
    return %c0_i32, %c0_i32_0 : i32, i32
  }
  func.func @transform_3(%arg0: i32, %arg1: i32) -> (i32, i32, i32) {
    %c0_i32 = arith.constant 0 : i32
    %c0_i32_0 = arith.constant 0 : i32
    %c0_i32_1 = arith.constant 0 : i32
    %c0_i32_2 = arith.constant 0 : i32
    return %c0_i32, %c0_i32_0, %c0_i32_1 : i32, i32, i32
  }
  func.func @transform_4(%arg0: i32, %arg1: i32) -> (i32, i32, i32) {
    %c0_i32 = arith.constant 0 : i32
    %c0_i32_0 = arith.constant 0 : i32
    %c0_i32_1 = arith.constant 0 : i32
    %c0_i32_2 = arith.constant 0 : i32
    return %c0_i32, %c0_i32_0, %c0_i32_1 : i32, i32, i32
  }
  func.func @transform_5(%arg0: i32, %arg1: i32) -> (i32, i32, i32) {
    %c0_i32 = arith.constant 0 : i32
    %c0_i32_0 = arith.constant 0 : i32
    %c0_i32_1 = arith.constant 0 : i32
    %c0_i32_2 = arith.constant 0 : i32
    return %c0_i32, %c0_i32_0, %c0_i32_1 : i32, i32, i32
  }
  func.func @transform_6(%arg0: i32, %arg1: i32) -> (i32, i32, i32) {
    %c0_i32 = arith.constant 0 : i32
    %c0_i32_0 = arith.constant 0 : i32
    %c0_i32_1 = arith.constant 0 : i32
    %c0_i32_2 = arith.constant 0 : i32
    return %c0_i32, %c0_i32_0, %c0_i32_1 : i32, i32, i32
  }
  func.func @transform_7(%arg0: i32, %arg1: i32) -> (i32, i32, i32) {
    %c0_i32 = arith.constant 0 : i32
    %c0_i32_0 = arith.constant 0 : i32
    %c0_i32_1 = arith.constant 0 : i32
    %c0_i32_2 = arith.constant 0 : i32
    return %c0_i32, %c0_i32_0, %c0_i32_1 : i32, i32, i32
  }
  func.func @transform_8(%arg0: i32, %arg1: i32) -> (i32, i32) {
    %c0_i32 = arith.constant 0 : i32
    %c0_i32_0 = arith.constant 0 : i32
    %c0_i32_1 = arith.constant 0 : i32
    return %c0_i32, %c0_i32_0 : i32, i32
  }
  func.func @transform_9(%arg0: i32, %arg1: i32) -> (i32, i32, i32) {
    %c0_i32 = arith.constant 0 : i32
    %c0_i32_0 = arith.constant 0 : i32
    %c0_i32_1 = arith.constant 0 : i32
    return %arg0, %c0_i32, %c0_i32_0 : i32, i32, i32
  }
}

module attributes {stable_mosaic.version = 11 : i64} {
  func.func @kernel(%arg0: i32, %arg1: memref<16x32xf32, #tpu.memory_space<vmem>>, %arg2: memref<2x8xf32, #tpu.memory_space<vmem>>, %arg3: memref<2x10x32xf32, #tpu.memory_space<vmem>>, %arg4: memref<16x128xf32, #tpu.memory_space<vmem>>, %arg5: memref<8x128xf32, #tpu.memory_space<vmem>>, %arg6: memref<2x16x128xf32, #tpu.memory_space<vmem>>, %arg7: memref<2x32x96xbf16, #tpu.memory_space<vmem>>, %arg8: memref<2x32x32xbf16, #tpu.memory_space<vmem>>, %arg9: memref<2x32x32xbf16, #tpu.memory_space<vmem>>, %arg10: memref<2x32x64xbf16, #tpu.memory_space<vmem>>, %arg11: memref<2x32x32xbf16, #tpu.memory_space<vmem>>, %arg12: memref<2x32x128xbf16, #tpu.memory_space<vmem>>, %arg13: memref<2x128x32xbf16, #tpu.memory_space<vmem>>, %arg14: memref<32x32xbf16, #tpu.memory_space<vmem>>, %arg15: memref<32x128xbf16, #tpu.memory_space<vmem>>, %arg16: memref<1x128xf32, #tpu.memory_space<vmem>>, %arg17: memref<16x32xf32, #tpu.memory_space<vmem>>, %arg18: memref<2x8x8xf32, #tpu.memory_space<vmem>>) attributes {dimension_semantics = [#tpu.dimension_semantics<arbitrary>], iteration_bounds = array<i64: 2>, scalar_prefetch = 0 : i64, scratch_operands = 2 : i64, tpu.core_type = #tpu.core_type<tc>, window_params = [{pipeline_mode = #tpu.pipeline_mode<synchronous>, transform_indices = @transform_0, window_bounds = array<i64: 16, 32>}, {pipeline_mode = #tpu.pipeline_mode<synchronous>, transform_indices = @transform_1, window_bounds = array<i64: 2, 8>}, {pipeline_mode = #tpu.pipeline_mode<synchronous>, transform_indices = @transform_2, window_bounds = array<i64: 2, 10, 32>}, {pipeline_mode = #tpu.pipeline_mode<synchronous>, transform_indices = @transform_3, window_bounds = array<i64: 16, 128>}, {pipeline_mode = #tpu.pipeline_mode<synchronous>, transform_indices = @transform_4, window_bounds = array<i64: 8, 128>}, {pipeline_mode = #tpu.pipeline_mode<synchronous>, transform_indices = @transform_5, window_bounds = array<i64: 2, 16, 128>}, {pipeline_mode = #tpu.pipeline_mode<synchronous>, transform_indices = @transform_6, window_bounds = array<i64: 2, 32, 96>}, {pipeline_mode = #tpu.pipeline_mode<synchronous>, transform_indices = @transform_7, window_bounds = array<i64: 2, 32, 32>}, {pipeline_mode = #tpu.pipeline_mode<synchronous>, transform_indices = @transform_8, window_bounds = array<i64: 2, 32, 32>}, {pipeline_mode = #tpu.pipeline_mode<synchronous>, transform_indices = @transform_9, window_bounds = array<i64: 2, 32, 64>}, {pipeline_mode = #tpu.pipeline_mode<synchronous>, transform_indices = @transform_10, window_bounds = array<i64: 2, 32, 32>}, {pipeline_mode = #tpu.pipeline_mode<synchronous>, transform_indices = @transform_11, window_bounds = array<i64: 2, 32, 128>}, {pipeline_mode = #tpu.pipeline_mode<synchronous>, transform_indices = @transform_12, window_bounds = array<i64: 2, 128, 32>}, {pipeline_mode = #tpu.pipeline_mode<synchronous>, transform_indices = @transform_13, window_bounds = array<i64: 32, 32>}, {pipeline_mode = #tpu.pipeline_mode<synchronous>, transform_indices = @transform_14, window_bounds = array<i64: 32, 128>}, {pipeline_mode = #tpu.pipeline_mode<synchronous>, transform_indices = @transform_15, window_bounds = array<i64: 1, 128>}]} {
    %c0 = arith.constant 0 : index
    %c0_0 = arith.constant 0 : index
    %0 = vector.load %arg5[%c0, %c0_0] : memref<8x128xf32, #tpu.memory_space<vmem>>, vector<8x128xf32>
    %c0_i32 = arith.constant 0 : i32
    %1 = arith.cmpi eq, %arg0, %c0_i32 : i32
    %2 = arith.extui %1 : i1 to i32
    %c0_i32_1 = arith.constant 0 : i32
    %3 = arith.cmpi ne, %2, %c0_i32_1 : i32
    scf.if %3 {
      %c0_142 = arith.constant 0 : index
      %c0_143 = arith.constant 0 : index
      %538 = vector.load %arg1[%c0_142, %c0_143] : memref<16x32xf32, #tpu.memory_space<vmem>>, vector<16x32xf32>
      %539 = vector.extract_strided_slice %0 {offsets = [0, 0], sizes = [1, 32], strides = [1, 1]} : vector<8x128xf32> to vector<1x32xf32>
      %540 = vector.extract_strided_slice %0 {offsets = [1, 0], sizes = [1, 32], strides = [1, 1]} : vector<8x128xf32> to vector<1x32xf32>
      %cst_144 = arith.constant dense<0.000000e+00> : vector<16xf32>
      %541 = vector.multi_reduction <add>, %538, %cst_144 [1] : vector<16x32xf32> to vector<16xf32>
      %542 = vector.shape_cast %541 : vector<16xf32> to vector<16x1xf32>
      %cst_145 = arith.constant 3.200000e+01 : f32
      %543 = vector.broadcast %cst_145 : f32 to vector<16x1xf32>
      %544 = arith.divf %542, %543 : vector<16x1xf32>
      %545 = vector.broadcast %544 : vector<16x1xf32> to vector<16x32xf32>
      %546 = arith.subf %538, %545 : vector<16x32xf32>
      %547 = arith.mulf %546, %546 : vector<16x32xf32>
      %cst_146 = arith.constant dense<0.000000e+00> : vector<16xf32>
      %548 = vector.multi_reduction <add>, %547, %cst_146 [1] : vector<16x32xf32> to vector<16xf32>
      %549 = vector.shape_cast %548 : vector<16xf32> to vector<16x1xf32>
      %cst_147 = arith.constant 3.200000e+01 : f32
      %550 = vector.broadcast %cst_147 : f32 to vector<16x1xf32>
      %551 = arith.divf %549, %550 : vector<16x1xf32>
      %552 = vector.broadcast %544 : vector<16x1xf32> to vector<16x32xf32>
      %553 = arith.subf %538, %552 : vector<16x32xf32>
      %cst_148 = arith.constant 9.99999996E-13 : f32
      %554 = vector.broadcast %cst_148 : f32 to vector<16x1xf32>
      %555 = arith.addf %551, %554 : vector<16x1xf32>
      %556 = math.rsqrt %555 : vector<16x1xf32>
      %557 = vector.broadcast %556 : vector<16x1xf32> to vector<16x32xf32>
      %558 = arith.mulf %553, %557 : vector<16x32xf32>
      %559 = vector.broadcast %539 : vector<1x32xf32> to vector<16x32xf32>
      %560 = arith.mulf %558, %559 : vector<16x32xf32>
      %561 = vector.broadcast %540 : vector<1x32xf32> to vector<16x32xf32>
      %562 = arith.addf %560, %561 : vector<16x32xf32>
      %c0_149 = arith.constant 0 : index
      %c0_150 = arith.constant 0 : index
      %563 = vector.load %arg17[%c0_149, %c0_150] : memref<16x32xf32, #tpu.memory_space<vmem>>, vector<16x32xf32>
      tpu.vector_store %arg17[%c0_149, %c0_150], %562 {strides = array<i32>} : memref<16x32xf32, #tpu.memory_space<vmem>>, vector<16x32xf32>,
      %564 = tpu.iota {dimensions = array<i32: 0>} : vector<8x8xi32>
      %565 = tpu.iota {dimensions = array<i32: 1>} : vector<8x8xi32>
      %566 = arith.cmpi sge, %564, %565 : vector<8x8xi32>
      %c0_151 = arith.constant 0 : index
      %c0_152 = arith.constant 0 : index
      %567 = vector.load %arg2[%c0_151, %c0_152] : memref<2x8xf32, #tpu.memory_space<vmem>>, vector<1x8xf32>
      %cst_153 = arith.constant 5.000000e-01 : f32
      %568 = vector.broadcast %cst_153 : f32 to vector<1x8xf32>
      %569 = arith.cmpf ogt, %567, %568 : vector<1x8xf32>
      %570 = vector.broadcast %569 : vector<1x8xi1> to vector<8x8xi1>
      %571 = arith.andi %566, %570 : vector<8x8xi1>
      %cst_154 = arith.constant 0.000000e+00 : f32
      %cst_155 = arith.constant -1.000000e+09 : f32
      %572 = vector.broadcast %cst_154 : f32 to vector<8x8xf32>
      %573 = vector.broadcast %cst_155 : f32 to vector<8x8xf32>
      %574 = arith.select %571, %572, %573 : vector<8x8xi1>, vector<8x8xf32>
      %c0_156 = arith.constant 0 : index
      %c0_157 = arith.constant 0 : index
      %c0_158 = arith.constant 0 : index
      %575 = vector.load %arg18[%c0_156, %c0_157, %c0_158] : memref<2x8x8xf32, #tpu.memory_space<vmem>>, vector<1x8x8xf32>
      %576 = vector.shape_cast %575 : vector<1x8x8xf32> to vector<8x8xf32>
      %577 = vector.shape_cast %574 : vector<8x8xf32> to vector<1x8x8xf32>
      tpu.vector_store %arg18[%c0_156, %c0_157, %c0_158], %577 {strides = array<i32>} : memref<2x8x8xf32, #tpu.memory_space<vmem>>, vector<1x8x8xf32>,
      %c1_159 = arith.constant 1 : index
      %c0_160 = arith.constant 0 : index
      %578 = vector.load %arg2[%c1_159, %c0_160] : memref<2x8xf32, #tpu.memory_space<vmem>>, vector<1x8xf32>
      %cst_161 = arith.constant 5.000000e-01 : f32
      %579 = vector.broadcast %cst_161 : f32 to vector<1x8xf32>
      %580 = arith.cmpf ogt, %578, %579 : vector<1x8xf32>
      %581 = vector.broadcast %580 : vector<1x8xi1> to vector<8x8xi1>
      %582 = arith.andi %566, %581 : vector<8x8xi1>
      %cst_162 = arith.constant 0.000000e+00 : f32
      %cst_163 = arith.constant -1.000000e+09 : f32
      %583 = vector.broadcast %cst_162 : f32 to vector<8x8xf32>
      %584 = vector.broadcast %cst_163 : f32 to vector<8x8xf32>
      %585 = arith.select %582, %583, %584 : vector<8x8xi1>, vector<8x8xf32>
      %c1_164 = arith.constant 1 : index
      %c0_165 = arith.constant 0 : index
      %c0_166 = arith.constant 0 : index
      %586 = vector.load %arg18[%c1_164, %c0_165, %c0_166] : memref<2x8x8xf32, #tpu.memory_space<vmem>>, vector<1x8x8xf32>
      %587 = vector.shape_cast %586 : vector<1x8x8xf32> to vector<8x8xf32>
      %588 = vector.shape_cast %585 : vector<8x8xf32> to vector<1x8x8xf32>
      tpu.vector_store %arg18[%c1_164, %c0_165, %c0_166], %588 {strides = array<i32>} : memref<2x8x8xf32, #tpu.memory_space<vmem>>, vector<1x8x8xf32>,
    } else {
    }
    %4 = arith.index_cast %arg0 : i32 to index
    %c0_2 = arith.constant 0 : index
    %c0_3 = arith.constant 0 : index
    %5 = vector.load %arg6[%4, %c0_2, %c0_3] : memref<2x16x128xf32, #tpu.memory_space<vmem>>, vector<1x16x128xf32>
    %6 = vector.shape_cast %5 : vector<1x16x128xf32> to vector<16x128xf32>
    %c0_4 = arith.constant 0 : index
    %c0_5 = arith.constant 0 : index
    %7 = vector.load %arg17[%c0_4, %c0_5] : memref<16x32xf32, #tpu.memory_space<vmem>>, vector<16x32xf32>
    %8 = arith.index_cast %arg0 : i32 to index
    %c0_6 = arith.constant 0 : index
    %c0_7 = arith.constant 0 : index
    %9 = vector.load %arg7[%8, %c0_6, %c0_7] : memref<2x32x96xbf16, #tpu.memory_space<vmem>>, vector<1x32x96xbf16>
    %10 = vector.shape_cast %9 : vector<1x32x96xbf16> to vector<32x96xbf16>
    %11 = vector.extract_strided_slice %6 {offsets = [0, 0], sizes = [1, 96], strides = [1, 1]} : vector<16x128xf32> to vector<1x96xf32>
    %12 = arith.truncf %7 : vector<16x32xf32> to vector<16x32xbf16>
    %cst = arith.constant dense<0.000000e+00> : vector<16x96xf32>
    %13 = tpu.matmul %12, %10, %cst {dimension_numbers = #tpu.dot_dimension_numbers<[1], [0], [0], [1], [0, 0, 1, 1], [], []>} : vector<16x32xbf16>, vector<32x96xbf16>, vector<16x96xf32> -> vector<16x96xf32>
    %14 = vector.broadcast %11 : vector<1x96xf32> to vector<16x96xf32>
    %15 = arith.addf %13, %14 : vector<16x96xf32>
    %16 = arith.index_cast %arg0 : i32 to index
    %c0_8 = arith.constant 0 : index
    %c0_9 = arith.constant 0 : index
    %17 = vector.load %arg8[%16, %c0_8, %c0_9] : memref<2x32x32xbf16, #tpu.memory_space<vmem>>, vector<1x32x32xbf16>
    %18 = vector.shape_cast %17 : vector<1x32x32xbf16> to vector<32x32xbf16>
    %19 = vector.extract_strided_slice %6 {offsets = [1, 0], sizes = [1, 32], strides = [1, 1]} : vector<16x128xf32> to vector<1x32xf32>
    %20 = vector.extract_strided_slice %15 {offsets = [0, 0], sizes = [8, 32], strides = [1, 1]} : vector<16x96xf32> to vector<8x32xf32>
    %21 = vector.extract_strided_slice %15 {offsets = [0, 32], sizes = [8, 32], strides = [1, 1]} : vector<16x96xf32> to vector<8x32xf32>
    %22 = vector.extract_strided_slice %15 {offsets = [0, 64], sizes = [8, 32], strides = [1, 1]} : vector<16x96xf32> to vector<8x32xf32>
    %c0_10 = arith.constant 0 : index
    %c0_11 = arith.constant 0 : index
    %c0_12 = arith.constant 0 : index
    %23 = vector.load %arg18[%c0_10, %c0_11, %c0_12] : memref<2x8x8xf32, #tpu.memory_space<vmem>>, vector<1x8x8xf32>
    %24 = vector.shape_cast %23 : vector<1x8x8xf32> to vector<8x8xf32>
    %25 = vector.extract_strided_slice %20 {offsets = [0, 0], sizes = [8, 8], strides = [1, 1]} : vector<8x32xf32> to vector<8x8xf32>
    %26 = arith.truncf %25 : vector<8x8xf32> to vector<8x8xbf16>
    %27 = vector.extract_strided_slice %21 {offsets = [0, 0], sizes = [8, 8], strides = [1, 1]} : vector<8x32xf32> to vector<8x8xf32>
    %28 = arith.truncf %27 : vector<8x8xf32> to vector<8x8xbf16>
    %29 = vector.extract_strided_slice %22 {offsets = [0, 0], sizes = [8, 8], strides = [1, 1]} : vector<8x32xf32> to vector<8x8xf32>
    %30 = arith.truncf %29 : vector<8x8xf32> to vector<8x8xbf16>
    "tpu.trace_start"() <{level = 10 : i32, message = "qd,kd->qk"}> : () -> ()
    %cst_13 = arith.constant dense<0.000000e+00> : vector<8x8xf32>
    %31 = tpu.matmul %26, %28, %cst_13 {dimension_numbers = #tpu.dot_dimension_numbers<[1], [1], [0], [0], [0, 0, 1, 0], [], []>} : vector<8x8xbf16>, vector<8x8xbf16>, vector<8x8xf32> -> vector<8x8xf32>
    "tpu.trace_stop"() : () -> ()
    %cst_14 = arith.constant 0.353553385 : f32
    %32 = vector.broadcast %cst_14 : f32 to vector<8x8xf32>
    %33 = arith.mulf %31, %32 : vector<8x8xf32>
    %34 = arith.addf %33, %24 : vector<8x8xf32>
    %cst_15 = arith.constant dense<0xFF800000> : vector<8xf32>
    %35 = vector.multi_reduction <maximumf>, %34, %cst_15 [1] : vector<8x8xf32> to vector<8xf32>
    %36 = vector.shape_cast %35 : vector<8xf32> to vector<8x1xf32>
    %37 = vector.broadcast %36 : vector<8x1xf32> to vector<8x8xf32>
    %38 = arith.subf %34, %37 : vector<8x8xf32>
    %39 = math.exp %38 : vector<8x8xf32>
    %cst_16 = arith.constant dense<0.000000e+00> : vector<8xf32>
    %40 = vector.multi_reduction <add>, %39, %cst_16 [1] : vector<8x8xf32> to vector<8xf32>
    %41 = vector.shape_cast %40 : vector<8xf32> to vector<8x1xf32>
    %42 = tpu.reciprocal %41 {approx = true} : vector<8x1xf32> -> vector<8x1xf32>
    %43 = vector.broadcast %42 : vector<8x1xf32> to vector<8x8xf32>
    %44 = arith.mulf %39, %43 : vector<8x8xf32>
    %45 = arith.truncf %44 : vector<8x8xf32> to vector<8x8xbf16>
    "tpu.trace_start"() <{level = 10 : i32, message = "qk,kd->qd"}> : () -> ()
    %cst_17 = arith.constant dense<0.000000e+00> : vector<8x8xf32>
    %46 = tpu.matmul %45, %30, %cst_17 {dimension_numbers = #tpu.dot_dimension_numbers<[1], [0], [0], [1], [0, 0, 1, 1], [], []>} : vector<8x8xbf16>, vector<8x8xbf16>, vector<8x8xf32> -> vector<8x8xf32>
    "tpu.trace_stop"() : () -> ()
    %47 = vector.extract_strided_slice %20 {offsets = [0, 8], sizes = [8, 8], strides = [1, 1]} : vector<8x32xf32> to vector<8x8xf32>
    %48 = arith.truncf %47 : vector<8x8xf32> to vector<8x8xbf16>
    %49 = vector.extract_strided_slice %21 {offsets = [0, 8], sizes = [8, 8], strides = [1, 1]} : vector<8x32xf32> to vector<8x8xf32>
    %50 = arith.truncf %49 : vector<8x8xf32> to vector<8x8xbf16>
    %51 = vector.extract_strided_slice %22 {offsets = [0, 8], sizes = [8, 8], strides = [1, 1]} : vector<8x32xf32> to vector<8x8xf32>
    %52 = arith.truncf %51 : vector<8x8xf32> to vector<8x8xbf16>
    "tpu.trace_start"() <{level = 10 : i32, message = "qd,kd->qk"}> : () -> ()
    %cst_18 = arith.constant dense<0.000000e+00> : vector<8x8xf32>
    %53 = tpu.matmul %48, %50, %cst_18 {dimension_numbers = #tpu.dot_dimension_numbers<[1], [1], [0], [0], [0, 0, 1, 0], [], []>} : vector<8x8xbf16>, vector<8x8xbf16>, vector<8x8xf32> -> vector<8x8xf32>
    "tpu.trace_stop"() : () -> ()
    %cst_19 = arith.constant 0.353553385 : f32
    %54 = vector.broadcast %cst_19 : f32 to vector<8x8xf32>
    %55 = arith.mulf %53, %54 : vector<8x8xf32>
    %56 = arith.addf %55, %24 : vector<8x8xf32>
    %cst_20 = arith.constant dense<0xFF800000> : vector<8xf32>
    %57 = vector.multi_reduction <maximumf>, %56, %cst_20 [1] : vector<8x8xf32> to vector<8xf32>
    %58 = vector.shape_cast %57 : vector<8xf32> to vector<8x1xf32>
    %59 = vector.broadcast %58 : vector<8x1xf32> to vector<8x8xf32>
    %60 = arith.subf %56, %59 : vector<8x8xf32>
    %61 = math.exp %60 : vector<8x8xf32>
    %cst_21 = arith.constant dense<0.000000e+00> : vector<8xf32>
    %62 = vector.multi_reduction <add>, %61, %cst_21 [1] : vector<8x8xf32> to vector<8xf32>
    %63 = vector.shape_cast %62 : vector<8xf32> to vector<8x1xf32>
    %64 = tpu.reciprocal %63 {approx = true} : vector<8x1xf32> -> vector<8x1xf32>
    %65 = vector.broadcast %64 : vector<8x1xf32> to vector<8x8xf32>
    %66 = arith.mulf %61, %65 : vector<8x8xf32>
    %67 = arith.truncf %66 : vector<8x8xf32> to vector<8x8xbf16>
    "tpu.trace_start"() <{level = 10 : i32, message = "qk,kd->qd"}> : () -> ()
    %cst_22 = arith.constant dense<0.000000e+00> : vector<8x8xf32>
    %68 = tpu.matmul %67, %52, %cst_22 {dimension_numbers = #tpu.dot_dimension_numbers<[1], [0], [0], [1], [0, 0, 1, 1], [], []>} : vector<8x8xbf16>, vector<8x8xbf16>, vector<8x8xf32> -> vector<8x8xf32>
    "tpu.trace_stop"() : () -> ()
    %69 = vector.extract_strided_slice %20 {offsets = [0, 16], sizes = [8, 8], strides = [1, 1]} : vector<8x32xf32> to vector<8x8xf32>
    %70 = arith.truncf %69 : vector<8x8xf32> to vector<8x8xbf16>
    %71 = vector.extract_strided_slice %21 {offsets = [0, 16], sizes = [8, 8], strides = [1, 1]} : vector<8x32xf32> to vector<8x8xf32>
    %72 = arith.truncf %71 : vector<8x8xf32> to vector<8x8xbf16>
    %73 = vector.extract_strided_slice %22 {offsets = [0, 16], sizes = [8, 8], strides = [1, 1]} : vector<8x32xf32> to vector<8x8xf32>
    %74 = arith.truncf %73 : vector<8x8xf32> to vector<8x8xbf16>
    "tpu.trace_start"() <{level = 10 : i32, message = "qd,kd->qk"}> : () -> ()
    %cst_23 = arith.constant dense<0.000000e+00> : vector<8x8xf32>
    %75 = tpu.matmul %70, %72, %cst_23 {dimension_numbers = #tpu.dot_dimension_numbers<[1], [1], [0], [0], [0, 0, 1, 0], [], []>} : vector<8x8xbf16>, vector<8x8xbf16>, vector<8x8xf32> -> vector<8x8xf32>
    "tpu.trace_stop"() : () -> ()
    %cst_24 = arith.constant 0.353553385 : f32
    %76 = vector.broadcast %cst_24 : f32 to vector<8x8xf32>
    %77 = arith.mulf %75, %76 : vector<8x8xf32>
    %78 = arith.addf %77, %24 : vector<8x8xf32>
    %cst_25 = arith.constant dense<0xFF800000> : vector<8xf32>
    %79 = vector.multi_reduction <maximumf>, %78, %cst_25 [1] : vector<8x8xf32> to vector<8xf32>
    %80 = vector.shape_cast %79 : vector<8xf32> to vector<8x1xf32>
    %81 = vector.broadcast %80 : vector<8x1xf32> to vector<8x8xf32>
    %82 = arith.subf %78, %81 : vector<8x8xf32>
    %83 = math.exp %82 : vector<8x8xf32>
    %cst_26 = arith.constant dense<0.000000e+00> : vector<8xf32>
    %84 = vector.multi_reduction <add>, %83, %cst_26 [1] : vector<8x8xf32> to vector<8xf32>
    %85 = vector.shape_cast %84 : vector<8xf32> to vector<8x1xf32>
    %86 = tpu.reciprocal %85 {approx = true} : vector<8x1xf32> -> vector<8x1xf32>
    %87 = vector.broadcast %86 : vector<8x1xf32> to vector<8x8xf32>
    %88 = arith.mulf %83, %87 : vector<8x8xf32>
    %89 = arith.truncf %88 : vector<8x8xf32> to vector<8x8xbf16>
    "tpu.trace_start"() <{level = 10 : i32, message = "qk,kd->qd"}> : () -> ()
    %cst_27 = arith.constant dense<0.000000e+00> : vector<8x8xf32>
    %90 = tpu.matmul %89, %74, %cst_27 {dimension_numbers = #tpu.dot_dimension_numbers<[1], [0], [0], [1], [0, 0, 1, 1], [], []>} : vector<8x8xbf16>, vector<8x8xbf16>, vector<8x8xf32> -> vector<8x8xf32>
    "tpu.trace_stop"() : () -> ()
    %91 = vector.extract_strided_slice %20 {offsets = [0, 24], sizes = [8, 8], strides = [1, 1]} : vector<8x32xf32> to vector<8x8xf32>
    %92 = arith.truncf %91 : vector<8x8xf32> to vector<8x8xbf16>
    %93 = vector.extract_strided_slice %21 {offsets = [0, 24], sizes = [8, 8], strides = [1, 1]} : vector<8x32xf32> to vector<8x8xf32>
    %94 = arith.truncf %93 : vector<8x8xf32> to vector<8x8xbf16>
    %95 = vector.extract_strided_slice %22 {offsets = [0, 24], sizes = [8, 8], strides = [1, 1]} : vector<8x32xf32> to vector<8x8xf32>
    %96 = arith.truncf %95 : vector<8x8xf32> to vector<8x8xbf16>
    "tpu.trace_start"() <{level = 10 : i32, message = "qd,kd->qk"}> : () -> ()
    %cst_28 = arith.constant dense<0.000000e+00> : vector<8x8xf32>
    %97 = tpu.matmul %92, %94, %cst_28 {dimension_numbers = #tpu.dot_dimension_numbers<[1], [1], [0], [0], [0, 0, 1, 0], [], []>} : vector<8x8xbf16>, vector<8x8xbf16>, vector<8x8xf32> -> vector<8x8xf32>
    "tpu.trace_stop"() : () -> ()
    %cst_29 = arith.constant 0.353553385 : f32
    %98 = vector.broadcast %cst_29 : f32 to vector<8x8xf32>
    %99 = arith.mulf %97, %98 : vector<8x8xf32>
    %100 = arith.addf %99, %24 : vector<8x8xf32>
    %cst_30 = arith.constant dense<0xFF800000> : vector<8xf32>
    %101 = vector.multi_reduction <maximumf>, %100, %cst_30 [1] : vector<8x8xf32> to vector<8xf32>
    %102 = vector.shape_cast %101 : vector<8xf32> to vector<8x1xf32>
    %103 = vector.broadcast %102 : vector<8x1xf32> to vector<8x8xf32>
    %104 = arith.subf %100, %103 : vector<8x8xf32>
    %105 = math.exp %104 : vector<8x8xf32>
    %cst_31 = arith.constant dense<0.000000e+00> : vector<8xf32>
    %106 = vector.multi_reduction <add>, %105, %cst_31 [1] : vector<8x8xf32> to vector<8xf32>
    %107 = vector.shape_cast %106 : vector<8xf32> to vector<8x1xf32>
    %108 = tpu.reciprocal %107 {approx = true} : vector<8x1xf32> -> vector<8x1xf32>
    %109 = vector.broadcast %108 : vector<8x1xf32> to vector<8x8xf32>
    %110 = arith.mulf %105, %109 : vector<8x8xf32>
    %111 = arith.truncf %110 : vector<8x8xf32> to vector<8x8xbf16>
    "tpu.trace_start"() <{level = 10 : i32, message = "qk,kd->qd"}> : () -> ()
    %cst_32 = arith.constant dense<0.000000e+00> : vector<8x8xf32>
    %112 = tpu.matmul %111, %96, %cst_32 {dimension_numbers = #tpu.dot_dimension_numbers<[1], [0], [0], [1], [0, 0, 1, 1], [], []>} : vector<8x8xbf16>, vector<8x8xbf16>, vector<8x8xf32> -> vector<8x8xf32>
    "tpu.trace_stop"() : () -> ()
    %113 = tpu.concatenate %46, %68, %90, %112 in 1 : vector<8x8xf32>, vector<8x8xf32>, vector<8x8xf32>, vector<8x8xf32> -> vector<8x32xf32>
    %114 = arith.truncf %113 : vector<8x32xf32> to vector<8x32xbf16>
    %cst_33 = arith.constant dense<0.000000e+00> : vector<8x32xf32>
    %115 = tpu.matmul %114, %18, %cst_33 {dimension_numbers = #tpu.dot_dimension_numbers<[1], [0], [0], [1], [0, 0, 1, 1], [], []>} : vector<8x32xbf16>, vector<32x32xbf16>, vector<8x32xf32> -> vector<8x32xf32>
    %116 = vector.broadcast %19 : vector<1x32xf32> to vector<8x32xf32>
    %117 = arith.addf %115, %116 : vector<8x32xf32>
    %118 = vector.extract_strided_slice %15 {offsets = [8, 0], sizes = [8, 32], strides = [1, 1]} : vector<16x96xf32> to vector<8x32xf32>
    %119 = vector.extract_strided_slice %15 {offsets = [8, 32], sizes = [8, 32], strides = [1, 1]} : vector<16x96xf32> to vector<8x32xf32>
    %120 = vector.extract_strided_slice %15 {offsets = [8, 64], sizes = [8, 32], strides = [1, 1]} : vector<16x96xf32> to vector<8x32xf32>
    %c1 = arith.constant 1 : index
    %c0_34 = arith.constant 0 : index
    %c0_35 = arith.constant 0 : index
    %121 = vector.load %arg18[%c1, %c0_34, %c0_35] : memref<2x8x8xf32, #tpu.memory_space<vmem>>, vector<1x8x8xf32>
    %122 = vector.shape_cast %121 : vector<1x8x8xf32> to vector<8x8xf32>
    %123 = vector.extract_strided_slice %118 {offsets = [0, 0], sizes = [8, 8], strides = [1, 1]} : vector<8x32xf32> to vector<8x8xf32>
    %124 = arith.truncf %123 : vector<8x8xf32> to vector<8x8xbf16>
    %125 = vector.extract_strided_slice %119 {offsets = [0, 0], sizes = [8, 8], strides = [1, 1]} : vector<8x32xf32> to vector<8x8xf32>
    %126 = arith.truncf %125 : vector<8x8xf32> to vector<8x8xbf16>
    %127 = vector.extract_strided_slice %120 {offsets = [0, 0], sizes = [8, 8], strides = [1, 1]} : vector<8x32xf32> to vector<8x8xf32>
    %128 = arith.truncf %127 : vector<8x8xf32> to vector<8x8xbf16>
    "tpu.trace_start"() <{level = 10 : i32, message = "qd,kd->qk"}> : () -> ()
    %cst_36 = arith.constant dense<0.000000e+00> : vector<8x8xf32>
    %129 = tpu.matmul %124, %126, %cst_36 {dimension_numbers = #tpu.dot_dimension_numbers<[1], [1], [0], [0], [0, 0, 1, 0], [], []>} : vector<8x8xbf16>, vector<8x8xbf16>, vector<8x8xf32> -> vector<8x8xf32>
    "tpu.trace_stop"() : () -> ()
    %cst_37 = arith.constant 0.353553385 : f32
    %130 = vector.broadcast %cst_37 : f32 to vector<8x8xf32>
    %131 = arith.mulf %129, %130 : vector<8x8xf32>
    %132 = arith.addf %131, %122 : vector<8x8xf32>
    %cst_38 = arith.constant dense<0xFF800000> : vector<8xf32>
    %133 = vector.multi_reduction <maximumf>, %132, %cst_38 [1] : vector<8x8xf32> to vector<8xf32>
    %134 = vector.shape_cast %133 : vector<8xf32> to vector<8x1xf32>
    %135 = vector.broadcast %134 : vector<8x1xf32> to vector<8x8xf32>
    %136 = arith.subf %132, %135 : vector<8x8xf32>
    %137 = math.exp %136 : vector<8x8xf32>
    %cst_39 = arith.constant dense<0.000000e+00> : vector<8xf32>
    %138 = vector.multi_reduction <add>, %137, %cst_39 [1] : vector<8x8xf32> to vector<8xf32>
    %139 = vector.shape_cast %138 : vector<8xf32> to vector<8x1xf32>
    %140 = tpu.reciprocal %139 {approx = true} : vector<8x1xf32> -> vector<8x1xf32>
    %141 = vector.broadcast %140 : vector<8x1xf32> to vector<8x8xf32>
    %142 = arith.mulf %137, %141 : vector<8x8xf32>
    %143 = arith.truncf %142 : vector<8x8xf32> to vector<8x8xbf16>
    "tpu.trace_start"() <{level = 10 : i32, message = "qk,kd->qd"}> : () -> ()
    %cst_40 = arith.constant dense<0.000000e+00> : vector<8x8xf32>
    %144 = tpu.matmul %143, %128, %cst_40 {dimension_numbers = #tpu.dot_dimension_numbers<[1], [0], [0], [1], [0, 0, 1, 1], [], []>} : vector<8x8xbf16>, vector<8x8xbf16>, vector<8x8xf32> -> vector<8x8xf32>
    "tpu.trace_stop"() : () -> ()
    %145 = vector.extract_strided_slice %118 {offsets = [0, 8], sizes = [8, 8], strides = [1, 1]} : vector<8x32xf32> to vector<8x8xf32>
    %146 = arith.truncf %145 : vector<8x8xf32> to vector<8x8xbf16>
    %147 = vector.extract_strided_slice %119 {offsets = [0, 8], sizes = [8, 8], strides = [1, 1]} : vector<8x32xf32> to vector<8x8xf32>
    %148 = arith.truncf %147 : vector<8x8xf32> to vector<8x8xbf16>
    %149 = vector.extract_strided_slice %120 {offsets = [0, 8], sizes = [8, 8], strides = [1, 1]} : vector<8x32xf32> to vector<8x8xf32>
    %150 = arith.truncf %149 : vector<8x8xf32> to vector<8x8xbf16>
    "tpu.trace_start"() <{level = 10 : i32, message = "qd,kd->qk"}> : () -> ()
    %cst_41 = arith.constant dense<0.000000e+00> : vector<8x8xf32>
    %151 = tpu.matmul %146, %148, %cst_41 {dimension_numbers = #tpu.dot_dimension_numbers<[1], [1], [0], [0], [0, 0, 1, 0], [], []>} : vector<8x8xbf16>, vector<8x8xbf16>, vector<8x8xf32> -> vector<8x8xf32>
    "tpu.trace_stop"() : () -> ()
    %cst_42 = arith.constant 0.353553385 : f32
    %152 = vector.broadcast %cst_42 : f32 to vector<8x8xf32>
    %153 = arith.mulf %151, %152 : vector<8x8xf32>
    %154 = arith.addf %153, %122 : vector<8x8xf32>
    %cst_43 = arith.constant dense<0xFF800000> : vector<8xf32>
    %155 = vector.multi_reduction <maximumf>, %154, %cst_43 [1] : vector<8x8xf32> to vector<8xf32>
    %156 = vector.shape_cast %155 : vector<8xf32> to vector<8x1xf32>
    %157 = vector.broadcast %156 : vector<8x1xf32> to vector<8x8xf32>
    %158 = arith.subf %154, %157 : vector<8x8xf32>
    %159 = math.exp %158 : vector<8x8xf32>
    %cst_44 = arith.constant dense<0.000000e+00> : vector<8xf32>
    %160 = vector.multi_reduction <add>, %159, %cst_44 [1] : vector<8x8xf32> to vector<8xf32>
    %161 = vector.shape_cast %160 : vector<8xf32> to vector<8x1xf32>
    %162 = tpu.reciprocal %161 {approx = true} : vector<8x1xf32> -> vector<8x1xf32>
    %163 = vector.broadcast %162 : vector<8x1xf32> to vector<8x8xf32>
    %164 = arith.mulf %159, %163 : vector<8x8xf32>
    %165 = arith.truncf %164 : vector<8x8xf32> to vector<8x8xbf16>
    "tpu.trace_start"() <{level = 10 : i32, message = "qk,kd->qd"}> : () -> ()
    %cst_45 = arith.constant dense<0.000000e+00> : vector<8x8xf32>
    %166 = tpu.matmul %165, %150, %cst_45 {dimension_numbers = #tpu.dot_dimension_numbers<[1], [0], [0], [1], [0, 0, 1, 1], [], []>} : vector<8x8xbf16>, vector<8x8xbf16>, vector<8x8xf32> -> vector<8x8xf32>
    "tpu.trace_stop"() : () -> ()
    %167 = vector.extract_strided_slice %118 {offsets = [0, 16], sizes = [8, 8], strides = [1, 1]} : vector<8x32xf32> to vector<8x8xf32>
    %168 = arith.truncf %167 : vector<8x8xf32> to vector<8x8xbf16>
    %169 = vector.extract_strided_slice %119 {offsets = [0, 16], sizes = [8, 8], strides = [1, 1]} : vector<8x32xf32> to vector<8x8xf32>
    %170 = arith.truncf %169 : vector<8x8xf32> to vector<8x8xbf16>
    %171 = vector.extract_strided_slice %120 {offsets = [0, 16], sizes = [8, 8], strides = [1, 1]} : vector<8x32xf32> to vector<8x8xf32>
    %172 = arith.truncf %171 : vector<8x8xf32> to vector<8x8xbf16>
    "tpu.trace_start"() <{level = 10 : i32, message = "qd,kd->qk"}> : () -> ()
    %cst_46 = arith.constant dense<0.000000e+00> : vector<8x8xf32>
    %173 = tpu.matmul %168, %170, %cst_46 {dimension_numbers = #tpu.dot_dimension_numbers<[1], [1], [0], [0], [0, 0, 1, 0], [], []>} : vector<8x8xbf16>, vector<8x8xbf16>, vector<8x8xf32> -> vector<8x8xf32>
    "tpu.trace_stop"() : () -> ()
    %cst_47 = arith.constant 0.353553385 : f32
    %174 = vector.broadcast %cst_47 : f32 to vector<8x8xf32>
    %175 = arith.mulf %173, %174 : vector<8x8xf32>
    %176 = arith.addf %175, %122 : vector<8x8xf32>
    %cst_48 = arith.constant dense<0xFF800000> : vector<8xf32>
    %177 = vector.multi_reduction <maximumf>, %176, %cst_48 [1] : vector<8x8xf32> to vector<8xf32>
    %178 = vector.shape_cast %177 : vector<8xf32> to vector<8x1xf32>
    %179 = vector.broadcast %178 : vector<8x1xf32> to vector<8x8xf32>
    %180 = arith.subf %176, %179 : vector<8x8xf32>
    %181 = math.exp %180 : vector<8x8xf32>
    %cst_49 = arith.constant dense<0.000000e+00> : vector<8xf32>
    %182 = vector.multi_reduction <add>, %181, %cst_49 [1] : vector<8x8xf32> to vector<8xf32>
    %183 = vector.shape_cast %182 : vector<8xf32> to vector<8x1xf32>
    %184 = tpu.reciprocal %183 {approx = true} : vector<8x1xf32> -> vector<8x1xf32>
    %185 = vector.broadcast %184 : vector<8x1xf32> to vector<8x8xf32>
    %186 = arith.mulf %181, %185 : vector<8x8xf32>
    %187 = arith.truncf %186 : vector<8x8xf32> to vector<8x8xbf16>
    "tpu.trace_start"() <{level = 10 : i32, message = "qk,kd->qd"}> : () -> ()
    %cst_50 = arith.constant dense<0.000000e+00> : vector<8x8xf32>
    %188 = tpu.matmul %187, %172, %cst_50 {dimension_numbers = #tpu.dot_dimension_numbers<[1], [0], [0], [1], [0, 0, 1, 1], [], []>} : vector<8x8xbf16>, vector<8x8xbf16>, vector<8x8xf32> -> vector<8x8xf32>
    "tpu.trace_stop"() : () -> ()
    %189 = vector.extract_strided_slice %118 {offsets = [0, 24], sizes = [8, 8], strides = [1, 1]} : vector<8x32xf32> to vector<8x8xf32>
    %190 = arith.truncf %189 : vector<8x8xf32> to vector<8x8xbf16>
    %191 = vector.extract_strided_slice %119 {offsets = [0, 24], sizes = [8, 8], strides = [1, 1]} : vector<8x32xf32> to vector<8x8xf32>
    %192 = arith.truncf %191 : vector<8x8xf32> to vector<8x8xbf16>
    %193 = vector.extract_strided_slice %120 {offsets = [0, 24], sizes = [8, 8], strides = [1, 1]} : vector<8x32xf32> to vector<8x8xf32>
    %194 = arith.truncf %193 : vector<8x8xf32> to vector<8x8xbf16>
    "tpu.trace_start"() <{level = 10 : i32, message = "qd,kd->qk"}> : () -> ()
    %cst_51 = arith.constant dense<0.000000e+00> : vector<8x8xf32>
    %195 = tpu.matmul %190, %192, %cst_51 {dimension_numbers = #tpu.dot_dimension_numbers<[1], [1], [0], [0], [0, 0, 1, 0], [], []>} : vector<8x8xbf16>, vector<8x8xbf16>, vector<8x8xf32> -> vector<8x8xf32>
    "tpu.trace_stop"() : () -> ()
    %cst_52 = arith.constant 0.353553385 : f32
    %196 = vector.broadcast %cst_52 : f32 to vector<8x8xf32>
    %197 = arith.mulf %195, %196 : vector<8x8xf32>
    %198 = arith.addf %197, %122 : vector<8x8xf32>
    %cst_53 = arith.constant dense<0xFF800000> : vector<8xf32>
    %199 = vector.multi_reduction <maximumf>, %198, %cst_53 [1] : vector<8x8xf32> to vector<8xf32>
    %200 = vector.shape_cast %199 : vector<8xf32> to vector<8x1xf32>
    %201 = vector.broadcast %200 : vector<8x1xf32> to vector<8x8xf32>
    %202 = arith.subf %198, %201 : vector<8x8xf32>
    %203 = math.exp %202 : vector<8x8xf32>
    %cst_54 = arith.constant dense<0.000000e+00> : vector<8xf32>
    %204 = vector.multi_reduction <add>, %203, %cst_54 [1] : vector<8x8xf32> to vector<8xf32>
    %205 = vector.shape_cast %204 : vector<8xf32> to vector<8x1xf32>
    %206 = tpu.reciprocal %205 {approx = true} : vector<8x1xf32> -> vector<8x1xf32>
    %207 = vector.broadcast %206 : vector<8x1xf32> to vector<8x8xf32>
    %208 = arith.mulf %203, %207 : vector<8x8xf32>
    %209 = arith.truncf %208 : vector<8x8xf32> to vector<8x8xbf16>
    "tpu.trace_start"() <{level = 10 : i32, message = "qk,kd->qd"}> : () -> ()
    %cst_55 = arith.constant dense<0.000000e+00> : vector<8x8xf32>
    %210 = tpu.matmul %209, %194, %cst_55 {dimension_numbers = #tpu.dot_dimension_numbers<[1], [0], [0], [1], [0, 0, 1, 1], [], []>} : vector<8x8xbf16>, vector<8x8xbf16>, vector<8x8xf32> -> vector<8x8xf32>
    "tpu.trace_stop"() : () -> ()
    %211 = tpu.concatenate %144, %166, %188, %210 in 1 : vector<8x8xf32>, vector<8x8xf32>, vector<8x8xf32>, vector<8x8xf32> -> vector<8x32xf32>
    %212 = arith.truncf %211 : vector<8x32xf32> to vector<8x32xbf16>
    %cst_56 = arith.constant dense<0.000000e+00> : vector<8x32xf32>
    %213 = tpu.matmul %212, %18, %cst_56 {dimension_numbers = #tpu.dot_dimension_numbers<[1], [0], [0], [1], [0, 0, 1, 1], [], []>} : vector<8x32xbf16>, vector<32x32xbf16>, vector<8x32xf32> -> vector<8x32xf32>
    %214 = vector.broadcast %19 : vector<1x32xf32> to vector<8x32xf32>
    %215 = arith.addf %213, %214 : vector<8x32xf32>
    %216 = tpu.concatenate %117, %215 in 0 : vector<8x32xf32>, vector<8x32xf32> -> vector<16x32xf32>
    %217 = arith.addf %7, %216 : vector<16x32xf32>
    %218 = vector.extract_strided_slice %6 {offsets = [2, 0], sizes = [1, 32], strides = [1, 1]} : vector<16x128xf32> to vector<1x32xf32>
    %219 = vector.extract_strided_slice %6 {offsets = [3, 0], sizes = [1, 32], strides = [1, 1]} : vector<16x128xf32> to vector<1x32xf32>
    %cst_57 = arith.constant dense<0.000000e+00> : vector<16xf32>
    %220 = vector.multi_reduction <add>, %217, %cst_57 [1] : vector<16x32xf32> to vector<16xf32>
    %221 = vector.shape_cast %220 : vector<16xf32> to vector<16x1xf32>
    %cst_58 = arith.constant 3.200000e+01 : f32
    %222 = vector.broadcast %cst_58 : f32 to vector<16x1xf32>
    %223 = arith.divf %221, %222 : vector<16x1xf32>
    %224 = vector.broadcast %223 : vector<16x1xf32> to vector<16x32xf32>
    %225 = arith.subf %217, %224 : vector<16x32xf32>
    %226 = arith.mulf %225, %225 : vector<16x32xf32>
    %cst_59 = arith.constant dense<0.000000e+00> : vector<16xf32>
    %227 = vector.multi_reduction <add>, %226, %cst_59 [1] : vector<16x32xf32> to vector<16xf32>
    %228 = vector.shape_cast %227 : vector<16xf32> to vector<16x1xf32>
    %cst_60 = arith.constant 3.200000e+01 : f32
    %229 = vector.broadcast %cst_60 : f32 to vector<16x1xf32>
    %230 = arith.divf %228, %229 : vector<16x1xf32>
    %231 = vector.broadcast %223 : vector<16x1xf32> to vector<16x32xf32>
    %232 = arith.subf %217, %231 : vector<16x32xf32>
    %cst_61 = arith.constant 9.99999996E-13 : f32
    %233 = vector.broadcast %cst_61 : f32 to vector<16x1xf32>
    %234 = arith.addf %230, %233 : vector<16x1xf32>
    %235 = math.rsqrt %234 : vector<16x1xf32>
    %236 = vector.broadcast %235 : vector<16x1xf32> to vector<16x32xf32>
    %237 = arith.mulf %232, %236 : vector<16x32xf32>
    %238 = vector.broadcast %218 : vector<1x32xf32> to vector<16x32xf32>
    %239 = arith.mulf %237, %238 : vector<16x32xf32>
    %240 = vector.broadcast %219 : vector<1x32xf32> to vector<16x32xf32>
    %241 = arith.addf %239, %240 : vector<16x32xf32>
    %242 = arith.index_cast %arg0 : i32 to index
    %c0_62 = arith.constant 0 : index
    %c0_63 = arith.constant 0 : index
    %243 = vector.load %arg9[%242, %c0_62, %c0_63] : memref<2x32x32xbf16, #tpu.memory_space<vmem>>, vector<1x32x32xbf16>
    %244 = vector.shape_cast %243 : vector<1x32x32xbf16> to vector<32x32xbf16>
    %245 = vector.extract_strided_slice %6 {offsets = [4, 0], sizes = [1, 32], strides = [1, 1]} : vector<16x128xf32> to vector<1x32xf32>
    %246 = arith.truncf %241 : vector<16x32xf32> to vector<16x32xbf16>
    %cst_64 = arith.constant dense<0.000000e+00> : vector<16x32xf32>
    %247 = tpu.matmul %246, %244, %cst_64 {dimension_numbers = #tpu.dot_dimension_numbers<[1], [0], [0], [1], [0, 0, 1, 1], [], []>} : vector<16x32xbf16>, vector<32x32xbf16>, vector<16x32xf32> -> vector<16x32xf32>
    %248 = vector.broadcast %245 : vector<1x32xf32> to vector<16x32xf32>
    %249 = arith.addf %247, %248 : vector<16x32xf32>
    %250 = arith.index_cast %arg0 : i32 to index
    %c0_65 = arith.constant 0 : index
    %c0_66 = arith.constant 0 : index
    %251 = vector.load %arg10[%250, %c0_65, %c0_66] : memref<2x32x64xbf16, #tpu.memory_space<vmem>>, vector<1x32x64xbf16>
    %252 = vector.shape_cast %251 : vector<1x32x64xbf16> to vector<32x64xbf16>
    %253 = vector.extract_strided_slice %6 {offsets = [5, 0], sizes = [1, 64], strides = [1, 1]} : vector<16x128xf32> to vector<1x64xf32>
    %254 = arith.index_cast %arg0 : i32 to index
    %c0_67 = arith.constant 0 : index
    %c0_68 = arith.constant 0 : index
    %255 = vector.load %arg11[%254, %c0_67, %c0_68] : memref<2x32x32xbf16, #tpu.memory_space<vmem>>, vector<1x32x32xbf16>
    %256 = vector.shape_cast %255 : vector<1x32x32xbf16> to vector<32x32xbf16>
    %257 = vector.extract_strided_slice %6 {offsets = [6, 0], sizes = [1, 32], strides = [1, 1]} : vector<16x128xf32> to vector<1x32xf32>
    %c0_69 = arith.constant 0 : index
    %c0_70 = arith.constant 0 : index
    %c0_71 = arith.constant 0 : index
    %258 = vector.load %arg3[%c0_69, %c0_70, %c0_71] : memref<2x10x32xf32, #tpu.memory_space<vmem>>, vector<1x10x32xf32>
    %259 = vector.shape_cast %258 : vector<1x10x32xf32> to vector<10x32xf32>
    %260 = arith.truncf %259 : vector<10x32xf32> to vector<10x32xbf16>
    %cst_72 = arith.constant dense<0.000000e+00> : vector<10x64xf32>
    %261 = tpu.matmul %260, %252, %cst_72 {dimension_numbers = #tpu.dot_dimension_numbers<[1], [0], [0], [1], [0, 0, 1, 1], [], []>} : vector<10x32xbf16>, vector<32x64xbf16>, vector<10x64xf32> -> vector<10x64xf32>
    %262 = vector.broadcast %253 : vector<1x64xf32> to vector<10x64xf32>
    %263 = arith.addf %261, %262 : vector<10x64xf32>
    %264 = vector.extract_strided_slice %249 {offsets = [0, 0], sizes = [8, 32], strides = [1, 1]} : vector<16x32xf32> to vector<8x32xf32>
    %265 = vector.extract_strided_slice %263 {offsets = [0, 0], sizes = [10, 32], strides = [1, 1]} : vector<10x64xf32> to vector<10x32xf32>
    %266 = vector.extract_strided_slice %263 {offsets = [0, 32], sizes = [10, 32], strides = [1, 1]} : vector<10x64xf32> to vector<10x32xf32>
    %267 = vector.extract_strided_slice %264 {offsets = [0, 0], sizes = [8, 8], strides = [1, 1]} : vector<8x32xf32> to vector<8x8xf32>
    %268 = arith.truncf %267 : vector<8x8xf32> to vector<8x8xbf16>
    %269 = vector.extract_strided_slice %265 {offsets = [0, 0], sizes = [10, 8], strides = [1, 1]} : vector<10x32xf32> to vector<10x8xf32>
    %270 = arith.truncf %269 : vector<10x8xf32> to vector<10x8xbf16>
    %271 = vector.extract_strided_slice %266 {offsets = [0, 0], sizes = [10, 8], strides = [1, 1]} : vector<10x32xf32> to vector<10x8xf32>
    %272 = arith.truncf %271 : vector<10x8xf32> to vector<10x8xbf16>
    "tpu.trace_start"() <{level = 10 : i32, message = "qd,kd->qk"}> : () -> ()
    %cst_73 = arith.constant dense<0.000000e+00> : vector<8x10xf32>
    %273 = tpu.matmul %268, %270, %cst_73 {dimension_numbers = #tpu.dot_dimension_numbers<[1], [1], [0], [0], [0, 0, 1, 0], [], []>} : vector<8x8xbf16>, vector<10x8xbf16>, vector<8x10xf32> -> vector<8x10xf32>
    "tpu.trace_stop"() : () -> ()
    %cst_74 = arith.constant 0.353553385 : f32
    %274 = vector.broadcast %cst_74 : f32 to vector<8x10xf32>
    %275 = arith.mulf %273, %274 : vector<8x10xf32>
    %cst_75 = arith.constant dense<0xFF800000> : vector<8xf32>
    %276 = vector.multi_reduction <maximumf>, %275, %cst_75 [1] : vector<8x10xf32> to vector<8xf32>
    %277 = vector.shape_cast %276 : vector<8xf32> to vector<8x1xf32>
    %278 = vector.broadcast %277 : vector<8x1xf32> to vector<8x10xf32>
    %279 = arith.subf %275, %278 : vector<8x10xf32>
    %280 = math.exp %279 : vector<8x10xf32>
    %cst_76 = arith.constant dense<0.000000e+00> : vector<8xf32>
    %281 = vector.multi_reduction <add>, %280, %cst_76 [1] : vector<8x10xf32> to vector<8xf32>
    %282 = vector.shape_cast %281 : vector<8xf32> to vector<8x1xf32>
    %283 = tpu.reciprocal %282 {approx = true} : vector<8x1xf32> -> vector<8x1xf32>
    %284 = vector.broadcast %283 : vector<8x1xf32> to vector<8x10xf32>
    %285 = arith.mulf %280, %284 : vector<8x10xf32>
    %286 = arith.truncf %285 : vector<8x10xf32> to vector<8x10xbf16>
    "tpu.trace_start"() <{level = 10 : i32, message = "qk,kd->qd"}> : () -> ()
    %cst_77 = arith.constant dense<0.000000e+00> : vector<8x8xf32>
    %287 = tpu.matmul %286, %272, %cst_77 {dimension_numbers = #tpu.dot_dimension_numbers<[1], [0], [0], [1], [0, 0, 1, 1], [], []>} : vector<8x10xbf16>, vector<10x8xbf16>, vector<8x8xf32> -> vector<8x8xf32>
    "tpu.trace_stop"() : () -> ()
    %288 = vector.extract_strided_slice %264 {offsets = [0, 8], sizes = [8, 8], strides = [1, 1]} : vector<8x32xf32> to vector<8x8xf32>
    %289 = arith.truncf %288 : vector<8x8xf32> to vector<8x8xbf16>
    %290 = vector.extract_strided_slice %265 {offsets = [0, 8], sizes = [10, 8], strides = [1, 1]} : vector<10x32xf32> to vector<10x8xf32>
    %291 = arith.truncf %290 : vector<10x8xf32> to vector<10x8xbf16>
    %292 = vector.extract_strided_slice %266 {offsets = [0, 8], sizes = [10, 8], strides = [1, 1]} : vector<10x32xf32> to vector<10x8xf32>
    %293 = arith.truncf %292 : vector<10x8xf32> to vector<10x8xbf16>
    "tpu.trace_start"() <{level = 10 : i32, message = "qd,kd->qk"}> : () -> ()
    %cst_78 = arith.constant dense<0.000000e+00> : vector<8x10xf32>
    %294 = tpu.matmul %289, %291, %cst_78 {dimension_numbers = #tpu.dot_dimension_numbers<[1], [1], [0], [0], [0, 0, 1, 0], [], []>} : vector<8x8xbf16>, vector<10x8xbf16>, vector<8x10xf32> -> vector<8x10xf32>
    "tpu.trace_stop"() : () -> ()
    %cst_79 = arith.constant 0.353553385 : f32
    %295 = vector.broadcast %cst_79 : f32 to vector<8x10xf32>
    %296 = arith.mulf %294, %295 : vector<8x10xf32>
    %cst_80 = arith.constant dense<0xFF800000> : vector<8xf32>
    %297 = vector.multi_reduction <maximumf>, %296, %cst_80 [1] : vector<8x10xf32> to vector<8xf32>
    %298 = vector.shape_cast %297 : vector<8xf32> to vector<8x1xf32>
    %299 = vector.broadcast %298 : vector<8x1xf32> to vector<8x10xf32>
    %300 = arith.subf %296, %299 : vector<8x10xf32>
    %301 = math.exp %300 : vector<8x10xf32>
    %cst_81 = arith.constant dense<0.000000e+00> : vector<8xf32>
    %302 = vector.multi_reduction <add>, %301, %cst_81 [1] : vector<8x10xf32> to vector<8xf32>
    %303 = vector.shape_cast %302 : vector<8xf32> to vector<8x1xf32>
    %304 = tpu.reciprocal %303 {approx = true} : vector<8x1xf32> -> vector<8x1xf32>
    %305 = vector.broadcast %304 : vector<8x1xf32> to vector<8x10xf32>
    %306 = arith.mulf %301, %305 : vector<8x10xf32>
    %307 = arith.truncf %306 : vector<8x10xf32> to vector<8x10xbf16>
    "tpu.trace_start"() <{level = 10 : i32, message = "qk,kd->qd"}> : () -> ()
    %cst_82 = arith.constant dense<0.000000e+00> : vector<8x8xf32>
    %308 = tpu.matmul %307, %293, %cst_82 {dimension_numbers = #tpu.dot_dimension_numbers<[1], [0], [0], [1], [0, 0, 1, 1], [], []>} : vector<8x10xbf16>, vector<10x8xbf16>, vector<8x8xf32> -> vector<8x8xf32>
    "tpu.trace_stop"() : () -> ()
    %309 = vector.extract_strided_slice %264 {offsets = [0, 16], sizes = [8, 8], strides = [1, 1]} : vector<8x32xf32> to vector<8x8xf32>
    %310 = arith.truncf %309 : vector<8x8xf32> to vector<8x8xbf16>
    %311 = vector.extract_strided_slice %265 {offsets = [0, 16], sizes = [10, 8], strides = [1, 1]} : vector<10x32xf32> to vector<10x8xf32>
    %312 = arith.truncf %311 : vector<10x8xf32> to vector<10x8xbf16>
    %313 = vector.extract_strided_slice %266 {offsets = [0, 16], sizes = [10, 8], strides = [1, 1]} : vector<10x32xf32> to vector<10x8xf32>
    %314 = arith.truncf %313 : vector<10x8xf32> to vector<10x8xbf16>
    "tpu.trace_start"() <{level = 10 : i32, message = "qd,kd->qk"}> : () -> ()
    %cst_83 = arith.constant dense<0.000000e+00> : vector<8x10xf32>
    %315 = tpu.matmul %310, %312, %cst_83 {dimension_numbers = #tpu.dot_dimension_numbers<[1], [1], [0], [0], [0, 0, 1, 0], [], []>} : vector<8x8xbf16>, vector<10x8xbf16>, vector<8x10xf32> -> vector<8x10xf32>
    "tpu.trace_stop"() : () -> ()
    %cst_84 = arith.constant 0.353553385 : f32
    %316 = vector.broadcast %cst_84 : f32 to vector<8x10xf32>
    %317 = arith.mulf %315, %316 : vector<8x10xf32>
    %cst_85 = arith.constant dense<0xFF800000> : vector<8xf32>
    %318 = vector.multi_reduction <maximumf>, %317, %cst_85 [1] : vector<8x10xf32> to vector<8xf32>
    %319 = vector.shape_cast %318 : vector<8xf32> to vector<8x1xf32>
    %320 = vector.broadcast %319 : vector<8x1xf32> to vector<8x10xf32>
    %321 = arith.subf %317, %320 : vector<8x10xf32>
    %322 = math.exp %321 : vector<8x10xf32>
    %cst_86 = arith.constant dense<0.000000e+00> : vector<8xf32>
    %323 = vector.multi_reduction <add>, %322, %cst_86 [1] : vector<8x10xf32> to vector<8xf32>
    %324 = vector.shape_cast %323 : vector<8xf32> to vector<8x1xf32>
    %325 = tpu.reciprocal %324 {approx = true} : vector<8x1xf32> -> vector<8x1xf32>
    %326 = vector.broadcast %325 : vector<8x1xf32> to vector<8x10xf32>
    %327 = arith.mulf %322, %326 : vector<8x10xf32>
    %328 = arith.truncf %327 : vector<8x10xf32> to vector<8x10xbf16>
    "tpu.trace_start"() <{level = 10 : i32, message = "qk,kd->qd"}> : () -> ()
    %cst_87 = arith.constant dense<0.000000e+00> : vector<8x8xf32>
    %329 = tpu.matmul %328, %314, %cst_87 {dimension_numbers = #tpu.dot_dimension_numbers<[1], [0], [0], [1], [0, 0, 1, 1], [], []>} : vector<8x10xbf16>, vector<10x8xbf16>, vector<8x8xf32> -> vector<8x8xf32>
    "tpu.trace_stop"() : () -> ()
    %330 = vector.extract_strided_slice %264 {offsets = [0, 24], sizes = [8, 8], strides = [1, 1]} : vector<8x32xf32> to vector<8x8xf32>
    %331 = arith.truncf %330 : vector<8x8xf32> to vector<8x8xbf16>
    %332 = vector.extract_strided_slice %265 {offsets = [0, 24], sizes = [10, 8], strides = [1, 1]} : vector<10x32xf32> to vector<10x8xf32>
    %333 = arith.truncf %332 : vector<10x8xf32> to vector<10x8xbf16>
    %334 = vector.extract_strided_slice %266 {offsets = [0, 24], sizes = [10, 8], strides = [1, 1]} : vector<10x32xf32> to vector<10x8xf32>
    %335 = arith.truncf %334 : vector<10x8xf32> to vector<10x8xbf16>
    "tpu.trace_start"() <{level = 10 : i32, message = "qd,kd->qk"}> : () -> ()
    %cst_88 = arith.constant dense<0.000000e+00> : vector<8x10xf32>
    %336 = tpu.matmul %331, %333, %cst_88 {dimension_numbers = #tpu.dot_dimension_numbers<[1], [1], [0], [0], [0, 0, 1, 0], [], []>} : vector<8x8xbf16>, vector<10x8xbf16>, vector<8x10xf32> -> vector<8x10xf32>
    "tpu.trace_stop"() : () -> ()
    %cst_89 = arith.constant 0.353553385 : f32
    %337 = vector.broadcast %cst_89 : f32 to vector<8x10xf32>
    %338 = arith.mulf %336, %337 : vector<8x10xf32>
    %cst_90 = arith.constant dense<0xFF800000> : vector<8xf32>
    %339 = vector.multi_reduction <maximumf>, %338, %cst_90 [1] : vector<8x10xf32> to vector<8xf32>
    %340 = vector.shape_cast %339 : vector<8xf32> to vector<8x1xf32>
    %341 = vector.broadcast %340 : vector<8x1xf32> to vector<8x10xf32>
    %342 = arith.subf %338, %341 : vector<8x10xf32>
    %343 = math.exp %342 : vector<8x10xf32>
    %cst_91 = arith.constant dense<0.000000e+00> : vector<8xf32>
    %344 = vector.multi_reduction <add>, %343, %cst_91 [1] : vector<8x10xf32> to vector<8xf32>
    %345 = vector.shape_cast %344 : vector<8xf32> to vector<8x1xf32>
    %346 = tpu.reciprocal %345 {approx = true} : vector<8x1xf32> -> vector<8x1xf32>
    %347 = vector.broadcast %346 : vector<8x1xf32> to vector<8x10xf32>
    %348 = arith.mulf %343, %347 : vector<8x10xf32>
    %349 = arith.truncf %348 : vector<8x10xf32> to vector<8x10xbf16>
    "tpu.trace_start"() <{level = 10 : i32, message = "qk,kd->qd"}> : () -> ()
    %cst_92 = arith.constant dense<0.000000e+00> : vector<8x8xf32>
    %350 = tpu.matmul %349, %335, %cst_92 {dimension_numbers = #tpu.dot_dimension_numbers<[1], [0], [0], [1], [0, 0, 1, 1], [], []>} : vector<8x10xbf16>, vector<10x8xbf16>, vector<8x8xf32> -> vector<8x8xf32>
    "tpu.trace_stop"() : () -> ()
    %351 = tpu.concatenate %287, %308, %329, %350 in 1 : vector<8x8xf32>, vector<8x8xf32>, vector<8x8xf32>, vector<8x8xf32> -> vector<8x32xf32>
    %352 = arith.truncf %351 : vector<8x32xf32> to vector<8x32xbf16>
    %cst_93 = arith.constant dense<0.000000e+00> : vector<8x32xf32>
    %353 = tpu.matmul %352, %256, %cst_93 {dimension_numbers = #tpu.dot_dimension_numbers<[1], [0], [0], [1], [0, 0, 1, 1], [], []>} : vector<8x32xbf16>, vector<32x32xbf16>, vector<8x32xf32> -> vector<8x32xf32>
    %354 = vector.broadcast %257 : vector<1x32xf32> to vector<8x32xf32>
    %355 = arith.addf %353, %354 : vector<8x32xf32>
    %c1_94 = arith.constant 1 : index
    %c0_95 = arith.constant 0 : index
    %c0_96 = arith.constant 0 : index
    %356 = vector.load %arg3[%c1_94, %c0_95, %c0_96] : memref<2x10x32xf32, #tpu.memory_space<vmem>>, vector<1x10x32xf32>
    %357 = vector.shape_cast %356 : vector<1x10x32xf32> to vector<10x32xf32>
    %358 = arith.truncf %357 : vector<10x32xf32> to vector<10x32xbf16>
    %cst_97 = arith.constant dense<0.000000e+00> : vector<10x64xf32>
    %359 = tpu.matmul %358, %252, %cst_97 {dimension_numbers = #tpu.dot_dimension_numbers<[1], [0], [0], [1], [0, 0, 1, 1], [], []>} : vector<10x32xbf16>, vector<32x64xbf16>, vector<10x64xf32> -> vector<10x64xf32>
    %360 = vector.broadcast %253 : vector<1x64xf32> to vector<10x64xf32>
    %361 = arith.addf %359, %360 : vector<10x64xf32>
    %362 = vector.extract_strided_slice %249 {offsets = [8, 0], sizes = [8, 32], strides = [1, 1]} : vector<16x32xf32> to vector<8x32xf32>
    %363 = vector.extract_strided_slice %361 {offsets = [0, 0], sizes = [10, 32], strides = [1, 1]} : vector<10x64xf32> to vector<10x32xf32>
    %364 = vector.extract_strided_slice %361 {offsets = [0, 32], sizes = [10, 32], strides = [1, 1]} : vector<10x64xf32> to vector<10x32xf32>
    %365 = vector.extract_strided_slice %362 {offsets = [0, 0], sizes = [8, 8], strides = [1, 1]} : vector<8x32xf32> to vector<8x8xf32>
    %366 = arith.truncf %365 : vector<8x8xf32> to vector<8x8xbf16>
    %367 = vector.extract_strided_slice %363 {offsets = [0, 0], sizes = [10, 8], strides = [1, 1]} : vector<10x32xf32> to vector<10x8xf32>
    %368 = arith.truncf %367 : vector<10x8xf32> to vector<10x8xbf16>
    %369 = vector.extract_strided_slice %364 {offsets = [0, 0], sizes = [10, 8], strides = [1, 1]} : vector<10x32xf32> to vector<10x8xf32>
    %370 = arith.truncf %369 : vector<10x8xf32> to vector<10x8xbf16>
    "tpu.trace_start"() <{level = 10 : i32, message = "qd,kd->qk"}> : () -> ()
    %cst_98 = arith.constant dense<0.000000e+00> : vector<8x10xf32>
    %371 = tpu.matmul %366, %368, %cst_98 {dimension_numbers = #tpu.dot_dimension_numbers<[1], [1], [0], [0], [0, 0, 1, 0], [], []>} : vector<8x8xbf16>, vector<10x8xbf16>, vector<8x10xf32> -> vector<8x10xf32>
    "tpu.trace_stop"() : () -> ()
    %cst_99 = arith.constant 0.353553385 : f32
    %372 = vector.broadcast %cst_99 : f32 to vector<8x10xf32>
    %373 = arith.mulf %371, %372 : vector<8x10xf32>
    %cst_100 = arith.constant dense<0xFF800000> : vector<8xf32>
    %374 = vector.multi_reduction <maximumf>, %373, %cst_100 [1] : vector<8x10xf32> to vector<8xf32>
    %375 = vector.shape_cast %374 : vector<8xf32> to vector<8x1xf32>
    %376 = vector.broadcast %375 : vector<8x1xf32> to vector<8x10xf32>
    %377 = arith.subf %373, %376 : vector<8x10xf32>
    %378 = math.exp %377 : vector<8x10xf32>
    %cst_101 = arith.constant dense<0.000000e+00> : vector<8xf32>
    %379 = vector.multi_reduction <add>, %378, %cst_101 [1] : vector<8x10xf32> to vector<8xf32>
    %380 = vector.shape_cast %379 : vector<8xf32> to vector<8x1xf32>
    %381 = tpu.reciprocal %380 {approx = true} : vector<8x1xf32> -> vector<8x1xf32>
    %382 = vector.broadcast %381 : vector<8x1xf32> to vector<8x10xf32>
    %383 = arith.mulf %378, %382 : vector<8x10xf32>
    %384 = arith.truncf %383 : vector<8x10xf32> to vector<8x10xbf16>
    "tpu.trace_start"() <{level = 10 : i32, message = "qk,kd->qd"}> : () -> ()
    %cst_102 = arith.constant dense<0.000000e+00> : vector<8x8xf32>
    %385 = tpu.matmul %384, %370, %cst_102 {dimension_numbers = #tpu.dot_dimension_numbers<[1], [0], [0], [1], [0, 0, 1, 1], [], []>} : vector<8x10xbf16>, vector<10x8xbf16>, vector<8x8xf32> -> vector<8x8xf32>
    "tpu.trace_stop"() : () -> ()
    %386 = vector.extract_strided_slice %362 {offsets = [0, 8], sizes = [8, 8], strides = [1, 1]} : vector<8x32xf32> to vector<8x8xf32>
    %387 = arith.truncf %386 : vector<8x8xf32> to vector<8x8xbf16>
    %388 = vector.extract_strided_slice %363 {offsets = [0, 8], sizes = [10, 8], strides = [1, 1]} : vector<10x32xf32> to vector<10x8xf32>
    %389 = arith.truncf %388 : vector<10x8xf32> to vector<10x8xbf16>
    %390 = vector.extract_strided_slice %364 {offsets = [0, 8], sizes = [10, 8], strides = [1, 1]} : vector<10x32xf32> to vector<10x8xf32>
    %391 = arith.truncf %390 : vector<10x8xf32> to vector<10x8xbf16>
    "tpu.trace_start"() <{level = 10 : i32, message = "qd,kd->qk"}> : () -> ()
    %cst_103 = arith.constant dense<0.000000e+00> : vector<8x10xf32>
    %392 = tpu.matmul %387, %389, %cst_103 {dimension_numbers = #tpu.dot_dimension_numbers<[1], [1], [0], [0], [0, 0, 1, 0], [], []>} : vector<8x8xbf16>, vector<10x8xbf16>, vector<8x10xf32> -> vector<8x10xf32>
    "tpu.trace_stop"() : () -> ()
    %cst_104 = arith.constant 0.353553385 : f32
    %393 = vector.broadcast %cst_104 : f32 to vector<8x10xf32>
    %394 = arith.mulf %392, %393 : vector<8x10xf32>
    %cst_105 = arith.constant dense<0xFF800000> : vector<8xf32>
    %395 = vector.multi_reduction <maximumf>, %394, %cst_105 [1] : vector<8x10xf32> to vector<8xf32>
    %396 = vector.shape_cast %395 : vector<8xf32> to vector<8x1xf32>
    %397 = vector.broadcast %396 : vector<8x1xf32> to vector<8x10xf32>
    %398 = arith.subf %394, %397 : vector<8x10xf32>
    %399 = math.exp %398 : vector<8x10xf32>
    %cst_106 = arith.constant dense<0.000000e+00> : vector<8xf32>
    %400 = vector.multi_reduction <add>, %399, %cst_106 [1] : vector<8x10xf32> to vector<8xf32>
    %401 = vector.shape_cast %400 : vector<8xf32> to vector<8x1xf32>
    %402 = tpu.reciprocal %401 {approx = true} : vector<8x1xf32> -> vector<8x1xf32>
    %403 = vector.broadcast %402 : vector<8x1xf32> to vector<8x10xf32>
    %404 = arith.mulf %399, %403 : vector<8x10xf32>
    %405 = arith.truncf %404 : vector<8x10xf32> to vector<8x10xbf16>
    "tpu.trace_start"() <{level = 10 : i32, message = "qk,kd->qd"}> : () -> ()
    %cst_107 = arith.constant dense<0.000000e+00> : vector<8x8xf32>
    %406 = tpu.matmul %405, %391, %cst_107 {dimension_numbers = #tpu.dot_dimension_numbers<[1], [0], [0], [1], [0, 0, 1, 1], [], []>} : vector<8x10xbf16>, vector<10x8xbf16>, vector<8x8xf32> -> vector<8x8xf32>
    "tpu.trace_stop"() : () -> ()
    %407 = vector.extract_strided_slice %362 {offsets = [0, 16], sizes = [8, 8], strides = [1, 1]} : vector<8x32xf32> to vector<8x8xf32>
    %408 = arith.truncf %407 : vector<8x8xf32> to vector<8x8xbf16>
    %409 = vector.extract_strided_slice %363 {offsets = [0, 16], sizes = [10, 8], strides = [1, 1]} : vector<10x32xf32> to vector<10x8xf32>
    %410 = arith.truncf %409 : vector<10x8xf32> to vector<10x8xbf16>
    %411 = vector.extract_strided_slice %364 {offsets = [0, 16], sizes = [10, 8], strides = [1, 1]} : vector<10x32xf32> to vector<10x8xf32>
    %412 = arith.truncf %411 : vector<10x8xf32> to vector<10x8xbf16>
    "tpu.trace_start"() <{level = 10 : i32, message = "qd,kd->qk"}> : () -> ()
    %cst_108 = arith.constant dense<0.000000e+00> : vector<8x10xf32>
    %413 = tpu.matmul %408, %410, %cst_108 {dimension_numbers = #tpu.dot_dimension_numbers<[1], [1], [0], [0], [0, 0, 1, 0], [], []>} : vector<8x8xbf16>, vector<10x8xbf16>, vector<8x10xf32> -> vector<8x10xf32>
    "tpu.trace_stop"() : () -> ()
    %cst_109 = arith.constant 0.353553385 : f32
    %414 = vector.broadcast %cst_109 : f32 to vector<8x10xf32>
    %415 = arith.mulf %413, %414 : vector<8x10xf32>
    %cst_110 = arith.constant dense<0xFF800000> : vector<8xf32>
    %416 = vector.multi_reduction <maximumf>, %415, %cst_110 [1] : vector<8x10xf32> to vector<8xf32>
    %417 = vector.shape_cast %416 : vector<8xf32> to vector<8x1xf32>
    %418 = vector.broadcast %417 : vector<8x1xf32> to vector<8x10xf32>
    %419 = arith.subf %415, %418 : vector<8x10xf32>
    %420 = math.exp %419 : vector<8x10xf32>
    %cst_111 = arith.constant dense<0.000000e+00> : vector<8xf32>
    %421 = vector.multi_reduction <add>, %420, %cst_111 [1] : vector<8x10xf32> to vector<8xf32>
    %422 = vector.shape_cast %421 : vector<8xf32> to vector<8x1xf32>
    %423 = tpu.reciprocal %422 {approx = true} : vector<8x1xf32> -> vector<8x1xf32>
    %424 = vector.broadcast %423 : vector<8x1xf32> to vector<8x10xf32>
    %425 = arith.mulf %420, %424 : vector<8x10xf32>
    %426 = arith.truncf %425 : vector<8x10xf32> to vector<8x10xbf16>
    "tpu.trace_start"() <{level = 10 : i32, message = "qk,kd->qd"}> : () -> ()
    %cst_112 = arith.constant dense<0.000000e+00> : vector<8x8xf32>
    %427 = tpu.matmul %426, %412, %cst_112 {dimension_numbers = #tpu.dot_dimension_numbers<[1], [0], [0], [1], [0, 0, 1, 1], [], []>} : vector<8x10xbf16>, vector<10x8xbf16>, vector<8x8xf32> -> vector<8x8xf32>
    "tpu.trace_stop"() : () -> ()
    %428 = vector.extract_strided_slice %362 {offsets = [0, 24], sizes = [8, 8], strides = [1, 1]} : vector<8x32xf32> to vector<8x8xf32>
    %429 = arith.truncf %428 : vector<8x8xf32> to vector<8x8xbf16>
    %430 = vector.extract_strided_slice %363 {offsets = [0, 24], sizes = [10, 8], strides = [1, 1]} : vector<10x32xf32> to vector<10x8xf32>
    %431 = arith.truncf %430 : vector<10x8xf32> to vector<10x8xbf16>
    %432 = vector.extract_strided_slice %364 {offsets = [0, 24], sizes = [10, 8], strides = [1, 1]} : vector<10x32xf32> to vector<10x8xf32>
    %433 = arith.truncf %432 : vector<10x8xf32> to vector<10x8xbf16>
    "tpu.trace_start"() <{level = 10 : i32, message = "qd,kd->qk"}> : () -> ()
    %cst_113 = arith.constant dense<0.000000e+00> : vector<8x10xf32>
    %434 = tpu.matmul %429, %431, %cst_113 {dimension_numbers = #tpu.dot_dimension_numbers<[1], [1], [0], [0], [0, 0, 1, 0], [], []>} : vector<8x8xbf16>, vector<10x8xbf16>, vector<8x10xf32> -> vector<8x10xf32>
    "tpu.trace_stop"() : () -> ()
    %cst_114 = arith.constant 0.353553385 : f32
    %435 = vector.broadcast %cst_114 : f32 to vector<8x10xf32>
    %436 = arith.mulf %434, %435 : vector<8x10xf32>
    %cst_115 = arith.constant dense<0xFF800000> : vector<8xf32>
    %437 = vector.multi_reduction <maximumf>, %436, %cst_115 [1] : vector<8x10xf32> to vector<8xf32>
    %438 = vector.shape_cast %437 : vector<8xf32> to vector<8x1xf32>
    %439 = vector.broadcast %438 : vector<8x1xf32> to vector<8x10xf32>
    %440 = arith.subf %436, %439 : vector<8x10xf32>
    %441 = math.exp %440 : vector<8x10xf32>
    %cst_116 = arith.constant dense<0.000000e+00> : vector<8xf32>
    %442 = vector.multi_reduction <add>, %441, %cst_116 [1] : vector<8x10xf32> to vector<8xf32>
    %443 = vector.shape_cast %442 : vector<8xf32> to vector<8x1xf32>
    %444 = tpu.reciprocal %443 {approx = true} : vector<8x1xf32> -> vector<8x1xf32>
    %445 = vector.broadcast %444 : vector<8x1xf32> to vector<8x10xf32>
    %446 = arith.mulf %441, %445 : vector<8x10xf32>
    %447 = arith.truncf %446 : vector<8x10xf32> to vector<8x10xbf16>
    "tpu.trace_start"() <{level = 10 : i32, message = "qk,kd->qd"}> : () -> ()
    %cst_117 = arith.constant dense<0.000000e+00> : vector<8x8xf32>
    %448 = tpu.matmul %447, %433, %cst_117 {dimension_numbers = #tpu.dot_dimension_numbers<[1], [0], [0], [1], [0, 0, 1, 1], [], []>} : vector<8x10xbf16>, vector<10x8xbf16>, vector<8x8xf32> -> vector<8x8xf32>
    "tpu.trace_stop"() : () -> ()
    %449 = tpu.concatenate %385, %406, %427, %448 in 1 : vector<8x8xf32>, vector<8x8xf32>, vector<8x8xf32>, vector<8x8xf32> -> vector<8x32xf32>
    %450 = arith.truncf %449 : vector<8x32xf32> to vector<8x32xbf16>
    %cst_118 = arith.constant dense<0.000000e+00> : vector<8x32xf32>
    %451 = tpu.matmul %450, %256, %cst_118 {dimension_numbers = #tpu.dot_dimension_numbers<[1], [0], [0], [1], [0, 0, 1, 1], [], []>} : vector<8x32xbf16>, vector<32x32xbf16>, vector<8x32xf32> -> vector<8x32xf32>
    %452 = vector.broadcast %257 : vector<1x32xf32> to vector<8x32xf32>
    %453 = arith.addf %451, %452 : vector<8x32xf32>
    %454 = tpu.concatenate %355, %453 in 0 : vector<8x32xf32>, vector<8x32xf32> -> vector<16x32xf32>
    %455 = arith.addf %241, %454 : vector<16x32xf32>
    %456 = vector.extract_strided_slice %6 {offsets = [7, 0], sizes = [1, 32], strides = [1, 1]} : vector<16x128xf32> to vector<1x32xf32>
    %457 = vector.extract_strided_slice %6 {offsets = [8, 0], sizes = [1, 32], strides = [1, 1]} : vector<16x128xf32> to vector<1x32xf32>
    %cst_119 = arith.constant dense<0.000000e+00> : vector<16xf32>
    %458 = vector.multi_reduction <add>, %455, %cst_119 [1] : vector<16x32xf32> to vector<16xf32>
    %459 = vector.shape_cast %458 : vector<16xf32> to vector<16x1xf32>
    %cst_120 = arith.constant 3.200000e+01 : f32
    %460 = vector.broadcast %cst_120 : f32 to vector<16x1xf32>
    %461 = arith.divf %459, %460 : vector<16x1xf32>
    %462 = vector.broadcast %461 : vector<16x1xf32> to vector<16x32xf32>
    %463 = arith.subf %455, %462 : vector<16x32xf32>
    %464 = arith.mulf %463, %463 : vector<16x32xf32>
    %cst_121 = arith.constant dense<0.000000e+00> : vector<16xf32>
    %465 = vector.multi_reduction <add>, %464, %cst_121 [1] : vector<16x32xf32> to vector<16xf32>
    %466 = vector.shape_cast %465 : vector<16xf32> to vector<16x1xf32>
    %cst_122 = arith.constant 3.200000e+01 : f32
    %467 = vector.broadcast %cst_122 : f32 to vector<16x1xf32>
    %468 = arith.divf %466, %467 : vector<16x1xf32>
    %469 = vector.broadcast %461 : vector<16x1xf32> to vector<16x32xf32>
    %470 = arith.subf %455, %469 : vector<16x32xf32>
    %cst_123 = arith.constant 9.99999996E-13 : f32
    %471 = vector.broadcast %cst_123 : f32 to vector<16x1xf32>
    %472 = arith.addf %468, %471 : vector<16x1xf32>
    %473 = math.rsqrt %472 : vector<16x1xf32>
    %474 = vector.broadcast %473 : vector<16x1xf32> to vector<16x32xf32>
    %475 = arith.mulf %470, %474 : vector<16x32xf32>
    %476 = vector.broadcast %456 : vector<1x32xf32> to vector<16x32xf32>
    %477 = arith.mulf %475, %476 : vector<16x32xf32>
    %478 = vector.broadcast %457 : vector<1x32xf32> to vector<16x32xf32>
    %479 = arith.addf %477, %478 : vector<16x32xf32>
    %480 = arith.index_cast %arg0 : i32 to index
    %c0_124 = arith.constant 0 : index
    %c0_125 = arith.constant 0 : index
    %481 = vector.load %arg12[%480, %c0_124, %c0_125] : memref<2x32x128xbf16, #tpu.memory_space<vmem>>, vector<1x32x128xbf16>
    %482 = vector.shape_cast %481 : vector<1x32x128xbf16> to vector<32x128xbf16>
    %483 = vector.extract_strided_slice %6 {offsets = [9, 0], sizes = [1, 128], strides = [1, 1]} : vector<16x128xf32> to vector<1x128xf32>
    %484 = arith.truncf %479 : vector<16x32xf32> to vector<16x32xbf16>
    %cst_126 = arith.constant dense<0.000000e+00> : vector<16x128xf32>
    %485 = tpu.matmul %484, %482, %cst_126 {dimension_numbers = #tpu.dot_dimension_numbers<[1], [0], [0], [1], [0, 0, 1, 1], [], []>} : vector<16x32xbf16>, vector<32x128xbf16>, vector<16x128xf32> -> vector<16x128xf32>
    %486 = vector.broadcast %483 : vector<1x128xf32> to vector<16x128xf32>
    %487 = arith.addf %485, %486 : vector<16x128xf32>
    %488 = arith.mulf %487, %487 : vector<16x128xf32>
    %489 = arith.mulf %487, %488 : vector<16x128xf32>
    %cst_127 = arith.constant 4.471500e-02 : f32
    %490 = vector.broadcast %cst_127 : f32 to vector<16x128xf32>
    %491 = arith.mulf %490, %489 : vector<16x128xf32>
    %492 = arith.addf %487, %491 : vector<16x128xf32>
    %cst_128 = arith.constant 0.797884583 : f32
    %493 = vector.broadcast %cst_128 : f32 to vector<16x128xf32>
    %494 = arith.mulf %493, %492 : vector<16x128xf32>
    %495 = math.tanh %494 : vector<16x128xf32>
    %cst_129 = arith.constant 1.000000e+00 : f32
    %496 = vector.broadcast %cst_129 : f32 to vector<16x128xf32>
    %497 = arith.addf %496, %495 : vector<16x128xf32>
    %cst_130 = arith.constant 5.000000e-01 : f32
    %498 = vector.broadcast %cst_130 : f32 to vector<16x128xf32>
    %499 = arith.mulf %498, %497 : vector<16x128xf32>
    %500 = arith.mulf %487, %499 : vector<16x128xf32>
    %501 = arith.index_cast %arg0 : i32 to index
    %c0_131 = arith.constant 0 : index
    %c0_132 = arith.constant 0 : index
    %502 = vector.load %arg13[%501, %c0_131, %c0_132] : memref<2x128x32xbf16, #tpu.memory_space<vmem>>, vector<1x128x32xbf16>
    %503 = vector.shape_cast %502 : vector<1x128x32xbf16> to vector<128x32xbf16>
    %504 = vector.extract_strided_slice %6 {offsets = [10, 0], sizes = [1, 32], strides = [1, 1]} : vector<16x128xf32> to vector<1x32xf32>
    %505 = arith.truncf %500 : vector<16x128xf32> to vector<16x128xbf16>
    %cst_133 = arith.constant dense<0.000000e+00> : vector<16x32xf32>
    %506 = tpu.matmul %505, %503, %cst_133 {dimension_numbers = #tpu.dot_dimension_numbers<[1], [0], [0], [1], [0, 0, 1, 1], [], []>} : vector<16x128xbf16>, vector<128x32xbf16>, vector<16x32xf32> -> vector<16x32xf32>
    %507 = vector.broadcast %504 : vector<1x32xf32> to vector<16x32xf32>
    %508 = arith.addf %506, %507 : vector<16x32xf32>
    %509 = arith.addf %479, %508 : vector<16x32xf32>
    %510 = vector.extract_strided_slice %6 {offsets = [11, 0], sizes = [1, 32], strides = [1, 1]} : vector<16x128xf32> to vector<1x32xf32>
    %511 = vector.extract_strided_slice %6 {offsets = [12, 0], sizes = [1, 32], strides = [1, 1]} : vector<16x128xf32> to vector<1x32xf32>
    %cst_134 = arith.constant dense<0.000000e+00> : vector<16xf32>
    %512 = vector.multi_reduction <add>, %509, %cst_134 [1] : vector<16x32xf32> to vector<16xf32>
    %513 = vector.shape_cast %512 : vector<16xf32> to vector<16x1xf32>
    %cst_135 = arith.constant 3.200000e+01 : f32
    %514 = vector.broadcast %cst_135 : f32 to vector<16x1xf32>
    %515 = arith.divf %513, %514 : vector<16x1xf32>
    %516 = vector.broadcast %515 : vector<16x1xf32> to vector<16x32xf32>
    %517 = arith.subf %509, %516 : vector<16x32xf32>
    %518 = arith.mulf %517, %517 : vector<16x32xf32>
    %cst_136 = arith.constant dense<0.000000e+00> : vector<16xf32>
    %519 = vector.multi_reduction <add>, %518, %cst_136 [1] : vector<16x32xf32> to vector<16xf32>
    %520 = vector.shape_cast %519 : vector<16xf32> to vector<16x1xf32>
    %cst_137 = arith.constant 3.200000e+01 : f32
    %521 = vector.broadcast %cst_137 : f32 to vector<16x1xf32>
    %522 = arith.divf %520, %521 : vector<16x1xf32>
    %523 = vector.broadcast %515 : vector<16x1xf32> to vector<16x32xf32>
    %524 = arith.subf %509, %523 : vector<16x32xf32>
    %cst_138 = arith.constant 9.99999996E-13 : f32
    %525 = vector.broadcast %cst_138 : f32 to vector<16x1xf32>
    %526 = arith.addf %522, %525 : vector<16x1xf32>
    %527 = math.rsqrt %526 : vector<16x1xf32>
    %528 = vector.broadcast %527 : vector<16x1xf32> to vector<16x32xf32>
    %529 = arith.mulf %524, %528 : vector<16x32xf32>
    %530 = vector.broadcast %510 : vector<1x32xf32> to vector<16x32xf32>
    %531 = arith.mulf %529, %530 : vector<16x32xf32>
    %532 = vector.broadcast %511 : vector<1x32xf32> to vector<16x32xf32>
    %533 = arith.addf %531, %532 : vector<16x32xf32>
    %c0_139 = arith.constant 0 : index
    %c0_140 = arith.constant 0 : index
    %534 = vector.load %arg17[%c0_139, %c0_140] : memref<16x32xf32, #tpu.memory_space<vmem>>, vector<16x32xf32>
    tpu.vector_store %arg17[%c0_139, %c0_140], %533 {strides = array<i32>} : memref<16x32xf32, #tpu.memory_space<vmem>>, vector<16x32xf32>,
    %c1_i32 = arith.constant 1 : i32
    %535 = arith.cmpi eq, %arg0, %c1_i32 : i32
    %536 = arith.extui %535 : i1 to i32
    %c0_i32_141 = arith.constant 0 : i32
    %537 = arith.cmpi ne, %536, %c0_i32_141 : i32
    scf.if %537 {
      %c0_142 = arith.constant 0 : index
      %c0_143 = arith.constant 0 : index
      %538 = vector.load %arg14[%c0_142, %c0_143] : memref<32x32xbf16, #tpu.memory_space<vmem>>, vector<32x32xbf16>
      %539 = vector.extract_strided_slice %0 {offsets = [2, 0], sizes = [1, 32], strides = [1, 1]} : vector<8x128xf32> to vector<1x32xf32>
      %540 = arith.truncf %533 : vector<16x32xf32> to vector<16x32xbf16>
      %cst_144 = arith.constant dense<0.000000e+00> : vector<16x32xf32>
      %541 = tpu.matmul %540, %538, %cst_144 {dimension_numbers = #tpu.dot_dimension_numbers<[1], [0], [0], [1], [0, 0, 1, 1], [], []>} : vector<16x32xbf16>, vector<32x32xbf16>, vector<16x32xf32> -> vector<16x32xf32>
      %542 = vector.broadcast %539 : vector<1x32xf32> to vector<16x32xf32>
      %543 = arith.addf %541, %542 : vector<16x32xf32>
      %544 = arith.mulf %543, %543 : vector<16x32xf32>
      %545 = arith.mulf %543, %544 : vector<16x32xf32>
      %cst_145 = arith.constant 4.471500e-02 : f32
      %546 = vector.broadcast %cst_145 : f32 to vector<16x32xf32>
      %547 = arith.mulf %546, %545 : vector<16x32xf32>
      %548 = arith.addf %543, %547 : vector<16x32xf32>
      %cst_146 = arith.constant 0.797884583 : f32
      %549 = vector.broadcast %cst_146 : f32 to vector<16x32xf32>
      %550 = arith.mulf %549, %548 : vector<16x32xf32>
      %551 = math.tanh %550 : vector<16x32xf32>
      %cst_147 = arith.constant 1.000000e+00 : f32
      %552 = vector.broadcast %cst_147 : f32 to vector<16x32xf32>
      %553 = arith.addf %552, %551 : vector<16x32xf32>
      %cst_148 = arith.constant 5.000000e-01 : f32
      %554 = vector.broadcast %cst_148 : f32 to vector<16x32xf32>
      %555 = arith.mulf %554, %553 : vector<16x32xf32>
      %556 = arith.mulf %543, %555 : vector<16x32xf32>
      %557 = vector.extract_strided_slice %0 {offsets = [3, 0], sizes = [1, 32], strides = [1, 1]} : vector<8x128xf32> to vector<1x32xf32>
      %558 = vector.extract_strided_slice %0 {offsets = [4, 0], sizes = [1, 32], strides = [1, 1]} : vector<8x128xf32> to vector<1x32xf32>
      %cst_149 = arith.constant dense<0.000000e+00> : vector<16xf32>
      %559 = vector.multi_reduction <add>, %556, %cst_149 [1] : vector<16x32xf32> to vector<16xf32>
      %560 = vector.shape_cast %559 : vector<16xf32> to vector<16x1xf32>
      %cst_150 = arith.constant 3.200000e+01 : f32
      %561 = vector.broadcast %cst_150 : f32 to vector<16x1xf32>
      %562 = arith.divf %560, %561 : vector<16x1xf32>
      %563 = vector.broadcast %562 : vector<16x1xf32> to vector<16x32xf32>
      %564 = arith.subf %556, %563 : vector<16x32xf32>
      %565 = arith.mulf %564, %564 : vector<16x32xf32>
      %cst_151 = arith.constant dense<0.000000e+00> : vector<16xf32>
      %566 = vector.multi_reduction <add>, %565, %cst_151 [1] : vector<16x32xf32> to vector<16xf32>
      %567 = vector.shape_cast %566 : vector<16xf32> to vector<16x1xf32>
      %cst_152 = arith.constant 3.200000e+01 : f32
      %568 = vector.broadcast %cst_152 : f32 to vector<16x1xf32>
      %569 = arith.divf %567, %568 : vector<16x1xf32>
      %570 = vector.broadcast %562 : vector<16x1xf32> to vector<16x32xf32>
      %571 = arith.subf %556, %570 : vector<16x32xf32>
      %cst_153 = arith.constant 9.99999996E-13 : f32
      %572 = vector.broadcast %cst_153 : f32 to vector<16x1xf32>
      %573 = arith.addf %569, %572 : vector<16x1xf32>
      %574 = math.rsqrt %573 : vector<16x1xf32>
      %575 = vector.broadcast %574 : vector<16x1xf32> to vector<16x32xf32>
      %576 = arith.mulf %571, %575 : vector<16x32xf32>
      %577 = vector.broadcast %557 : vector<1x32xf32> to vector<16x32xf32>
      %578 = arith.mulf %576, %577 : vector<16x32xf32>
      %579 = vector.broadcast %558 : vector<1x32xf32> to vector<16x32xf32>
      %580 = arith.addf %578, %579 : vector<16x32xf32>
      %c0_154 = arith.constant 0 : index
      %c0_155 = arith.constant 0 : index
      %581 = vector.load %arg15[%c0_154, %c0_155] : memref<32x128xbf16, #tpu.memory_space<vmem>>, vector<32x128xbf16>
      %582 = vector.extract_strided_slice %0 {offsets = [5, 0], sizes = [1, 128], strides = [1, 1]} : vector<8x128xf32> to vector<1x128xf32>
      %583 = arith.truncf %580 : vector<16x32xf32> to vector<16x32xbf16>
      %cst_156 = arith.constant dense<0.000000e+00> : vector<16x128xf32>
      %584 = tpu.matmul %583, %581, %cst_156 {dimension_numbers = #tpu.dot_dimension_numbers<[1], [0], [0], [1], [0, 0, 1, 1], [], []>} : vector<16x32xbf16>, vector<32x128xbf16>, vector<16x128xf32> -> vector<16x128xf32>
      %585 = vector.broadcast %582 : vector<1x128xf32> to vector<16x128xf32>
      %586 = arith.addf %584, %585 : vector<16x128xf32>
      %cst_157 = arith.constant dense<0xFF800000> : vector<16xf32>
      %587 = vector.multi_reduction <maximumf>, %586, %cst_157 [1] : vector<16x128xf32> to vector<16xf32>
      %588 = vector.shape_cast %587 : vector<16xf32> to vector<16x1xf32>
      %589 = vector.broadcast %588 : vector<16x1xf32> to vector<16x128xf32>
      %590 = arith.subf %586, %589 : vector<16x128xf32>
      %591 = math.exp %590 : vector<16x128xf32>
      %cst_158 = arith.constant dense<0.000000e+00> : vector<16xf32>
      %592 = vector.multi_reduction <add>, %591, %cst_158 [1] : vector<16x128xf32> to vector<16xf32>
      %593 = vector.shape_cast %592 : vector<16xf32> to vector<16x1xf32>
      %594 = math.log %593 : vector<16x1xf32>
      %595 = vector.broadcast %594 : vector<16x1xf32> to vector<16x128xf32>
      %596 = arith.subf %590, %595 : vector<16x128xf32>
      %c0_159 = arith.constant 0 : index
      %c0_160 = arith.constant 0 : index
      %597 = vector.load %arg4[%c0_159, %c0_160] : memref<16x128xf32, #tpu.memory_space<vmem>>, vector<16x128xf32>
      %cst_161 = arith.constant dense<0.000000e+00> : vector<16xf32>
      %598 = vector.multi_reduction <add>, %597, %cst_161 [1] : vector<16x128xf32> to vector<16xf32>
      %599 = vector.shape_cast %598 : vector<16xf32> to vector<16x1xf32>
      %600 = arith.mulf %597, %596 : vector<16x128xf32>
      %cst_162 = arith.constant dense<0.000000e+00> : vector<16xf32>
      %601 = vector.multi_reduction <add>, %600, %cst_162 [1] : vector<16x128xf32> to vector<16xf32>
      %602 = vector.shape_cast %601 : vector<16xf32> to vector<16x1xf32>
      %cst_163 = arith.constant 0.000000e+00 : f32
      %603 = vector.broadcast %cst_163 : f32 to vector<16x1xf32>
      %604 = arith.subf %603, %602 : vector<16x1xf32>
      %cst_164 = arith.constant dense<0.000000e+00> : vector<16xf32>
      %605 = vector.multi_reduction <add>, %596, %cst_164 [1] : vector<16x128xf32> to vector<16xf32>
      %606 = vector.shape_cast %605 : vector<16xf32> to vector<16x1xf32>
      %cst_165 = arith.constant 1.280000e+02 : f32
      %607 = vector.broadcast %cst_165 : f32 to vector<16x1xf32>
      %608 = arith.divf %606, %607 : vector<16x1xf32>
      %cst_166 = arith.constant 0.000000e+00 : f32
      %609 = vector.broadcast %cst_166 : f32 to vector<16x1xf32>
      %610 = arith.subf %609, %608 : vector<16x1xf32>
      %cst_167 = arith.constant 0.899999976 : f32
      %611 = vector.broadcast %cst_167 : f32 to vector<16x1xf32>
      %612 = arith.mulf %611, %604 : vector<16x1xf32>
      %cst_168 = arith.constant 1.000000e-01 : f32
      %613 = vector.broadcast %cst_168 : f32 to vector<16x1xf32>
      %614 = arith.mulf %613, %610 : vector<16x1xf32>
      %615 = arith.addf %612, %614 : vector<16x1xf32>
      %616 = tpu.iota {dimensions = array<i32: 1>} : vector<16x128xi32>
      %c0_i32_169 = arith.constant 0 : i32
      %617 = vector.broadcast %c0_i32_169 : i32 to vector<16x128xi32>
      %618 = arith.cmpi eq, %616, %617 : vector<16x128xi32>
      %619 = arith.mulf %615, %599 : vector<16x1xf32>
      %c1_i32_170 = arith.constant 1 : i32
      %620 = vector.broadcast %c1_i32_170 : i32 to vector<16x128xi32>
      %621 = arith.cmpi eq, %616, %620 : vector<16x128xi32>
      %cst_171 = arith.constant 0.000000e+00 : f32
      %622 = vector.shape_cast %599 : vector<16x1xf32> to vector<16x1xf32>
      %623 = vector.broadcast %622 : vector<16x1xf32> to vector<16x128xf32>
      %624 = vector.broadcast %cst_171 : f32 to vector<16x128xf32>
      %625 = arith.select %621, %623, %624 : vector<16x128xi1>, vector<16x128xf32>
      %626 = vector.shape_cast %619 : vector<16x1xf32> to vector<16x1xf32>
      %627 = vector.broadcast %626 : vector<16x1xf32> to vector<16x128xf32>
      %628 = arith.select %618, %627, %625 : vector<16x128xi1>, vector<16x128xf32>
      %cst_172 = arith.constant dense<0.000000e+00> : vector<128xf32>
      %629 = vector.multi_reduction <add>, %628, %cst_172 [0] : vector<16x128xf32> to vector<128xf32>
      %630 = vector.shape_cast %629 : vector<128xf32> to vector<1x128xf32>
      %c0_173 = arith.constant 0 : index
      %c0_174 = arith.constant 0 : index
      %631 = vector.load %arg16[%c0_173, %c0_174] : memref<1x128xf32, #tpu.memory_space<vmem>>, vector<1x128xf32>
      tpu.vector_store %arg16[%c0_173, %c0_174], %630 {strides = array<i32>} : memref<1x128xf32, #tpu.memory_space<vmem>>, vector<1x128xf32>,
    } else {
    }
    return
  }
  func.func @transform_0(%arg0: i32) -> (i32, i32) {
    %c0_i32 = arith.constant 0 : i32
    %c0_i32_0 = arith.constant 0 : i32
    %c0_i32_1 = arith.constant 0 : i32
    return %c0_i32, %c0_i32_0 : i32, i32
  }
  func.func @transform_1(%arg0: i32) -> (i32, i32) {
    %c0_i32 = arith.constant 0 : i32
    %c0_i32_0 = arith.constant 0 : i32
    %c0_i32_1 = arith.constant 0 : i32
    return %c0_i32, %c0_i32_0 : i32, i32
  }
  func.func @transform_2(%arg0: i32) -> (i32, i32, i32) {
    %c0_i32 = arith.constant 0 : i32
    %c0_i32_0 = arith.constant 0 : i32
    %c0_i32_1 = arith.constant 0 : i32
    %c0_i32_2 = arith.constant 0 : i32
    return %c0_i32, %c0_i32_0, %c0_i32_1 : i32, i32, i32
  }
  func.func @transform_3(%arg0: i32) -> (i32, i32) {
    %c0_i32 = arith.constant 0 : i32
    %c0_i32_0 = arith.constant 0 : i32
    %c0_i32_1 = arith.constant 0 : i32
    return %c0_i32, %c0_i32_0 : i32, i32
  }
  func.func @transform_4(%arg0: i32) -> (i32, i32) {
    %c0_i32 = arith.constant 0 : i32
    %c0_i32_0 = arith.constant 0 : i32
    %c0_i32_1 = arith.constant 0 : i32
    return %c0_i32, %c0_i32_0 : i32, i32
  }
  func.func @transform_5(%arg0: i32) -> (i32, i32, i32) {
    %c0_i32 = arith.constant 0 : i32
    %c0_i32_0 = arith.constant 0 : i32
    %c0_i32_1 = arith.constant 0 : i32
    %c0_i32_2 = arith.constant 0 : i32
    return %c0_i32, %c0_i32_0, %c0_i32_1 : i32, i32, i32
  }
  func.func @transform_6(%arg0: i32) -> (i32, i32, i32) {
    %c0_i32 = arith.constant 0 : i32
    %c0_i32_0 = arith.constant 0 : i32
    %c0_i32_1 = arith.constant 0 : i32
    %c0_i32_2 = arith.constant 0 : i32
    return %c0_i32, %c0_i32_0, %c0_i32_1 : i32, i32, i32
  }
  func.func @transform_7(%arg0: i32) -> (i32, i32, i32) {
    %c0_i32 = arith.constant 0 : i32
    %c0_i32_0 = arith.constant 0 : i32
    %c0_i32_1 = arith.constant 0 : i32
    %c0_i32_2 = arith.constant 0 : i32
    return %c0_i32, %c0_i32_0, %c0_i32_1 : i32, i32, i32
  }
  func.func @transform_8(%arg0: i32) -> (i32, i32, i32) {
    %c0_i32 = arith.constant 0 : i32
    %c0_i32_0 = arith.constant 0 : i32
    %c0_i32_1 = arith.constant 0 : i32
    %c0_i32_2 = arith.constant 0 : i32
    return %c0_i32, %c0_i32_0, %c0_i32_1 : i32, i32, i32
  }
  func.func @transform_9(%arg0: i32) -> (i32, i32, i32) {
    %c0_i32 = arith.constant 0 : i32
    %c0_i32_0 = arith.constant 0 : i32
    %c0_i32_1 = arith.constant 0 : i32
    %c0_i32_2 = arith.constant 0 : i32
    return %c0_i32, %c0_i32_0, %c0_i32_1 : i32, i32, i32
  }
  func.func @transform_10(%arg0: i32) -> (i32, i32, i32) {
    %c0_i32 = arith.constant 0 : i32
    %c0_i32_0 = arith.constant 0 : i32
    %c0_i32_1 = arith.constant 0 : i32
    %c0_i32_2 = arith.constant 0 : i32
    return %c0_i32, %c0_i32_0, %c0_i32_1 : i32, i32, i32
  }
  func.func @transform_11(%arg0: i32) -> (i32, i32, i32) {
    %c0_i32 = arith.constant 0 : i32
    %c0_i32_0 = arith.constant 0 : i32
    %c0_i32_1 = arith.constant 0 : i32
    %c0_i32_2 = arith.constant 0 : i32
    return %c0_i32, %c0_i32_0, %c0_i32_1 : i32, i32, i32
  }
  func.func @transform_12(%arg0: i32) -> (i32, i32, i32) {
    %c0_i32 = arith.constant 0 : i32
    %c0_i32_0 = arith.constant 0 : i32
    %c0_i32_1 = arith.constant 0 : i32
    %c0_i32_2 = arith.constant 0 : i32
    return %c0_i32, %c0_i32_0, %c0_i32_1 : i32, i32, i32
  }
  func.func @transform_13(%arg0: i32) -> (i32, i32) {
    %c0_i32 = arith.constant 0 : i32
    %c0_i32_0 = arith.constant 0 : i32
    %c0_i32_1 = arith.constant 0 : i32
    return %c0_i32, %c0_i32_0 : i32, i32
  }
  func.func @transform_14(%arg0: i32) -> (i32, i32) {
    %c0_i32 = arith.constant 0 : i32
    %c0_i32_0 = arith.constant 0 : i32
    %c0_i32_1 = arith.constant 0 : i32
    return %c0_i32, %c0_i32_0 : i32, i32
  }
  func.func @transform_15(%arg0: i32) -> (i32, i32) {
    %c0_i32 = arith.constant 0 : i32
    %c0_i32_0 = arith.constant 0 : i32
    %c0_i32_1 = arith.constant 0 : i32
    return %c0_i32, %c0_i32_0 : i32, i32
  }
}

</mosaic_0001>

<bundles_post_ra>
// kernel: blip_video_caption_forward.2
= control target key start
LH: loop header
LB: loop body
LE: loop exit
PB: predicated region body
PF: predicated region fallthrough
CT: control target
= control target key end

     0   :  { %s2922_s30 = smov 0   ;;  %s2924_s10 = smov 0   ;;  %s3482_s0 = inlined_call_operand.vmem [shape: bf16[4,5,192], index: 0, kind: input, shape index: {}]   ;;  %s3483_s1 = inlined_call_operand.vmem [shape: bf16[192,32], index: 1, kind: input, shape index: {}]   ;;  %s3484_s2 = inlined_call_operand.vmem [shape: f32[5,32], index: 2, kind: input, shape index: {}]   ;;  %s3485_s3 = inlined_call_operand.vmem [shape: f32[2,8,128], index: 3, kind: input, shape index: {}]   ;;  %s3486_s4 = inlined_call_operand.vmem [shape: bf16[2,32,96], index: 4, kind: input, shape index: {}]   ;;  %s3487_s5 = inlined_call_operand.vmem [shape: bf16[2,32,32], index: 5, kind: input, shape index: {}]   ;;  %s3488_s6 = inlined_call_operand.vmem [shape: bf16[2,32,128], index: 6, kind: input, shape index: {}]   ;;  %s3489_s7 = inlined_call_operand.vmem [shape: bf16[2,128,32], index: 7, kind: input, shape index: {}]   ;;  %s3490_s8 = inlined_call_operand.vmem [shape: f32[2,32], index: 8, kind: input, shape index: {}]   ;;  %s3491_s9 = inlined_call_operand.vmem [shape: f32[4,5,32], index: 9, kind: output, shape index: {}]  }
   0x1   :  { %s2926_s11 = smov 0   ;;  %s2928_s12 = smov 0  }
   0x2   :  { %s2930_s13 = smov 0  }
   0x3 LB: > { %s28_s14 = sadd.s32 1, %s2844_s11  ;;  %s31_s15 = sadd.s32 1, %s2848_s12  ;;  %s2852_s13 = sphi %s2930_s13, %s19_s13   ;;  %s2848_s12 = sphi %s2928_s12, %s3503_s12   ;;  %s2844_s11 = sphi %s2926_s11, %s3502_s11   ;;  %s2840_s10 = sphi %s2924_s10, %s3501_s10   ;;  %s2836_s30 = sphi %s2922_s30, %s3500_s30  }
   0x4   : > { %p29_p0 = scmp.ge.s32.totalorder %s28_s14, 2  ;;  %p2316_p1 = scmp.ge.s32.totalorder %s2852_s13, 1 }
   0x5   : > { %p301_p2 = scmp.lt.s32.totalorder %s2852_s13, 5 }
   0x6   : > { %s3505_s14 = smov (%p29_p0, %s28_s14), 0  ;;  %s3507_s15 = smov (!%p29_p0, %s31_s15), %s2848_s12 }
   0x7   : > { %p302_p3 = pnand %p2316_p1, %p301_p2  ;;  %p33_p4 = scmp.ge.s32.totalorder %s3507_s15, 2 }
   0x8   : > { %s2317_s16 = sshll.u32 (!%p302_p3), %s2840_s10, 1  ;;  %p2322_p6 = scmp.ne.s32.totalorder (!%p302_p3), %s2836_s30, 0 }
   0x9   : > { %s3509_s15 = smov (%p33_p4, %s3507_s15), 0  ;;  %305 = sbr.rel (%p302_p3) target bundleno = 6130 (0x17f2), region = 56 }
   0xa   : > { %p339_p5 = scmp.lt.s32.totalorder (!%p302_p3), %s2317_s16, 3 }
   0xe   : > { %s3511_s16 = smov (!%p339_p5, %s2317_s16), 3  ;;  %355 = sbr.rel (%p2322_p6) target bundleno = 267 (0x10b), region = 60 }
   0xf   : > { %s2409_s17 = sshll.u32 %s3511_s16, 3 }
  0x10   : > { %s2957_s20 = scalar_lea.vmem %s3482_s0, %s2409_s17  ;;  %s2962_s23 = scalar_lea.vmem %s3491_s9, %s2409_s17 }
  0x13   : > { %v2724_v0 = vld [vmem:[%s3483_s1 + $0x38] sm:$0xff]   ;;  %v2854_v1 = vmov 0   ;;  %v2726_v3 = vld [vmem:[%s3483_s1 + $0x30] sm:$0xff]   ;;  %v2728_v5 = vld [vmem:[%s3483_s1 + $0x28] sm:$0xff]   ;;  %vm460_vm0 = vcmask 523264   ;;  %vm504_vm1 = vcmask 258048  }
  0x14   : > { %464 = vmatprep.subr.bf16.mxu0 %v2854_v1  ;;  %614 = vmatprep.subr.bf16.mxu1 %v2854_v1  ;;  %v2725_v2 = vld [vmem:[%s3483_s1 + $0x38] sm:$0xff]   ;;  %v2727_v4 = vld [vmem:[%s3483_s1 + $0x30] sm:$0xff]   ;;  %v2729_v6 = vld [vmem:[%s3483_s1 + $0x28] sm:$0xff]  }
  0x15   : > { %465 = vmatpush1.bf16.msra.mxu0 %v2724_v0  ;;  %615 = vmatpush1.bf16.msra.mxu1 %v2725_v2  ;;  %v2730_v7 = vld [vmem:[%s3483_s1 + $0x20] sm:$0xff]   ;;  %v2732_v9 = vld [vmem:[%s3483_s1 + $0x18] sm:$0xff]   ;;  %v2734_v11 = vld [vmem:[%s3483_s1 + $0x10] sm:$0xff]  }
  0x16   : > { %466 = vmatprep.subr.bf16.mxu0 %v2854_v1  ;;  %616 = vmatprep.subr.bf16.mxu1 %v2854_v1  ;;  %v2731_v8 = vld [vmem:[%s3483_s1 + $0x20] sm:$0xff]   ;;  %v2733_v10 = vld [vmem:[%s3483_s1 + $0x18] sm:$0xff]   ;;  %v2735_v12 = vld [vmem:[%s3483_s1 + $0x10] sm:$0xff]  }
  0x17   : > { %v2736_v13 = vld [vmem:[%s3483_s1 + $0x8] sm:$0xff]   ;;  %v356_v15 = vld [vmem:[%s2957_s20] sm:$0x77]  ;;  %v2740_v21 = vld [vmem:[%s3483_s1 + $0x58] sm:$0xff]  }
  0x18   : > { %v2737_v14 = vld [vmem:[%s3483_s1 + $0x8] sm:$0xff]   ;;  %v2324_v17 = vcombine.high %v356_v15, %v356_v15  ;;  %v2738_v19 = vld [vmem:[%s3483_s1] sm:$0xff]   ;;  %v2741_v22 = vld [vmem:[%s3483_s1 + $0x58] sm:$0xff]   ;;  %v2323_v29 = vcombine.low %v356_v15, %v356_v15 }
  0x19   : > { %467 = vmatpush1.bf16.msra.mxu0 %v2726_v3  ;;  %617 = vmatpush1.bf16.msra.mxu1 %v2727_v4  ;;  %v2338_v16 = vld [vmem:[%s2957_s20 + $0x8] sm:$0x77]  ;;  %v2739_v20 = vld [vmem:[%s3483_s1] sm:$0xff]   ;;  %v2742_v23 = vld [vmem:[%s3483_s1 + $0x50] sm:$0xff]  }
  0x1a   : > { %468 = vmatprep.subr.bf16.mxu0 %v2854_v1  ;;  %618 = vmatprep.subr.bf16.mxu1 %v2854_v1  ;;  %v2340_v18 = vcombine.high %v2338_v16, %v2338_v16  ;;  %v2743_v24 = vld [vmem:[%s3483_s1 + $0x50] sm:$0xff]   ;;  %v2744_v25 = vld [vmem:[%s3483_s1 + $0x48] sm:$0xff]   ;;  %v2746_v27 = vld [vmem:[%s3483_s1 + $0x40] sm:$0xff]   ;;  %v2339_v30 = vcombine.low %v2338_v16, %v2338_v16 }
  0x1b   : > { %2337 = vmatprep.mubr.msk.bf16.mxu0 %vm460_vm0, %v2324_v17  ;;  %v2745_v26 = vld [vmem:[%s3483_s1 + $0x48] sm:$0xff]   ;;  %v2747_v28 = vld [vmem:[%s3483_s1 + $0x40] sm:$0xff]  }
  0x1c   : > { %2353 = vmatprep.mubr.msk.bf16.mxu1 %vm460_vm0, %v2340_v18  ;;  %v381_v31 = vld [vmem:[%s3484_s2] sm:$0x1f] }
  0x1d   : > { %469 = vmatpush1.bf16.msra.mxu0 %v2728_v5  ;;  %619 = vmatpush1.bf16.msra.mxu1 %v2729_v6  ;;  %v532_v32 = vld [vmem:[%s3484_s2] sm:$0x1f] }
  0x1e   : > { %470 = vmatprep.subr.bf16.mxu0 %v2854_v1  ;;  %620 = vmatprep.subr.bf16.mxu1 %v2854_v1 }
  0x21   : > { %471 = vmatpush1.bf16.msra.mxu0 %v2730_v7  ;;  %621 = vmatpush1.bf16.msra.mxu1 %v2731_v8 }
  0x22   : > { %472 = vmatprep.subr.bf16.mxu0 %v2854_v1  ;;  %622 = vmatprep.subr.bf16.mxu1 %v2854_v1 }
  0x25   : > { %473 = vmatpush1.bf16.msra.mxu0 %v2732_v9  ;;  %623 = vmatpush1.bf16.msra.mxu1 %v2733_v10 }
  0x26   : > { %474 = vmatprep.subr.bf16.mxu0 %v2854_v1  ;;  %624 = vmatprep.subr.bf16.mxu1 %v2854_v1 }
  0x29   : > { %475 = vmatpush1.bf16.msra.mxu0 %v2734_v11  ;;  %625 = vmatpush1.bf16.msra.mxu1 %v2735_v12 }
  0x2a   : > { %476 = vmatprep.subr.bf16.mxu0 %v2854_v1  ;;  %626 = vmatprep.subr.bf16.mxu1 %v2854_v1 }
  0x2d   : > { %477 = vmatpush1.bf16.msra.mxu0 %v2736_v13  ;;  %627 = vmatpush1.bf16.msra.mxu1 %v2737_v14 }
  0x2e   : > { %478 = vmatprep.subr.bf16.mxu0 %v2854_v1  ;;  %628 = vmatprep.subr.bf16.mxu1 %v2854_v1 }
  0x31   : > { %479 = vmatpush1.bf16.msra.mxu0 %v2738_v19  ;;  %629 = vmatpush1.bf16.msra.mxu1 %v2739_v20 }
  0x32   : > { %488 = vmatprep.subr.bf16.mxu0 %v2854_v1  ;;  %638 = vmatprep.subr.bf16.mxu1 %v2854_v1 }
  0x35   : > { %489 = vmatpush2.bf16.msra.mxu0 %v2740_v21  ;;  %639 = vmatpush2.bf16.msra.mxu1 %v2741_v22 }
  0x36   : > { %490 = vmatprep.subr.bf16.mxu0 %v2854_v1  ;;  %640 = vmatprep.subr.bf16.mxu1 %v2854_v1 }
  0x39   : > { %491 = vmatpush2.bf16.msra.mxu0 %v2742_v23  ;;  %641 = vmatpush2.bf16.msra.mxu1 %v2743_v24 }
  0x3a   : > { %492 = vmatprep.subr.bf16.mxu0 %v2854_v1  ;;  %642 = vmatprep.subr.bf16.mxu1 %v2854_v1 }
  0x3d   : > { %493 = vmatpush2.bf16.msra.mxu0 %v2744_v25  ;;  %643 = vmatpush2.bf16.msra.mxu1 %v2745_v26 }
  0x3e   : > { %494 = vmatprep.subr.bf16.mxu0 %v2854_v1  ;;  %644 = vmatprep.subr.bf16.mxu1 %v2854_v1 }
  0x41   : > { %495 = vmatpush2.bf16.msra.mxu0 %v2746_v27  ;;  %645 = vmatpush2.bf16.msra.mxu1 %v2747_v28 }
  0x44   : > { %497 = vmatmul.mubr.bf16.vlgmr.msra.gmra.mxu0 %v2323_v29  ;;  %647 = vmatmul.mubr.bf16.vlgmr.msra.gmra.mxu1 %v2339_v30 }
 0x104   : > { %v498_v33 = vpop.f32.mrf.mxu0  ;;  %v648_v35 = vpop.f32.mrf.mxu1 }
 0x105   : > { %v499_v34 = vadd.f32 %v498_v33, %v381_v31  ;;  %v649_v36 = vadd.f32 %v648_v35, %v532_v32 }
 0x106   : > { %v500_v37 = vpop.f32.mrf.mxu0  ;;  %v650_v38 = vpop.f32.mrf.mxu1 }
 0x107   : > { %505 = vst.msk [vmem:[%s2962_s23] sm:$0x1f] %vm504_vm1, %v499_v34  ;;  %2354 = vst.msk [vmem:[%s2962_s23 + $0x8] sm:$0x1f] %vm504_vm1, %v649_v36 }
 0x108   : > { %v501_v39 = vpop.f32.mrf.mxu0  ;;  %v651_v40 = vpop.f32.mrf.mxu1 }
 0x10a   : > { %v502_v41 = vpop.f32.mrf.mxu0  ;;  %v652_v42 = vpop.f32.mrf.mxu1 }
 0x10b PF: > { %vm698_vm2 = vcmask 258048   ;;  %s2410_s21 = sshll.u32 %s2836_s30, 4  ;;  %v2855_v50 = vmov 0.0   ;;  %vm2856_vm3 = vmmov 0   ;;  %v713_v56 = vlaneseq  ;;  %s2355_s16 = sshll.u32 %s2836_s30, 3 }
 0x10c   : > { %2482 = vmatprep.subr.bf16.mxu1 %v2855_v50  ;;  %s661_s25 = scalar_lea.vmem %s3486_s4, %s2410_s21  ;;  %2486 = vmatprep.mubr.msk.bf16.mxu1 %vm2856_vm3, %v2855_v50  ;;  %s3093_s28 = scalar_lea.vmem %s3487_s5, %s2410_s21  ;;  %vm740_vm4 = vcmask 261120   ;;  %vm788_vm5 = vcmask 64512   ;;  %vm855_vm6 = vcmask 1041408   ;;  %vm856_vm7 = vcmask 1042432  }
 0x10d   : > { %v3085_v51 = vld [vmem:[%s661_s25 + $0x8] sm:$0xff]   ;;  %2508 = vmatprep.subr.bf16.mxu0 %v2855_v50  ;;  %2510 = vmatprep.mubr.msk.bf16.mxu0 %vm2856_vm3, %v2855_v50  ;;  %s3098_s10 = scalar_lea.vmem %s3488_s6, %s2410_s21  ;;  %v3101_v52 = vld [vmem:[%s661_s25] sm:$0xff]   ;;  %v3107_v57 = vshrl.u32 %v713_v56, 7  ;;  %s657_s19 = scalar_lea.vmem %s3485_s3, %s2355_s16  ;;  %v2859_v14 = vmov 65535   ;;  %vm836_vm8 = vcmask 36864   ;;  %vm851_vm9 = vcmask 39936  }
 0x10e   : > { %v3072_v43 = vld [vmem:[%s2962_s23] sm:$0x1f]  ;;  %2483 = vmatpush3.bf16.msra.mxu1 %v3085_v51  ;;  %s2857_s21 = smov 64   ;;  %s2858_s22 = smov 96   ;;  %v857_v15 = vsel %vm855_vm6, 4294967295, %v2859_v14  ;;  %vm1248_vm10 = vcmask 130048  }
 0x10f   : > { %v699_v44 = vsel %vm698_vm2, %v3072_v43, 0.0  ;;  %2484 = vmatprep.subr.bf16.mxu1 %v2855_v50  ;;  %v715_v58 = vsub.s32 0, %v3107_v57  ;;  %v3113_v59 = vld [vmem:[%s657_s19] sm:$0xff]  ;;  %v720_v60 = vsub.s32 1, %v3107_v57  ;;  %v726_v4 = vsub.s32 2, %v3107_v57  ;;  %s2860_s24 = smov 80  }
 0x110   : > { %700 = vadd.xlane.f32.xlu0 %v699_v44  ;;  %v3140_v16 = vsel %vm856_vm7, %v857_v15, 0  ;;  %s2861_s25 = smov 88   ;;  %s2862_s26 = smov 120   ;;  %vm1250_vm11 = vcmask 195584  }
 0x111   : > { %v3117_v61 = vrot.slane %v3113_v59, %v715_v58  ;;  %v3120_v0 = vrot.slane %v3113_v59, %v720_v60  ;;  %v3129_v5 = vrot.slane %v3113_v59, %v726_v4  ;;  %s2863_s27 = smov 112   ;;  %s2864_s29 = smov 72  }
 0x112   : > { %2485 = vmatpush3.bf16.msra.mxu1 %v3101_v52  ;;  %s2865_s20 = smov 104   ;;  %s2866_s16 = smov 48  }
 0x113   : > { %2490 = vmatprep.subr.bf16.mxu1 %v2855_v50  ;;  %s3493_s17 = smov 56   ;;  %s3492_s18 = smov 40  }
 0x114   : > { %s2869_s19 = smov 8   ;;  %p2400_p7 = scmp.ne.s32.totalorder %s2836_s30, 1 }
 0x199   : > { %v701_v45 = vpop.xlane.xlu0 %700 }
 0x19a   : > { %v703_v46 = vmul.f32 0.03125, %v701_v45 }
 0x19c   : > { %v704_v47 = vsub.f32 %v3072_v43, %v703_v46 }
 0x19e   : > { %v705_v48 = vmul.f32 %v704_v47, %v704_v47 }
 0x1a0   : > { %v706_v49 = vsel %vm698_vm2, %v705_v48, 0.0 }
 0x1a1   : > { %707 = vadd.xlane.f32.xlu0 %v706_v49 }
 0x22a   : > { %v708_v53 = vpop.xlane.xlu0 %707 }
 0x22b   : > { %v709_v54 = vmul.f32 0.03125, %v708_v53 }
 0x22d   : > { %v710_v55 = vadd.f32 1e-06, %v709_v54 }
 0x22f   : > { %2766 = vrsqrt.f32 %v710_v55 }
 0x23c   : > { %v2767_v62 = vpop.eup %2766 }
 0x23d   : > { %v712_v63 = vmul.f32 %v2767_v62, %v704_v47 }
 0x23f   : > { %v717_v1 = vmul.f32 %v3117_v61, %v712_v63 }
 0x241   : > { %v722_v2 = vadd.f32 %v3120_v0, %v717_v1 }
 0x243   : > { %v723_v3 = vpack.c.bf16 %v722_v2, %v722_v2 }
 0x245   : > { %2487 = vmatmul.mubr.msk.bf16.vlgmr.msra.gmra.mxu1 %vm740_vm4, %v723_v3 }
 0x246   : > { %2492 = vmatprep.mubr.msk.bf16.mxu1 %vm2856_vm3, %v2855_v50 }
 0x305   : > { %v778_v6 = vpop.f32.mrf.mxu1 }
 0x306   : > { %v779_v7 = vadd.f32 %v778_v6, %v3129_v5 }
 0x307   : > { %v2488_v8 = vpop.f32.mrf.mxu1 }
 0x308   : > { %v3132_v9 = vpack.c.bf16 %v779_v7, %v779_v7 }
 0x309   : > { %v781_v10 = vpop.f32.mrf.mxu1 }
 0x30a   : > { %849 = vrot.lane.b32.xlu0 %v3132_v9, %s2857_s21  ;;  %786 = vrot.lane.b32.xlu1 %v3132_v9, %s2858_s22 }
 0x30b   : > { %v2489_v11 = vpop.f32.mrf.mxu1 }
 0x37c   : > { %v787_v12 = vpop.permute.xlu1 %786  ;;  %v850_v17 = vpop.permute.xlu0 %849 }
 0x37d   : > { %v793_v13 = vsel %vm788_vm5, %v787_v12, 0  ;;  %v860_v18 = vand.u32 %v3140_v16, %v850_v17 }
 0x37e   : > { %2491 = vmatpush3.bf16.xpose.msra.mxu1 %v793_v13 }
 0x37f   : > { %2496 = vmatprep.subr.bf16.mxu1 %v2855_v50 }
 0x385   : > { %2493 = vmatmul.mubr.msk.bf16.vlgmr.msra.gmra.mxu1 %vm788_vm5, %v3132_v9 }
 0x386   : > { %2497 = vmatpush3.bf16.msra.mxu1 %v860_v18  ;;  %2498 = vmatprep.mubr.msk.bf16.mxu1 %vm2856_vm3, %v2855_v50 }
 0x387   : > { %2502 = vmatprep.subr.bf16.mxu1 %v2855_v50 }
 0x445   : > { %v829_v19 = vpop.f32.mrf.mxu1 }
 0x446   : > { %v835_v20 = vmul.f32 0.35355338, %v829_v19 }
 0x447   : > { %v2494_v21 = vpop.f32.mrf.mxu1 }
 0x448   : > { %v837_v22 = vsel %vm836_vm8, %v835_v20, -inf }
 0x449   : > { %838 = vmax.xlane.f32.xlu1 %v837_v22  ;;  %v832_v23 = vpop.f32.mrf.mxu1 }
 0x44b   : > { %v2495_v24 = vpop.f32.mrf.mxu1 }
 0x45a   : > { %1015 = vrot.lane.b32.xlu1 %v3132_v9, %s2860_s24 }
 0x4d2   : > { %v839_v25 = vpop.xlane.xlu1 %838 }
 0x4d3   : > { %v840_v26 = vsub.f32 %v835_v20, %v839_v25 }
 0x4d5   : > { %v841_v27 = vmul.f32 1.442695, %v840_v26 }
 0x4d6   : > { %v1016_v37 = vpop.permute.xlu1 %1015 }
 0x4d7   : > { %2768 = vpow2.f32 %v841_v27  ;;  %v1021_v39 = vsel %vm788_vm5, %v1016_v37, 0 }
 0x4e4   : > { %v2769_v28 = vpop.eup %2768 }
 0x4e5   : > { %v843_v29 = vsel %vm836_vm8, %v2769_v28, 0.0 }
 0x4e6   : > { %844 = vadd.xlane.f32.xlu0 %v843_v29 }
 0x4fc   : > { %904 = vrot.lane.b32.xlu0 %v3132_v9, %s2861_s25 }
 0x500   : > { %902 = vrot.lane.b32.xlu0 %v3132_v9, %s2862_s26 }
 0x504   : > { %1013 = vrot.lane.b32.xlu0 %v3132_v9, %s2863_s27 }
 0x508   : > { %1126 = vrot.lane.b32.xlu0 %v3132_v9, %s2864_s29 }
 0x50c   : > { %1124 = vrot.lane.b32.xlu0 %v3132_v9, %s2865_s20 }
 0x56f   : > { %v845_v30 = vpop.xlane.xlu0 %844 }
 0x570   : > { %2770 = vrcp.f32 %v845_v30 }
 0x573   : > { %v905_v32 = vpop.permute.xlu0 %904 }
 0x574   : > { %v910_v35 = vsel %vm788_vm5, %v905_v32, 0 }
 0x577   : > { %v903_v36 = vpop.permute.xlu0 %902 }
 0x57b   : > { %v1014_v38 = vpop.permute.xlu0 %1013 }
 0x57d   : > { %v2771_v31 = vpop.eup %2770 }
 0x57e   : > { %v847_v33 = vmul.f32 %v2771_v31, %v2769_v28 }
 0x57f   : > { %v1127_v40 = vpop.permute.xlu0 %1126 }
 0x580   : > { %v848_v34 = vpack.c.bf16 %v847_v33, %v847_v33  ;;  %v1132_v41 = vsel %vm788_vm5, %v1127_v40, 0 }
 0x582   : > { %2499 = vmatmul.mubr.msk.bf16.vlgmr.msra.gmra.mxu1 %vm851_vm9, %v848_v34 }
 0x583   : > { %2503 = vmatpush3.bf16.xpose.msra.mxu1 %v910_v35  ;;  %2504 = vmatprep.mubr.msk.bf16.mxu1 %vm2856_vm3, %v2855_v50  ;;  %v1125_v42 = vpop.permute.xlu0 %1124 }
 0x584   : > { %2514 = vmatprep.subr.bf16.mxu1 %v2855_v50 }
 0x58a   : > { %2505 = vmatmul.mubr.msk.bf16.vlgmr.msra.gmra.mxu1 %vm788_vm5, %v903_v36 }
 0x58b   : > { %2515 = vmatpush3.bf16.xpose.msra.mxu1 %v1021_v39  ;;  %2516 = vmatprep.mubr.msk.bf16.mxu1 %vm2856_vm3, %v2855_v50 }
 0x58c   : > { %2526 = vmatprep.subr.bf16.mxu1 %v2855_v50 }
 0x592   : > { %2517 = vmatmul.mubr.msk.bf16.vlgmr.msra.gmra.mxu1 %vm788_vm5, %v1014_v38 }
 0x593   : > { %2527 = vmatpush3.bf16.xpose.msra.mxu1 %v1132_v41  ;;  %2528 = vmatprep.mubr.msk.bf16.mxu1 %vm2856_vm3, %v2855_v50 }
 0x594   : > { %2538 = vmatprep.subr.bf16.mxu1 %v2855_v50 }
 0x59a   : > { %2529 = vmatmul.mubr.msk.bf16.vlgmr.msra.gmra.mxu1 %vm788_vm5, %v1125_v42 }
 0x59b   : > { %2542 = vmatprep.mubr.msk.bf16.mxu1 %vm2856_vm3, %v2855_v50 }
 0x642   : > { %v3180_v44 = vpop.f32.mrf.mxu1 }
 0x644   : > { %v2500_v45 = vpop.f32.mrf.mxu1 }
 0x646   : > { %v899_v46 = vpop.f32.mrf.mxu1 }
 0x647   : > { %v3210_v46 = vld [vmem:[%s3093_s28 + $0x8] sm:$0xff]  }
 0x648   : > { %v2501_v47 = vpop.f32.mrf.mxu1  ;;  %2539 = vmatpush3.bf16.msra.mxu1 %v3210_v46 }
 0x649   : > { %2540 = vmatprep.subr.bf16.mxu1 %v2855_v50 }
 0x64a   : > { %v946_v48 = vpop.f32.mrf.mxu1 }
 0x64b   : > { %v952_v49 = vmul.f32 0.35355338, %v946_v48 }
 0x64c   : > { %v2506_v53 = vpop.f32.mrf.mxu1 }
 0x64d   : > { %v953_v54 = vsel %vm836_vm8, %v952_v49, -inf }
 0x64e   : > { %954 = vmax.xlane.f32.xlu0 %v953_v54  ;;  %v949_v55 = vpop.f32.mrf.mxu1 }
 0x650   : > { %v2507_v56 = vpop.f32.mrf.mxu1 }
 0x652   : > { %v1057_v58 = vpop.f32.mrf.mxu1 }
 0x653   : > { %v1063_v60 = vmul.f32 0.35355338, %v1057_v58 }
 0x654   : > { %v2518_v62 = vpop.f32.mrf.mxu1 }
 0x655   : > { %v1064_v63 = vsel %vm836_vm8, %v1063_v60, -inf }
 0x656   : > { %1065 = vmax.xlane.f32.xlu1 %v1064_v63  ;;  %v1060_v1 = vpop.f32.mrf.mxu1 }
 0x658   : > { %v2519_v2 = vpop.f32.mrf.mxu1 }
 0x65a   : > { %v1168_v3 = vpop.f32.mrf.mxu1 }
 0x65b   : > { %v1174_v4 = vmul.f32 0.35355338, %v1168_v3 }
 0x65c   : > { %v2530_v6 = vpop.f32.mrf.mxu1 }
 0x65d   : > { %v1175_v7 = vsel %vm836_vm8, %v1174_v4, -inf }
 0x65e   : > { %1176 = vmax.xlane.f32.xlu0 %v1175_v7  ;;  %v1171_v8 = vpop.f32.mrf.mxu1 }
 0x660   : > { %v2531_v10 = vpop.f32.mrf.mxu1 }
 0x667   : > { %1076 = vrot.lane.b32.xlu1 %v3132_v9, %s2866_s16 }
 0x6d7   : > { %v955_v11 = vpop.xlane.xlu0 %954 }
 0x6d8   : > { %v956_v12 = vsub.f32 %v952_v49, %v955_v11  ;;  %v3216_v49 = vld [vmem:[%s3093_s28] sm:$0xff]   ;;  %s2413_s28 = sshll.u32 %s2836_s30, 6 }
 0x6d9   : > { %2541 = vmatpush3.bf16.msra.mxu1 %v3216_v49 }
 0x6da   : > { %v957_v13 = vmul.f32 1.442695, %v956_v12  ;;  %2554 = vmatprep.subr.bf16.mxu1 %v2855_v50  ;;  %v1255_v12 = vsub.s32 3, %v3107_v57 }
 0x6dc   : > { %2772 = vpow2.f32 %v957_v13  ;;  %v3231_v13 = vrot.slane %v3113_v59, %v1255_v12 }
 0x6df   : > { %v1066_v14 = vpop.xlane.xlu1 %1065 }
 0x6e0   : > { %v1067_v15 = vsub.f32 %v1063_v60, %v1066_v14 }
 0x6e2   : > { %v1068_v17 = vmul.f32 1.442695, %v1067_v15 }
 0x6e3   : > { %v1077_v29 = vpop.permute.xlu1 %1076 }
 0x6e4   : > { %2774 = vpow2.f32 %v1068_v17  ;;  %v1082_v36 = vand.u32 %v1077_v29, %v3140_v16 }
 0x6e7   : > { %v1177_v18 = vpop.xlane.xlu0 %1176 }
 0x6e8   : > { %v1178_v19 = vsub.f32 %v1174_v4, %v1177_v18 }
 0x6e9   : > { %v2773_v20 = vpop.eup %2772 }
 0x6ea   : > { %v1179_v21 = vmul.f32 1.442695, %v1178_v19  ;;  %v959_v22 = vsel %vm836_vm8, %v2773_v20, 0.0 }
 0x6eb   : > { %960 = vadd.xlane.f32.xlu0 %v959_v22 }
 0x6ec   : > { %2776 = vpow2.f32 %v1179_v21 }
 0x6f1   : > { %v2775_v23 = vpop.eup %2774 }
 0x6f2   : > { %v1070_v24 = vsel %vm836_vm8, %v2775_v23, 0.0 }
 0x6f3   : > { %1071 = vadd.xlane.f32.xlu0 %v1070_v24 }
 0x6f9   : > { %v2777_v25 = vpop.eup %2776 }
 0x6fa   : > { %v1181_v26 = vsel %vm836_vm8, %v2777_v25, 0.0 }
 0x6fb   : > { %1182 = vadd.xlane.f32.xlu1 %v1181_v26  ;;  %v3242_v26 = vld [vmem:[%s3098_s10 + $0x8] sm:$0xff]  }
 0x709   : > { %965 = vrot.lane.b32.xlu0 %v3132_v9, %s3493_s17  ;;  %s3494_s17 = smov 24  }
 0x70c   : > { %1187 = vrot.lane.b32.xlu1 %v3132_v9, %s3492_s18  ;;  %s3495_s18 = smov 16  }
 0x774   : > { %v961_v27 = vpop.xlane.xlu0 %960 }
 0x775   : > { %2778 = vrcp.f32 %v961_v27 }
 0x77c   : > { %v1072_v28 = vpop.xlane.xlu0 %1071 }
 0x77d   : > { %2780 = vrcp.f32 %v1072_v28 }
 0x780   : > { %v966_v30 = vpop.permute.xlu0 %965 }
 0x781   : > { %v971_v31 = vand.u32 %v966_v30, %v3140_v16  ;;  %v1328_v30 = vsub.s32 4, %v3107_v57 }
 0x782   : > { %v2779_v32 = vpop.eup %2778 }
 0x783   : > { %2509 = vmatpush3.bf16.msra.mxu0 %v971_v31  ;;  %v963_v33 = vmul.f32 %v2779_v32, %v2773_v20  ;;  %v1333_v31 = vsub.s32 5, %v3107_v57  ;;  %v3254_v32 = vrot.slane %v3113_v59, %v1328_v30 }
 0x784   : > { %v1183_v34 = vpop.xlane.xlu1 %1182  ;;  %2520 = vmatprep.subr.bf16.mxu0 %v2855_v50 }
 0x785   : > { %2782 = vrcp.f32 %v1183_v34  ;;  %v964_v35 = vpack.c.bf16 %v963_v33, %v963_v33 }
 0x787   : > { %2511 = vmatmul.mubr.msk.bf16.vlgmr.msra.gmra.mxu0 %vm851_vm9, %v964_v35  ;;  %v3257_v35 = vrot.slane %v3113_v59, %v1333_v31 }
 0x788   : > { %2521 = vmatpush3.bf16.msra.mxu0 %v1082_v36  ;;  %2522 = vmatprep.mubr.msk.bf16.mxu0 %vm2856_vm3, %v2855_v50  ;;  %v1188_v37 = vpop.permute.xlu1 %1187 }
 0x789   : > { %2532 = vmatprep.subr.bf16.mxu0 %v2855_v50  ;;  %v1193_v40 = vand.u32 %v1188_v37, %v3140_v16 }
 0x78a   : > { %v2781_v9 = vpop.eup %2780 }
 0x78b   : > { %v1074_v38 = vmul.f32 %v2781_v9, %v2775_v23 }
 0x78d   : > { %v1075_v39 = vpack.c.bf16 %v1074_v38, %v1074_v38 }
 0x78f   : > { %2523 = vmatmul.mubr.msk.bf16.vlgmr.msra.gmra.mxu0 %vm851_vm9, %v1075_v39 }
 0x790   : > { %2533 = vmatpush3.bf16.msra.mxu0 %v1193_v40  ;;  %2534 = vmatprep.mubr.msk.bf16.mxu0 %vm2856_vm3, %v2855_v50 }
 0x791   : > { %2546 = vmatprep.subr.bf16.mxu0 %v2855_v50 }
 0x792   : > { %v2783_v41 = vpop.eup %2782 }
 0x793   : > { %v1185_v42 = vmul.f32 %v2783_v41, %v2777_v25 }
 0x795   : > { %v1186_v45 = vpack.c.bf16 %v1185_v42, %v1185_v42 }
 0x797   : > { %2535 = vmatmul.mubr.msk.bf16.vlgmr.msra.gmra.mxu0 %vm851_vm9, %v1186_v45 }
 0x798   : > { %2550 = vmatprep.mubr.msk.bf16.mxu0 %vm2856_vm3, %v2855_v50  ;;  %2547 = vmatpush3.bf16.msra.mxu0 %v3242_v26 }
 0x799   : > { %2548 = vmatprep.subr.bf16.mxu0 %v2855_v50 }
 0x847   : > { %v1007_v47 = vpop.f32.mrf.mxu0 }
 0x848   : > { %1236 = vrot.lane.b32.xlu1 %v1007_v47, %s2869_s19  ;;  %v1339_v47 = vsub.s32 6, %v3107_v57 }
 0x849   : > { %v2512_v48 = vpop.f32.mrf.mxu0 }
 0x84a   : > { %v3306_v48 = vrot.slane %v3113_v59, %v1339_v47 }
 0x84b   : > { %v1010_v53 = vpop.f32.mrf.mxu0 }
 0x84d   : > { %v2513_v54 = vpop.f32.mrf.mxu0 }
 0x84f   : > { %v1118_v55 = vpop.f32.mrf.mxu0 }
 0x850   : > { %1240 = vrot.lane.b32.xlu0 %v1118_v55, %s3495_s18  ;;  %s680_s18 = scalar_lea.vmem %s3489_s7, %s2413_s28 }
 0x851   : > { %v2524_v56 = vpop.f32.mrf.mxu0  ;;  %v3272_v38 = vld [vmem:[%s680_s18 + $0x38] sm:$0xff]   ;;  %v3283_v39 = vld [vmem:[%s680_s18 + $0x20] sm:$0xff]   ;;  %v3291_v41 = vld [vmem:[%s680_s18 + $0x10] sm:$0xff]  }
 0x852   : > { %v3287_v40 = vld [vmem:[%s680_s18 + $0x18] sm:$0xff]   ;;  %v3295_v42 = vld [vmem:[%s680_s18 + $0x8] sm:$0xff]   ;;  %v3299_v45 = vld [vmem:[%s680_s18] sm:$0xff]  }
 0x853   : > { %v1121_v58 = vpop.f32.mrf.mxu0 }
 0x855   : > { %v2525_v60 = vpop.f32.mrf.mxu0 }
 0x857   : > { %v1229_v62 = vpop.f32.mrf.mxu0 }
 0x858   : > { %1244 = vrot.lane.b32.xlu1 %v1229_v62, %s3494_s17 }
 0x859   : > { %v2536_v63 = vpop.f32.mrf.mxu0 }
 0x85b   : > { %v1232_v1 = vpop.f32.mrf.mxu0 }
 0x85d   : > { %v2537_v2 = vpop.f32.mrf.mxu0 }
 0x8ba   : > { %v1237_v3 = vpop.permute.xlu1 %1236 }
 0x8bb   : > { %v1247_v6 = vsel %vm788_vm5, %v3180_v44, %v1237_v3 }
 0x8c2   : > { %v1241_v4 = vpop.permute.xlu0 %1240 }
 0x8c3   : > { %v1249_v7 = vsel %vm1248_vm10, %v1247_v6, %v1241_v4 }
 0x8ca   : > { %v1245_v8 = vpop.permute.xlu1 %1244 }
 0x8cb   : > { %v1251_v10 = vsel %vm1250_vm11, %v1249_v7, %v1245_v8 }
 0x8cc   : > { %v1252_v11 = vpack.c.bf16 %v1251_v10, %v1251_v10  ;;  %v1408_v10 = vsub.s32 7, %v3107_v57 }
 0x8ce   : > { %2543 = vmatmul.mubr.msk.bf16.vlgmr.msra.gmra.mxu1 %vm740_vm4, %v1252_v11  ;;  %v3313_v11 = vrot.slane %v3113_v59, %v1408_v10 }
 0x8cf   : > { %2570 = vmatprep.mubr.msk.bf16.mxu1 %vm2856_vm3, %v2855_v50  ;;  %2555 = vmatpush3.bf16.msra.mxu1 %v3272_v38 }
 0x8d0   : > { %2556 = vmatprep.subr.bf16.mxu1 %v2855_v50 }
 0x98e   : > { %v1306_v14 = vpop.f32.mrf.mxu1 }
 0x98f   : > { %v1307_v44 = vadd.f32 %v1306_v14, %v3231_v13 }
 0x990   : > { %v2544_v15 = vpop.f32.mrf.mxu1 }
 0x991   : > { %v3235_v17 = vadd.f32 %v1307_v44, %v3072_v43  ;;  %v3246_v43 = vld [vmem:[%s3098_s10] sm:$0xff]  }
 0x992   : > { %v1309_v18 = vpop.f32.mrf.mxu1  ;;  %2549 = vmatpush3.bf16.msra.mxu0 %v3246_v43 }
 0x993   : > { %v1313_v19 = vsel %vm698_vm2, %v3235_v17, 0.0  ;;  %2574 = vmatprep.subr.bf16.mxu0 %v2855_v50 }
 0x994   : > { %1314 = vadd.xlane.f32.xlu0 %v1313_v19  ;;  %v2545_v20 = vpop.f32.mrf.mxu1 }
 0x995   : > { %v3320_v20 = vld [vmem:[%s2962_s23 + $0x8] sm:$0x1f] }
 0xa1d   : > { %v1315_v21 = vpop.xlane.xlu0 %1314 }
 0xa1e   : > { %v1316_v22 = vmul.f32 0.03125, %v1315_v21  ;;  %v1502_v21 = vsel %vm698_vm2, %v3320_v20, 0.0 }
 0xa1f   : > { %1503 = vadd.xlane.f32.xlu0 %v1502_v21 }
 0xa20   : > { %v1317_v23 = vsub.f32 %v3235_v17, %v1316_v22 }
 0xa22   : > { %v1318_v24 = vmul.f32 %v1317_v23, %v1317_v23 }
 0xa24   : > { %v1319_v25 = vsel %vm698_vm2, %v1318_v24, 0.0 }
 0xa25   : > { %1320 = vadd.xlane.f32.xlu1 %v1319_v25 }
 0xaa8   : > { %v1504_v57 = vpop.xlane.xlu0 %1503 }
 0xaa9   : > { %v1505_v22 = vmul.f32 0.03125, %v1504_v57 }
 0xaab   : > { %v1506_v59 = vsub.f32 %v3320_v20, %v1505_v22 }
 0xaae   : > { %v1321_v27 = vpop.xlane.xlu1 %1320 }
 0xaaf   : > { %v1322_v28 = vmul.f32 0.03125, %v1321_v27 }
 0xab1   : > { %v1323_v29 = vadd.f32 1e-06, %v1322_v28 }
 0xab3   : > { %2784 = vrsqrt.f32 %v1323_v29 }
 0xac0   : > { %v2785_v33 = vpop.eup %2784 }
 0xac1   : > { %v1325_v34 = vmul.f32 %v2785_v33, %v1317_v23  ;;  %v1507_v23 = vmul.f32 %v1506_v59, %v1506_v59 }
 0xac3   : > { %v1330_v36 = vmul.f32 %v3254_v32, %v1325_v34  ;;  %v1508_v24 = vsel %vm698_vm2, %v1507_v23, 0.0 }
 0xac4   : > { %1509 = vadd.xlane.f32.xlu0 %v1508_v24 }
 0xac5   : > { %v1335_v9 = vadd.f32 %v3257_v35, %v1330_v36 }
 0xac7   : > { %v1336_v37 = vpack.c.bf16 %v1335_v9, %v1335_v9 }
 0xac9   : > { %2551 = vmatmul.mubr.msk.bf16.vlgmr.msra.gmra.mxu0 %vm740_vm4, %v1336_v37 }
 0xaca   : > { %2575 = vmatpush3.bf16.msra.mxu0 %v3085_v51  ;;  %2578 = vmatprep.mubr.msk.bf16.mxu0 %vm2856_vm3, %v2855_v50  ;;  %v3276_v51 = vld [vmem:[%s680_s18 + $0x30] sm:$0xff]  }
 0xacb   : > { %2576 = vmatprep.subr.bf16.mxu0 %v2855_v50  ;;  %2557 = vmatpush3.bf16.msra.mxu1 %v3276_v51 }
 0xacc   : > { %2558 = vmatprep.subr.bf16.mxu1 %v2855_v50 }
 0xace   : > { %2577 = vmatpush3.bf16.msra.mxu0 %v3101_v52  ;;  %v3280_v52 = vld [vmem:[%s680_s18 + $0x28] sm:$0xff]  }
 0xacf   : > { %2582 = vmatprep.subr.bf16.mxu0 %v2855_v50  ;;  %2559 = vmatpush3.bf16.msra.mxu1 %v3280_v52 }
 0xad0   : > { %2560 = vmatprep.subr.bf16.mxu1 %v2855_v50 }
 0xad3   : > { %2561 = vmatpush3.bf16.msra.mxu1 %v3283_v39 }
 0xad4   : > { %2562 = vmatprep.subr.bf16.mxu1 %v2855_v50 }
 0xad7   : > { %2563 = vmatpush3.bf16.msra.mxu1 %v3287_v40 }
 0xad8   : > { %2564 = vmatprep.subr.bf16.mxu1 %v2855_v50 }
 0xadb   : > { %2565 = vmatpush3.bf16.msra.mxu1 %v3291_v41 }
 0xadc   : > { %2566 = vmatprep.subr.bf16.mxu1 %v2855_v50 }
 0xadf   : > { %2567 = vmatpush3.bf16.msra.mxu1 %v3295_v42 }
 0xae0   : > { %2568 = vmatprep.subr.bf16.mxu1 %v2855_v50 }
 0xae3   : > { %2569 = vmatpush3.bf16.msra.mxu1 %v3299_v45 }
 0xae4   : > { %2600 = vmatprep.subr.bf16.mxu1 %v2855_v50 }
 0xb4d   : > { %v1510_v25 = vpop.xlane.xlu0 %1509 }
 0xb89   : > { %v1390_v53 = vpop.f32.mrf.mxu0 }
 0xb8a   : > { %v1391_v54 = vadd.f32 %v1390_v53, %v3306_v48 }
 0xb8b   : > { %v2552_v55 = vpop.f32.mrf.mxu0 }
 0xb8c   : > { %v1396_v56 = vmul.f32 %v1391_v54, %v1391_v54 }
 0xb8d   : > { %v1393_v58 = vpop.f32.mrf.mxu0 }
 0xb8e   : > { %v1397_v60 = vmul.f32 %v1396_v56, %v1391_v54 }
 0xb8f   : > { %v2553_v62 = vpop.f32.mrf.mxu0 }
 0xb90   : > { %v1398_v63 = vmul.f32 0.044715, %v1397_v60 }
 0xb92   : > { %v1399_v1 = vadd.f32 %v1398_v63, %v1391_v54 }
 0xb94   : > { %v1400_v2 = vmul.f32 0.7978846, %v1399_v1 }
 0xb96   : > { %2786 = vtanh.f32 %v1400_v2 }
 0xba3   : > { %v2787_v3 = vpop.eup %2786 }
 0xba4   : > { %v1402_v4 = vadd.f32 1.0, %v2787_v3 }
 0xba6   : > { %v1403_v6 = vmul.f32 0.5, %v1402_v4 }
 0xba8   : > { %v1404_v7 = vmul.f32 %v1403_v6, %v1391_v54 }
 0xbaa   : > { %v1405_v8 = vpack.c.bf16 %v1404_v7, %v1404_v7 }
 0xbac   : > { %2571 = vmatmul.mubr.bf16.vlgmr.msra.gmra.mxu1 %v1405_v8 }
 0xbad   : > { %2602 = vmatprep.mubr.msk.bf16.mxu1 %vm2856_vm3, %v2855_v50 }
 0xc6c   : > { %v1492_v12 = vpop.f32.mrf.mxu1 }
 0xc6d   : > { %v1493_v14 = vadd.f32 %v1492_v12, %v3313_v11 }
 0xc6e   : > { %v2572_v44 = vpop.f32.mrf.mxu1 }
 0xc6f   : > { %v1498_v15 = vadd.f32 %v1493_v14, %v3235_v17  ;;  %v1511_v17 = vmul.f32 0.03125, %v1510_v25 }
 0xc70   : > { %v1495_v18 = vpop.f32.mrf.mxu1 }
 0xc71   : > { %1499 = vst.msk [vmem:[%s2962_s23] sm:$0x1f] %vm698_vm2, %v1498_v15  ;;  %v1512_v27 = vadd.f32 1e-06, %v1511_v17 }
 0xc72   : > { %v2573_v19 = vpop.f32.mrf.mxu1 }
 0xc73   : > { %2788 = vrsqrt.f32 %v1512_v27 }
 0xc80   : > { %v2789_v28 = vpop.eup %2788 }
 0xc81   : > { %v1514_v29 = vmul.f32 %v2789_v28, %v1506_v59 }
 0xc83   : > { %v1515_v30 = vmul.f32 %v1514_v29, %v3117_v61 }
 0xc85   : > { %v1516_v31 = vadd.f32 %v1515_v30, %v3120_v0 }
 0xc87   : > { %v1517_v33 = vpack.c.bf16 %v1516_v31, %v1516_v31 }
 0xc89   : > { %2579 = vmatmul.mubr.msk.bf16.vlgmr.msra.gmra.mxu0 %vm740_vm4, %v1517_v33 }
 0xc8a   : > { %2584 = vmatprep.mubr.msk.bf16.mxu0 %vm2856_vm3, %v2855_v50 }
 0xd49   : > { %v1555_v34 = vpop.f32.mrf.mxu0 }
 0xd4a   : > { %v1556_v36 = vadd.f32 %v1555_v34, %v3129_v5 }
 0xd4b   : > { %v2580_v9 = vpop.f32.mrf.mxu0 }
 0xd4c   : > { %v3332_v37 = vpack.c.bf16 %v1556_v36, %v1556_v36 }
 0xd4d   : > { %v1558_v47 = vpop.f32.mrf.mxu0 }
 0xd4e   : > { %1563 = vrot.lane.b32.xlu0 %v3332_v37, %s2858_s22  ;;  %s3497_s22 = smov 40  }
 0xd4f   : > { %v2581_v53 = vpop.f32.mrf.mxu0 }
 0xd52   : > { %1674 = vrot.lane.b32.xlu0 %v3332_v37, %s2861_s25  ;;  %s3499_s25 = smov 24  }
 0xd56   : > { %1785 = vrot.lane.b32.xlu0 %v3332_v37, %s2860_s24  ;;  %s3498_s24 = smov 16  }
 0xd5a   : > { %1896 = vrot.lane.b32.xlu0 %v3332_v37, %s2864_s29 }
 0xdc0   : > { %v1564_v61 = vpop.permute.xlu0 %1563 }
 0xdc1   : > { %v1569_v0 = vsel %vm788_vm5, %v1564_v61, 0 }
 0xdc2   : > { %2583 = vmatpush3.bf16.xpose.msra.mxu0 %v1569_v0 }
 0xdc3   : > { %2588 = vmatprep.subr.bf16.mxu0 %v2855_v50 }
 0xdc4   : > { %v1675_v12 = vpop.permute.xlu0 %1674 }
 0xdc5   : > { %v1680_v44 = vsel %vm788_vm5, %v1675_v12, 0 }
 0xdc8   : > { %v1786_v15 = vpop.permute.xlu0 %1785 }
 0xdc9   : > { %2585 = vmatmul.mubr.msk.bf16.vlgmr.msra.gmra.mxu0 %vm788_vm5, %v3332_v37  ;;  %v1791_v19 = vsel %vm788_vm5, %v1786_v15, 0 }
 0xdca   : > { %2590 = vmatprep.mubr.msk.bf16.mxu0 %vm2856_vm3, %v2855_v50 }
 0xdcc   : > { %v1897_v21 = vpop.permute.xlu0 %1896 }
 0xdcd   : > { %v1902_v22 = vsel %vm788_vm5, %v1897_v21, 0 }
 0xe89   : > { %v1605_v5 = vpop.f32.mrf.mxu0 }
 0xe8a   : > { %v1611_v54 = vmul.f32 0.35355338, %v1605_v5 }
 0xe8b   : > { %v2586_v55 = vpop.f32.mrf.mxu0 }
 0xe8c   : > { %v1612_v56 = vsel %vm836_vm8, %v1611_v54, -inf }
 0xe8d   : > { %1613 = vmax.xlane.f32.xlu1 %v1612_v56  ;;  %v1608_v58 = vpop.f32.mrf.mxu0 }
 0xe8f   : > { %v2587_v60 = vpop.f32.mrf.mxu0 }
 0xf16   : > { %v1614_v62 = vpop.xlane.xlu1 %1613 }
 0xf17   : > { %v1615_v63 = vsub.f32 %v1611_v54, %v1614_v62 }
 0xf19   : > { %v1616_v1 = vmul.f32 1.442695, %v1615_v63 }
 0xf1b   : > { %2790 = vpow2.f32 %v1616_v1 }
 0xf28   : > { %v2791_v2 = vpop.eup %2790 }
 0xf29   : > { %v1618_v3 = vsel %vm836_vm8, %v2791_v2, 0.0 }
 0xf2a   : > { %1619 = vadd.xlane.f32.xlu1 %v1618_v3 }
 0xf3b   : > { %1624 = vrot.lane.b32.xlu1 %v3332_v37, %s2857_s21  ;;  %s3496_s21 = smov 56  }
 0xf3f   : > { %1672 = vrot.lane.b32.xlu1 %v3332_v37, %s2862_s26 }
 0xf43   : > { %1783 = vrot.lane.b32.xlu1 %v3332_v37, %s2863_s27 }
 0xf47   : > { %1894 = vrot.lane.b32.xlu1 %v3332_v37, %s2865_s20 }
 0xfb3   : > { %v1620_v4 = vpop.xlane.xlu1 %1619 }
 0xfb4   : > { %2792 = vrcp.f32 %v1620_v4 }
 0xfb7   : > { %v1625_v6 = vpop.permute.xlu1 %1624 }
 0xfb8   : > { %v1630_v7 = vand.u32 %v1625_v6, %v3140_v16 }
 0xfba   : > { %2589 = vmatpush3.bf16.msra.mxu0 %v1630_v7 }
 0xfbb   : > { %2594 = vmatprep.subr.bf16.mxu0 %v2855_v50  ;;  %v1673_v18 = vpop.permute.xlu1 %1672 }
 0xfbf   : > { %v1784_v57 = vpop.permute.xlu1 %1783 }
 0xfc1   : > { %v2793_v8 = vpop.eup %2792 }
 0xfc2   : > { %v1622_v10 = vmul.f32 %v2793_v8, %v2791_v2 }
 0xfc3   : > { %v1895_v59 = vpop.permute.xlu1 %1894 }
 0xfc4   : > { %v1623_v14 = vpack.c.bf16 %v1622_v10, %v1622_v10 }
 0xfc6   : > { %2591 = vmatmul.mubr.msk.bf16.vlgmr.msra.gmra.mxu0 %vm851_vm9, %v1623_v14 }
 0xfc7   : > { %2595 = vmatpush3.bf16.xpose.msra.mxu0 %v1680_v44  ;;  %2596 = vmatprep.mubr.msk.bf16.mxu0 %vm2856_vm3, %v2855_v50 }
 0xfc8   : > { %2606 = vmatprep.subr.bf16.mxu0 %v2855_v50 }
 0xfce   : > { %2597 = vmatmul.mubr.msk.bf16.vlgmr.msra.gmra.mxu0 %vm788_vm5, %v1673_v18 }
 0xfcf   : > { %2607 = vmatpush3.bf16.xpose.msra.mxu0 %v1791_v19  ;;  %2608 = vmatprep.mubr.msk.bf16.mxu0 %vm2856_vm3, %v2855_v50 }
 0xfd0   : > { %2618 = vmatprep.subr.bf16.mxu0 %v2855_v50 }
 0xfd6   : > { %2609 = vmatmul.mubr.msk.bf16.vlgmr.msra.gmra.mxu0 %vm788_vm5, %v1784_v57 }
 0xfd7   : > { %2619 = vmatpush3.bf16.xpose.msra.mxu0 %v1902_v22  ;;  %2620 = vmatprep.mubr.msk.bf16.mxu0 %vm2856_vm3, %v2855_v50 }
 0xfd8   : > { %2630 = vmatprep.subr.bf16.mxu0 %v2855_v50 }
 0xfde   : > { %2621 = vmatmul.mubr.msk.bf16.vlgmr.msra.gmra.mxu0 %vm788_vm5, %v1895_v59 }
 0xfdf   : > { %2631 = vmatpush3.bf16.msra.mxu0 %v3210_v46  ;;  %2634 = vmatprep.mubr.msk.bf16.mxu0 %vm2856_vm3, %v2855_v50 }
 0xfe0   : > { %2632 = vmatprep.subr.bf16.mxu0 %v2855_v50 }
 0xfe3   : > { %2633 = vmatpush3.bf16.msra.mxu0 %v3216_v49 }
 0xfe4   : > { %2646 = vmatprep.subr.bf16.mxu0 %v2855_v50 }
0x1086   : > { %v3382_v23 = vpop.f32.mrf.mxu0 }
0x1088   : > { %v2592_v24 = vpop.f32.mrf.mxu0 }
0x108a   : > { %v1669_v25 = vpop.f32.mrf.mxu0 }
0x108c   : > { %v2593_v17 = vpop.f32.mrf.mxu0 }
0x108e   : > { %v1716_v27 = vpop.f32.mrf.mxu0 }
0x108f   : > { %v1722_v28 = vmul.f32 0.35355338, %v1716_v27 }
0x1090   : > { %v2598_v29 = vpop.f32.mrf.mxu0 }
0x1091   : > { %v1723_v30 = vsel %vm836_vm8, %v1722_v28, -inf }
0x1092   : > { %1724 = vmax.xlane.f32.xlu0 %v1723_v30  ;;  %v1719_v46 = vpop.f32.mrf.mxu0 }
0x1094   : > { %v2599_v31 = vpop.f32.mrf.mxu0 }
0x1096   : > { %v1827_v33 = vpop.f32.mrf.mxu0 }
0x1097   : > { %v1833_v34 = vmul.f32 0.35355338, %v1827_v33 }
0x1098   : > { %v2610_v36 = vpop.f32.mrf.mxu0 }
0x1099   : > { %v1834_v49 = vsel %vm836_vm8, %v1833_v34, -inf }
0x109a   : > { %1835 = vmax.xlane.f32.xlu1 %v1834_v49  ;;  %v1830_v9 = vpop.f32.mrf.mxu0 }
0x109c   : > { %v2611_v47 = vpop.f32.mrf.mxu0 }
0x109e   : > { %v1938_v53 = vpop.f32.mrf.mxu0 }
0x109f   : > { %v1944_v61 = vmul.f32 0.35355338, %v1938_v53 }
0x10a0   : > { %v2622_v0 = vpop.f32.mrf.mxu0 }
0x10a1   : > { %v1945_v5 = vsel %vm836_vm8, %v1944_v61, -inf }
0x10a2   : > { %1946 = vmax.xlane.f32.xlu0 %v1945_v5  ;;  %v1941_v54 = vpop.f32.mrf.mxu0 }
0x10a4   : > { %v2623_v55 = vpop.f32.mrf.mxu0 }
0x10ab   : > { %1846 = vrot.lane.b32.xlu1 %v3332_v37, %s2866_s16 }
0x111b   : > { %v1725_v56 = vpop.xlane.xlu0 %1724 }
0x111c   : > { %v1726_v58 = vsub.f32 %v1722_v28, %v1725_v56 }
0x111e   : > { %v1727_v60 = vmul.f32 1.442695, %v1726_v58 }
0x1120   : > { %2794 = vpow2.f32 %v1727_v60 }
0x1123   : > { %v1836_v62 = vpop.xlane.xlu1 %1835 }
0x1124   : > { %v1837_v63 = vsub.f32 %v1833_v34, %v1836_v62 }
0x1126   : > { %v1838_v1 = vmul.f32 1.442695, %v1837_v63 }
0x1127   : > { %v1847_v18 = vpop.permute.xlu1 %1846 }
0x1128   : > { %2796 = vpow2.f32 %v1838_v1  ;;  %v1852_v25 = vand.u32 %v1847_v18, %v3140_v16 }
0x112b   : > { %v1947_v2 = vpop.xlane.xlu0 %1946 }
0x112c   : > { %v1948_v3 = vsub.f32 %v1944_v61, %v1947_v2 }
0x112d   : > { %v2795_v4 = vpop.eup %2794 }
0x112e   : > { %v1949_v6 = vmul.f32 1.442695, %v1948_v3  ;;  %v1729_v7 = vsel %vm836_vm8, %v2795_v4, 0.0 }
0x112f   : > { %1730 = vadd.xlane.f32.xlu0 %v1729_v7 }
0x1130   : > { %2798 = vpow2.f32 %v1949_v6 }
0x1135   : > { %v2797_v8 = vpop.eup %2796 }
0x1136   : > { %v1840_v10 = vsel %vm836_vm8, %v2797_v8, 0.0 }
0x1137   : > { %1841 = vadd.xlane.f32.xlu0 %v1840_v10 }
0x113d   : > { %v2799_v12 = vpop.eup %2798 }
0x113e   : > { %v1951_v14 = vsel %vm836_vm8, %v2799_v12, 0.0 }
0x113f   : > { %1952 = vadd.xlane.f32.xlu1 %v1951_v14 }
0x114d   : > { %1735 = vrot.lane.b32.xlu0 %v3332_v37, %s3496_s21 }
0x1150   : > { %1957 = vrot.lane.b32.xlu1 %v3332_v37, %s3497_s22 }
0x11b8   : > { %v1731_v44 = vpop.xlane.xlu0 %1730 }
0x11b9   : > { %2800 = vrcp.f32 %v1731_v44 }
0x11c0   : > { %v1842_v15 = vpop.xlane.xlu0 %1841 }
0x11c1   : > { %2802 = vrcp.f32 %v1842_v15 }
0x11c4   : > { %v1736_v19 = vpop.permute.xlu0 %1735 }
0x11c5   : > { %v1741_v21 = vand.u32 %v1736_v19, %v3140_v16 }
0x11c6   : > { %v2801_v57 = vpop.eup %2800 }
0x11c7   : > { %2601 = vmatpush3.bf16.msra.mxu1 %v1741_v21  ;;  %v1733_v22 = vmul.f32 %v2801_v57, %v2795_v4 }
0x11c8   : > { %v1953_v59 = vpop.xlane.xlu1 %1952  ;;  %2612 = vmatprep.subr.bf16.mxu1 %v2855_v50 }
0x11c9   : > { %2804 = vrcp.f32 %v1953_v59  ;;  %v1734_v24 = vpack.c.bf16 %v1733_v22, %v1733_v22 }
0x11cb   : > { %2603 = vmatmul.mubr.msk.bf16.vlgmr.msra.gmra.mxu1 %vm851_vm9, %v1734_v24 }
0x11cc   : > { %2613 = vmatpush3.bf16.msra.mxu1 %v1852_v25  ;;  %2614 = vmatprep.mubr.msk.bf16.mxu1 %vm2856_vm3, %v2855_v50  ;;  %v1958_v17 = vpop.permute.xlu1 %1957 }
0x11cd   : > { %2624 = vmatprep.subr.bf16.mxu1 %v2855_v50  ;;  %v1963_v29 = vand.u32 %v1958_v17, %v3140_v16 }
0x11ce   : > { %v2803_v37 = vpop.eup %2802 }
0x11cf   : > { %v1844_v27 = vmul.f32 %v2803_v37, %v2797_v8 }
0x11d1   : > { %v1845_v28 = vpack.c.bf16 %v1844_v27, %v1844_v27 }
0x11d3   : > { %2615 = vmatmul.mubr.msk.bf16.vlgmr.msra.gmra.mxu1 %vm851_vm9, %v1845_v28 }
0x11d4   : > { %2625 = vmatpush3.bf16.msra.mxu1 %v1963_v29  ;;  %2626 = vmatprep.mubr.msk.bf16.mxu1 %vm2856_vm3, %v2855_v50 }
0x11d5   : > { %2638 = vmatprep.subr.bf16.mxu1 %v2855_v50 }
0x11d6   : > { %v2805_v30 = vpop.eup %2804 }
0x11d7   : > { %v1955_v46 = vmul.f32 %v2805_v30, %v2799_v12 }
0x11d9   : > { %v1956_v31 = vpack.c.bf16 %v1955_v46, %v1955_v46 }
0x11db   : > { %2627 = vmatmul.mubr.msk.bf16.vlgmr.msra.gmra.mxu1 %vm851_vm9, %v1956_v31 }
0x11dc   : > { %2639 = vmatpush3.bf16.msra.mxu1 %v3242_v26  ;;  %2642 = vmatprep.mubr.msk.bf16.mxu1 %vm2856_vm3, %v2855_v50 }
0x11dd   : > { %2640 = vmatprep.subr.bf16.mxu1 %v2855_v50 }
0x11e0   : > { %2641 = vmatpush3.bf16.msra.mxu1 %v3246_v43 }
0x128b   : > { %v1777_v16 = vpop.f32.mrf.mxu1 }
0x128c   : > { %2006 = vrot.lane.b32.xlu1 %v1777_v16, %s2869_s19 }
0x128d   : > { %v2604_v33 = vpop.f32.mrf.mxu1 }
0x128f   : > { %v1780_v34 = vpop.f32.mrf.mxu1 }
0x1291   : > { %v2605_v36 = vpop.f32.mrf.mxu1 }
0x1293   : > { %v1888_v49 = vpop.f32.mrf.mxu1 }
0x1294   : > { %2010 = vrot.lane.b32.xlu0 %v1888_v49, %s3498_s24 }
0x1295   : > { %v2616_v9 = vpop.f32.mrf.mxu1 }
0x1297   : > { %v1891_v47 = vpop.f32.mrf.mxu1 }
0x1299   : > { %v2617_v53 = vpop.f32.mrf.mxu1 }
0x129b   : > { %v1999_v26 = vpop.f32.mrf.mxu1 }
0x129c   : > { %2014 = vrot.lane.b32.xlu1 %v1999_v26, %s3499_s25 }
0x129d   : > { %v2628_v61 = vpop.f32.mrf.mxu1 }
0x129f   : > { %v2002_v0 = vpop.f32.mrf.mxu1 }
0x12a1   : > { %v2629_v5 = vpop.f32.mrf.mxu1 }
0x12fe   : > { %v2007_v54 = vpop.permute.xlu1 %2006 }
0x12ff   : > { %v2017_v55 = vsel %vm788_vm5, %v3382_v23, %v2007_v54 }
0x1306   : > { %v2011_v43 = vpop.permute.xlu0 %2010 }
0x1307   : > { %v2018_v56 = vsel %vm1248_vm10, %v2017_v55, %v2011_v43 }
0x130e   : > { %v2015_v58 = vpop.permute.xlu1 %2014 }
0x130f   : > { %v2019_v60 = vsel %vm1250_vm11, %v2018_v56, %v2015_v58 }
0x1310   : > { %v2020_v62 = vpack.c.bf16 %v2019_v60, %v2019_v60 }
0x1312   : > { %2635 = vmatmul.mubr.msk.bf16.vlgmr.msra.gmra.mxu0 %vm740_vm4, %v2020_v62 }
0x1313   : > { %2647 = vmatpush3.bf16.msra.mxu0 %v3272_v38  ;;  %2662 = vmatprep.mubr.msk.bf16.mxu0 %vm2856_vm3, %v2855_v50 }
0x1314   : > { %2648 = vmatprep.subr.bf16.mxu0 %v2855_v50 }
0x1317   : > { %2649 = vmatpush3.bf16.msra.mxu0 %v3276_v51 }
0x1318   : > { %2650 = vmatprep.subr.bf16.mxu0 %v2855_v50 }
0x131b   : > { %2651 = vmatpush3.bf16.msra.mxu0 %v3280_v52 }
0x131c   : > { %2652 = vmatprep.subr.bf16.mxu0 %v2855_v50 }
0x131f   : > { %2653 = vmatpush3.bf16.msra.mxu0 %v3283_v39 }
0x1320   : > { %2654 = vmatprep.subr.bf16.mxu0 %v2855_v50 }
0x1323   : > { %2655 = vmatpush3.bf16.msra.mxu0 %v3287_v40 }
0x1324   : > { %2656 = vmatprep.subr.bf16.mxu0 %v2855_v50 }
0x1327   : > { %2657 = vmatpush3.bf16.msra.mxu0 %v3291_v41 }
0x1328   : > { %2658 = vmatprep.subr.bf16.mxu0 %v2855_v50 }
0x132b   : > { %2659 = vmatpush3.bf16.msra.mxu0 %v3295_v42 }
0x132c   : > { %2660 = vmatprep.subr.bf16.mxu0 %v2855_v50 }
0x132f   : > { %2661 = vmatpush3.bf16.msra.mxu0 %v3299_v45 }
0x13d2   : > { %v2058_v38 = vpop.f32.mrf.mxu0 }
0x13d3   : > { %v2059_v51 = vadd.f32 %v2058_v38, %v3231_v13 }
0x13d4   : > { %v2636_v52 = vpop.f32.mrf.mxu0 }
0x13d5   : > { %v2064_v39 = vadd.f32 %v3320_v20, %v2059_v51 }
0x13d6   : > { %v2061_v23 = vpop.f32.mrf.mxu0 }
0x13d7   : > { %v2065_v40 = vsel %vm698_vm2, %v2064_v39, 0.0 }
0x13d8   : > { %2066 = vadd.xlane.f32.xlu0 %v2065_v40  ;;  %v2637_v63 = vpop.f32.mrf.mxu0 }
0x1461   : > { %v2067_v41 = vpop.xlane.xlu0 %2066 }
0x1462   : > { %v2068_v1 = vmul.f32 0.03125, %v2067_v41 }
0x1464   : > { %v2069_v2 = vsub.f32 %v2064_v39, %v2068_v1 }
0x1466   : > { %v2070_v3 = vmul.f32 %v2069_v2, %v2069_v2 }
0x1468   : > { %v2071_v42 = vsel %vm698_vm2, %v2070_v3, 0.0 }
0x1469   : > { %2072 = vadd.xlane.f32.xlu1 %v2071_v42 }
0x14f2   : > { %v2073_v50 = vpop.xlane.xlu1 %2072 }
0x14f3   : > { %v2074_v45 = vmul.f32 0.03125, %v2073_v50 }
0x14f5   : > { %v2075_v4 = vadd.f32 1e-06, %v2074_v45 }
0x14f7   : > { %2806 = vrsqrt.f32 %v2075_v4 }
0x1504   : > { %v2807_v13 = vpop.eup %2806 }
0x1505   : > { %v2077_v6 = vmul.f32 %v2807_v13, %v2069_v2 }
0x1507   : > { %v2078_v20 = vmul.f32 %v2077_v6, %v3254_v32 }
0x1509   : > { %v2079_v7 = vadd.f32 %v2078_v20, %v3257_v35 }
0x150b   : > { %v2080_v8 = vpack.c.bf16 %v2079_v7, %v2079_v7 }
0x150d   : > { %2643 = vmatmul.mubr.msk.bf16.vlgmr.msra.gmra.mxu1 %vm740_vm4, %v2080_v8 }
0x15cd   : > { %v2118_v10 = vpop.f32.mrf.mxu1 }
0x15ce   : > { %v2119_v12 = vadd.f32 %v2118_v10, %v3306_v48 }
0x15cf   : > { %v2644_v14 = vpop.f32.mrf.mxu1 }
0x15d0   : > { %v2124_v44 = vmul.f32 %v2119_v12, %v2119_v12 }
0x15d1   : > { %v2121_v15 = vpop.f32.mrf.mxu1 }
0x15d2   : > { %v2125_v18 = vmul.f32 %v2124_v44, %v2119_v12 }
0x15d3   : > { %v2645_v19 = vpop.f32.mrf.mxu1 }
0x15d4   : > { %v2126_v21 = vmul.f32 0.044715, %v2125_v18 }
0x15d6   : > { %v2127_v57 = vadd.f32 %v2126_v21, %v2119_v12 }
0x15d8   : > { %v2128_v22 = vmul.f32 0.7978846, %v2127_v57 }
0x15da   : > { %2808 = vtanh.f32 %v2128_v22 }
0x15e7   : > { %v2809_v59 = vpop.eup %2808 }
0x15e8   : > { %v2130_v32 = vadd.f32 1.0, %v2809_v59 }
0x15ea   : > { %v2131_v24 = vmul.f32 0.5, %v2130_v32 }
0x15ec   : > { %v2132_v35 = vmul.f32 %v2131_v24, %v2119_v12 }
0x15ee   : > { %v2133_v25 = vpack.c.bf16 %v2132_v35, %v2132_v35 }
0x15f0   : > { %2663 = vmatmul.mubr.bf16.vlgmr.msra.gmra.mxu0 %v2133_v25 }
0x16b0   : > { %v2168_v37 = vpop.f32.mrf.mxu0 }
0x16b1   : > { %v2169_v17 = vadd.f32 %v2168_v37, %v3313_v11 }
0x16b2   : > { %v2664_v48 = vpop.f32.mrf.mxu0  ;;  %2179 = sbr.rel (%p2400_p7) target bundleno = 6130 (0x17f2), region = 64 }
0x16b3   : > { %v2174_v27 = vadd.f32 %v2169_v17, %v2064_v39 }
0x16b4   : > { %v2171_v28 = vpop.f32.mrf.mxu0 }
0x16b5   : > { %2399 = vst.msk [vmem:[%s2962_s23 + $0x8] sm:$0x1f] %vm698_vm2, %v2174_v27 }
0x16b6   : > { %v2665_v29 = vpop.f32.mrf.mxu0 }
0x16b7   : > { %v2180_v30 = vld [vmem:[%s2962_s23] sm:$0x1f] }
0x16b8   : > { %v2183_v46 = vsel %vm698_vm2, %v2180_v30, 0.0  ;;  %v2401_v53 = vld [vmem:[%s3490_s8] ss:$0 sm:$0xff]  ;;  %v2402_v61 = vld [vmem:[%s3490_s8 + $0x1] ss:$0 sm:$0xff] }
0x16b9   : > { %2184 = vadd.xlane.f32.xlu0 %v2183_v46 }
0x16bc   : > { %v2403_v54 = vld [vmem:[%s2962_s23 + $0x8] sm:$0x1f] }
0x16bd   : > { %v2210_v43 = vsel %vm698_vm2, %v2403_v54, 0.0 }
0x16be   : > { %2211 = vadd.xlane.f32.xlu1 %v2210_v43 }
0x1742   : > { %v2185_v31 = vpop.xlane.xlu0 %2184 }
0x1743   : > { %v2186_v16 = vmul.f32 0.03125, %v2185_v31 }
0x1745   : > { %v2187_v33 = vsub.f32 %v2180_v30, %v2186_v16 }
0x1747   : > { %v2188_v11 = vmul.f32 %v2187_v33, %v2187_v33  ;;  %v2212_v55 = vpop.xlane.xlu1 %2211 }
0x1748   : > { %v2213_v56 = vmul.f32 0.03125, %v2212_v55 }
0x1749   : > { %v2189_v34 = vsel %vm698_vm2, %v2188_v11, 0.0 }
0x174a   : > { %2190 = vadd.xlane.f32.xlu0 %v2189_v34  ;;  %v2214_v58 = vsub.f32 %v2403_v54, %v2213_v56 }
0x174c   : > { %v2215_v60 = vmul.f32 %v2214_v58, %v2214_v58 }
0x174e   : > { %v2216_v62 = vsel %vm698_vm2, %v2215_v60, 0.0 }
0x174f   : > { %2217 = vadd.xlane.f32.xlu1 %v2216_v62 }
0x17d3   : > { %v2191_v36 = vpop.xlane.xlu0 %2190 }
0x17d4   : > { %v2192_v49 = vmul.f32 0.03125, %v2191_v36 }
0x17d6   : > { %v2193_v9 = vadd.f32 1e-06, %v2192_v49 }
0x17d8   : > { %2810 = vrsqrt.f32 %v2193_v9  ;;  %v2218_v38 = vpop.xlane.xlu1 %2217 }
0x17d9   : > { %v2219_v51 = vmul.f32 0.03125, %v2218_v38 }
0x17db   : > { %v2220_v52 = vadd.f32 1e-06, %v2219_v51 }
0x17dd   : > { %2812 = vrsqrt.f32 %v2220_v52 }
0x17e5   : > { %v2811_v47 = vpop.eup %2810 }
0x17e6   : > { %v2195_v26 = vmul.f32 %v2811_v47, %v2187_v33 }
0x17e8   : > { %v2200_v0 = vmul.f32 %v2401_v53, %v2195_v26 }
0x17ea   : > { %v2205_v5 = vadd.f32 %v2402_v61, %v2200_v0  ;;  %v2813_v39 = vpop.eup %2812 }
0x17eb   : > { %v2222_v23 = vmul.f32 %v2813_v39, %v2214_v58 }
0x17ec   : > { %2206 = vst.msk [vmem:[%s2962_s23] sm:$0x1f] %vm698_vm2, %v2205_v5 }
0x17ed   : > { %v2227_v40 = vmul.f32 %v2401_v53, %v2222_v23 }
0x17ef   : > { %v2232_v63 = vadd.f32 %v2402_v61, %v2227_v40 }
0x17f1   : > { %2406 = vst.msk [vmem:[%s2962_s23 + $0x8] sm:$0x1f] %vm698_vm2, %v2232_v63 }
0x17f2 PF: > { %s19_s13 = sadd.s32 1, %s2852_s13   ;;  %s3500_s30 = smov %s2844_s11 }
0x17f3   : > { %p16_p8 = scmp.ge.s32.totalorder %s19_s13, 6   ;;  %s3501_s10 = smov %s2848_s12 }
0x17f4   : > { %s3502_s11 = smov %s3505_s14  ;;  %s3503_s12 = smov %s3509_s15 }
0x17f5   :  { %18 = sbr.rel (!%p16_p8) target bundleno = 3 (0x3), region = 102 }

// kernel: blip_video_caption_forward.3
= control target key start
LH: loop header
LB: loop body
LE: loop exit
PB: predicated region body
PF: predicated region fallthrough
CT: control target
= control target key end

     0   :  { %s4239_s18 = smov 0   ;;  %s4854_s0 = inlined_call_operand.vmem [shape: f32[16,32], index: 0, kind: input, shape index: {}]   ;;  %s4855_s1 = inlined_call_operand.vmem [shape: f32[2,8], index: 1, kind: input, shape index: {}]   ;;  %s4856_s2 = inlined_call_operand.vmem [shape: f32[2,10,32], index: 2, kind: input, shape index: {}]   ;;  %s4857_s3 = inlined_call_operand.vmem [shape: f32[16,128], index: 3, kind: input, shape index: {}]   ;;  %s4858_s4 = inlined_call_operand.vmem [shape: f32[8,128], index: 4, kind: input, shape index: {}]   ;;  %s4859_s5 = inlined_call_operand.vmem [shape: f32[2,16,128], index: 5, kind: input, shape index: {}]   ;;  %s4860_s6 = inlined_call_operand.vmem [shape: bf16[2,32,96], index: 6, kind: input, shape index: {}]   ;;  %s4861_s7 = inlined_call_operand.vmem [shape: bf16[2,32,32], index: 7, kind: input, shape index: {}]   ;;  %s4862_s8 = inlined_call_operand.vmem [shape: bf16[2,32,32], index: 8, kind: input, shape index: {}]   ;;  %s4863_s9 = inlined_call_operand.vmem [shape: bf16[2,32,64], index: 9, kind: input, shape index: {}]   ;;  %s4864_s10 = inlined_call_operand.vmem [shape: bf16[2,32,32], index: 10, kind: input, shape index: {}]   ;;  %s4865_s11 = inlined_call_operand.vmem [shape: bf16[2,32,128], index: 11, kind: input, shape index: {}]   ;;  %s4866_s12 = inlined_call_operand.vmem [shape: bf16[2,128,32], index: 12, kind: input, shape index: {}]   ;;  %s4867_s13 = inlined_call_operand.vmem [shape: bf16[32,32], index: 13, kind: input, shape index: {}]   ;;  %s4868_s14 = inlined_call_operand.vmem [shape: bf16[32,128], index: 14, kind: input, shape index: {}]   ;;  %s4869_s15 = inlined_call_operand.vmem [shape: f32[1,128], index: 15, kind: output, shape index: {}]  }
   0x1 LB: > { %s4245_s19 = sadd.s32 4294967295, %s4137_s18   ;;  %p3482_p0 = scmp.ge.s32.totalorder %s4137_s18, 1  ;;  %s4137_s18 = sphi %s4239_s18, %s25_s18  }
   0x2   : > { %p422_p1 = scmp.lt.s32.totalorder %s4137_s18, 3 }
   0x4   : > { %p423_p2 = pnand %p3482_p0, %p422_p1 }
   0x5   : > { %p3483_p3 = scmp.ne.s32.totalorder (!%p423_p2), %s4245_s19, 0 }
   0x6   : > { %426 = sbr.rel (%p423_p2) target bundleno = 7161 (0x1bf9), region = 80 }
   0xb   : > { %v4252_v0 = vld [vmem:[%s4858_s4] sm:$0xff]  ;;  %465 = sbr.rel (%p3483_p3) target bundleno = 330 (0x14a), region = 84 }
  0x10   : > { %v466_v1 = vld [vmem:[%s4854_s0] sm:$0xff]  ;;  %vm468_vm0 = vcmask 261120   ;;  %v467_v2 = vld [vmem:[%s4854_s0 + $0x8] sm:$0xff]  ;;  %v496_v5 = vlaneseq  ;;  %v4139_v10 = vmov 0   ;;  %vm525_vm5 = vcmask 64512  }
  0x11   : > { %v469_v3 = vsel %vm468_vm0, %v466_v1, 0.0  ;;  %v472_v4 = vsel %vm468_vm0, %v467_v2, 0.0  ;;  %v515_v6 = vld [vmem:[%s4855_s1] sm:$0x1]  ;;  %v527_v7 = vld [vmem:[%s4855_s1 + $0x1] sm:$0x1] }
  0x12   : > { %470 = vadd.xlane.f32.xlu0 %v469_v3  ;;  %vm516_vm1 = vcmp.gt.f32.partialorder %v515_v6, 0.5  ;;  %v497_v8 = vshrl.u32 %v496_v5, 7  ;;  %v513_v9 = vand.u32 127, %v496_v5  ;;  %vm528_vm2 = vcmp.gt.f32.partialorder %v527_v7, 0.5 }
  0x13   : > { %v517_v11 = vsel %vm516_vm1, 1, %v4139_v10  ;;  %v529_v12 = vsel %vm528_vm2, 1, %v4139_v10  ;;  %v4140_v16 = vmov -1e+09  }
  0x14   : > { %v498_v13 = vsub.s32 0, %v497_v8  ;;  %vm514_vm3 = vcmp.ge.s32.totalorder %v497_v8, %v513_v9  ;;  %v504_v35 = vsub.s32 1, %v497_v8 }
  0x16   : > { %473 = vadd.xlane.f32.xlu0 %v472_v4  ;;  %v521_v14 = vrot.slane %v517_v11, %v498_v13  ;;  %v533_v15 = vrot.slane %v529_v12, %v498_v13  ;;  %v499_v36 = vrot.slane %v4252_v0, %v498_v13  ;;  %v505_v38 = vrot.slane %v4252_v0, %v504_v35 }
  0x18   : > { %vm522_vm4 = vcmp.eq.s32.totalorder %v521_v14, 1  ;;  %vm534_vm6 = vcmp.eq.s32.totalorder %v533_v15, 1 }
  0x19   : > { %vm523_vm7 = vmand %vm514_vm3, %vm522_vm4 }
  0x1a   : > { %v524_v17 = vsel %vm523_vm7, 0.0, %v4140_v16  ;;  %vm535_vm8 = vmand %vm514_vm3, %vm534_vm6 }
  0x1b   : > { %526 = vst.msk [vmem:[#allocation3] sm:$0xff] %vm525_vm5, %v524_v17  ;;  %v536_v18 = vsel %vm535_vm8, 0.0, %v4140_v16 }
  0x1c   : > { %538 = vst.msk [vmem:[#allocation3 + $0x8] sm:$0xff] %vm525_vm5, %v536_v18 }
  0x9b   : > { %v471_v19 = vpop.xlane.xlu0 %470 }
  0x9c   : > { %v476_v20 = vmul.f32 0.03125, %v471_v19 }
  0x9e   : > { %v478_v21 = vsub.f32 %v466_v1, %v476_v20 }
  0x9f   : > { %v474_v22 = vpop.xlane.xlu0 %473 }
  0xa0   : > { %v477_v23 = vmul.f32 0.03125, %v474_v22  ;;  %v480_v24 = vmul.f32 %v478_v21, %v478_v21 }
  0xa2   : > { %v479_v25 = vsub.f32 %v467_v2, %v477_v23  ;;  %v482_v26 = vsel %vm468_vm0, %v480_v24, 0.0 }
  0xa3   : > { %483 = vadd.xlane.f32.xlu1 %v482_v26 }
  0xa4   : > { %v481_v27 = vmul.f32 %v479_v25, %v479_v25 }
  0xa6   : > { %v485_v28 = vsel %vm468_vm0, %v481_v27, 0.0 }
  0xa7   : > { %486 = vadd.xlane.f32.xlu1 %v485_v28 }
 0x12c   : > { %v484_v29 = vpop.xlane.xlu1 %483 }
 0x12d   : > { %v488_v30 = vmul.f32 0.03125, %v484_v29 }
 0x12f   : > { %v490_v31 = vadd.f32 1e-12, %v488_v30 }
 0x130   : > { %v487_v32 = vpop.xlane.xlu1 %486 }
 0x131   : > { %4006 = vrsqrt.f32 %v490_v31  ;;  %v489_v33 = vmul.f32 0.03125, %v487_v32 }
 0x133   : > { %v491_v34 = vadd.f32 1e-12, %v489_v33 }
 0x135   : > { %4008 = vrsqrt.f32 %v491_v34 }
 0x13e   : > { %v4007_v37 = vpop.eup %4006 }
 0x13f   : > { %v494_v39 = vmul.f32 %v4007_v37, %v478_v21 }
 0x141   : > { %v500_v40 = vmul.f32 %v499_v36, %v494_v39 }
 0x142   : > { %v4009_v41 = vpop.eup %4008 }
 0x143   : > { %v506_v42 = vadd.f32 %v505_v38, %v500_v40  ;;  %v495_v43 = vmul.f32 %v4009_v41, %v479_v25 }
 0x145   : > { %508 = vst.msk [vmem:[#allocation2] sm:$0xff] %vm468_vm0, %v506_v42  ;;  %v501_v44 = vmul.f32 %v499_v36, %v495_v43 }
 0x147   : > { %v507_v45 = vadd.f32 %v505_v38, %v501_v44 }
 0x149   : > { %509 = vst.msk [vmem:[#allocation2 + $0x8] sm:$0xff] %vm468_vm0, %v507_v45 }
 0x14a PF: > { %s4276_s30 = sshll.u32 %s4245_s19, 4  ;;  %v4141_v46 = vmov 0.0   ;;  %vm4142_vm9 = vmmov 0   ;;  %vm569_vm10 = vcmask 261120   ;;  %v553_v52 = vlaneseq  ;;  %s4884_s24 = smov 120   ;;  %v620_v13 = vld [vmem:[#allocation3] sm:$0xff] }
 0x14b   : > { %3678 = vmatprep.subr.bf16.mxu0 %v4141_v46  ;;  %s547_s20 = scalar_lea.vmem %s4860_s6, %s4276_s30  ;;  %3682 = vmatprep.mubr.msk.bf16.mxu0 %vm4142_vm9, %v4141_v46  ;;  %s4306_s23 = scalar_lea.vmem %s4859_s5, %s4276_s30  ;;  %vm625_vm11 = vcmask 64512   ;;  %vm691_vm12 = vcmask 1043456   ;;  %vm1084_vm13 = vcmask 130048   ;;  %vm1086_vm14 = vcmask 195584  }
 0x14c   : > { %v4010_v47 = vld [vmem:[%s547_s20 + $0x8] sm:$0xff]   ;;  %3698 = vmatprep.subr.bf16.mxu1 %v4141_v46  ;;  %3700 = vmatprep.mubr.msk.bf16.mxu1 %vm4142_vm9, %v4141_v46  ;;  %v4011_v48 = vld [vmem:[%s547_s20] sm:$0xff]   ;;  %v4300_v53 = vshrl.u32 %v553_v52, 7  ;;  %s4876_s25 = smov 96   ;;  %s4874_s26 = smov 80   ;;  %vm1889_vm15 = vcmask 80896  }
 0x14d   : > { %3679 = vmatpush3.bf16.msra.mxu0 %v4010_v47  ;;  %v4288_v49 = vld [vmem:[#allocation2] sm:$0xff]  ;;  %s4870_s27 = smov 88   ;;  %s4872_s28 = smov 72   ;;  %vm1908_vm0 = vcmask 1044480  }
 0x14e   : > { %3680 = vmatprep.subr.bf16.mxu0 %v4141_v46  ;;  %v555_v54 = vsub.s32 0, %v4300_v53  ;;  %v4310_v55 = vld [vmem:[%s4306_s23] sm:$0xff]  ;;  %s4882_s29 = smov 112   ;;  %s4878_s16 = smov 104  }
 0x14f   : > { %s4150_s17 = smov 56   ;;  %s4151_s20 = smov 48  }
 0x150   : > { %v4290_v50 = vld [vmem:[#allocation2 + $0x8] sm:$0xff]  ;;  %v556_v56 = vrot.slane %v4310_v55, %v555_v54  ;;  %s4152_s21 = smov 64   ;;  %s4153_s22 = smov 40  }
 0x151   : > { %v552_v51 = vpack.c.bf16 %v4290_v50, %v4288_v49  ;;  %3681 = vmatpush3.bf16.msra.mxu0 %v4011_v48  ;;  %p3556_p4 = scmp.ne.s32.totalorder %s4245_s19, 1 }
 0x152   : > { %3686 = vmatprep.subr.bf16.mxu0 %v4141_v46 }
 0x154   : > { %3683 = vmatmul.mubr.msk.bf16.vlgmr.msra.gmra.mxu0 %vm569_vm10, %v552_v51 }
 0x155   : > { %3688 = vmatprep.mubr.msk.bf16.mxu0 %vm4142_vm9, %v4141_v46 }
 0x214   : > { %v607_v57 = vpop.f32.mrf.mxu0 }
 0x215   : > { %v608_v58 = vadd.f32 %v607_v57, %v556_v56 }
 0x216   : > { %v3684_v59 = vpop.f32.mrf.mxu0 }
 0x217   : > { %v4315_v60 = vpack.c.bf16 %v608_v58, %v608_v58 }
 0x218   : > { %v610_v61 = vpop.f32.mrf.mxu0 }
 0x219   : > { %v4317_v62 = vadd.f32 %v610_v61, %v556_v56  ;;  %735 = vrot.lane.b32.xlu1 %v4315_v60, %s4884_s24  ;;  %623 = vrot.lane.b32.xlu0 %v4315_v60, %s4876_s25 }
 0x21a   : > { %v3685_v63 = vpop.f32.mrf.mxu0 }
 0x21d   : > { %849 = vrot.lane.b32.xlu1 %v4315_v60, %s4874_s26  ;;  %737 = vrot.lane.b32.xlu0 %v4315_v60, %s4870_s27 }
 0x221   : > { %961 = vrot.lane.b32.xlu1 %v4315_v60, %s4872_s28  ;;  %847 = vrot.lane.b32.xlu0 %v4315_v60, %s4882_s29 }
 0x225   : > { %959 = vrot.lane.b32.xlu0 %v4315_v60, %s4878_s16 }
 0x28b   : > { %v624_v1 = vpop.permute.xlu0 %623  ;;  %v736_v3 = vpop.permute.xlu1 %735 }
 0x28c   : > { %v630_v2 = vsel %vm625_vm11, %v624_v1, 0 }
 0x28d   : > { %3687 = vmatpush3.bf16.xpose.msra.mxu0 %v630_v2 }
 0x28e   : > { %3692 = vmatprep.subr.bf16.mxu0 %v4141_v46 }
 0x28f   : > { %v738_v4 = vpop.permute.xlu0 %737  ;;  %v850_v6 = vpop.permute.xlu1 %849 }
 0x290   : > { %v743_v5 = vsel %vm625_vm11, %v738_v4, 0  ;;  %v855_v7 = vsel %vm625_vm11, %v850_v6, 0  ;;  %v4371_v4 = vpack.c.bf16 %v4317_v62, %v4317_v62 }
 0x291   : > { %3699 = vmatpush3.bf16.xpose.msra.mxu1 %v743_v5 }
 0x292   : > { %3710 = vmatprep.subr.bf16.mxu1 %v4141_v46 }
 0x293   : > { %v962_v8 = vpop.permute.xlu1 %961  ;;  %v848_v9 = vpop.permute.xlu0 %847 }
 0x294   : > { %3689 = vmatmul.mubr.msk.bf16.vlgmr.msra.gmra.mxu0 %vm625_vm11, %v4315_v60  ;;  %v967_v10 = vsel %vm625_vm11, %v962_v8, 0 }
 0x295   : > { %3694 = vmatprep.mubr.msk.bf16.mxu0 %vm4142_vm9, %v4141_v46 }
 0x297   : > { %v960_v11 = vpop.permute.xlu0 %959 }
 0x298   : > { %3701 = vmatmul.mubr.msk.bf16.vlgmr.msra.gmra.mxu1 %vm625_vm11, %v736_v3 }
 0x299   : > { %3711 = vmatpush3.bf16.xpose.msra.mxu1 %v855_v7  ;;  %3712 = vmatprep.mubr.msk.bf16.mxu1 %vm4142_vm9, %v4141_v46 }
 0x29a   : > { %3722 = vmatprep.subr.bf16.mxu1 %v4141_v46 }
 0x2a0   : > { %3713 = vmatmul.mubr.msk.bf16.vlgmr.msra.gmra.mxu1 %vm625_vm11, %v848_v9 }
 0x2a1   : > { %3723 = vmatpush3.bf16.xpose.msra.mxu1 %v967_v10  ;;  %3724 = vmatprep.mubr.msk.bf16.mxu1 %vm4142_vm9, %v4141_v46 }
 0x2a2   : > { %3734 = vmatprep.subr.bf16.mxu1 %v4141_v46 }
 0x2a8   : > { %3725 = vmatmul.mubr.msk.bf16.vlgmr.msra.gmra.mxu1 %vm625_vm11, %v960_v11 }
 0x2a9   : > { %3738 = vmatprep.mubr.msk.bf16.mxu1 %vm4142_vm9, %v4141_v46 }
 0x354   : > { %v666_v12 = vpop.f32.mrf.mxu0 }
 0x355   : > { %v672_v14 = vmul.f32 0.35355338, %v666_v12 }
 0x356   : > { %v3690_v15 = vpop.f32.mrf.mxu0 }
 0x357   : > { %v673_v16 = vadd.f32 %v672_v14, %v620_v13 }
 0x358   : > { %v669_v17 = vpop.f32.mrf.mxu0  ;;  %v779_v18 = vpop.f32.mrf.mxu1 }
 0x359   : > { %v785_v19 = vmul.f32 0.35355338, %v779_v18  ;;  %v674_v20 = vsel %vm625_vm11, %v673_v16, -inf }
 0x35a   : > { %675 = vmax.xlane.f32.xlu1 %v674_v20  ;;  %v3691_v21 = vpop.f32.mrf.mxu0  ;;  %v3702_v22 = vpop.f32.mrf.mxu1 }
 0x35b   : > { %v786_v23 = vadd.f32 %v785_v19, %v620_v13 }
 0x35c   : > { %v782_v24 = vpop.f32.mrf.mxu1 }
 0x35d   : > { %v787_v25 = vsel %vm625_vm11, %v786_v23, -inf }
 0x35e   : > { %788 = vmax.xlane.f32.xlu0 %v787_v25  ;;  %v3703_v26 = vpop.f32.mrf.mxu1 }
 0x360   : > { %v891_v27 = vpop.f32.mrf.mxu1 }
 0x361   : > { %v897_v28 = vmul.f32 0.35355338, %v891_v27 }
 0x362   : > { %v3714_v29 = vpop.f32.mrf.mxu1 }
 0x363   : > { %v898_v30 = vadd.f32 %v897_v28, %v620_v13 }
 0x364   : > { %v894_v31 = vpop.f32.mrf.mxu1 }
 0x365   : > { %v899_v32 = vsel %vm625_vm11, %v898_v30, -inf }
 0x366   : > { %900 = vmax.xlane.f32.xlu0 %v899_v32  ;;  %v3715_v33 = vpop.f32.mrf.mxu1 }
 0x368   : > { %v1003_v34 = vpop.f32.mrf.mxu1 }
 0x369   : > { %v1009_v35 = vmul.f32 0.35355338, %v1003_v34 }
 0x36a   : > { %v3726_v36 = vpop.f32.mrf.mxu1 }
 0x36b   : > { %v1010_v37 = vadd.f32 %v1009_v35, %v620_v13 }
 0x36c   : > { %v1006_v38 = vpop.f32.mrf.mxu1 }
 0x36d   : > { %v1011_v39 = vsel %vm625_vm11, %v1010_v37, -inf }
 0x36e   : > { %1012 = vmax.xlane.f32.xlu1 %v1011_v39  ;;  %v3727_v40 = vpop.f32.mrf.mxu1 }
 0x3e3   : > { %v676_v41 = vpop.xlane.xlu1 %675 }
 0x3e4   : > { %v677_v42 = vsub.f32 %v673_v16, %v676_v41 }
 0x3e6   : > { %v678_v43 = vmul.f32 1.442695, %v677_v42 }
 0x3e7   : > { %v789_v44 = vpop.xlane.xlu0 %788 }
 0x3e8   : > { %4030 = vpow2.f32 %v678_v43  ;;  %v790_v45 = vsub.f32 %v786_v23, %v789_v44 }
 0x3ea   : > { %v791_v47 = vmul.f32 1.442695, %v790_v45 }
 0x3ec   : > { %4032 = vpow2.f32 %v791_v47 }
 0x3ef   : > { %v901_v48 = vpop.xlane.xlu0 %900 }
 0x3f0   : > { %v902_v51 = vsub.f32 %v898_v30, %v901_v48 }
 0x3f2   : > { %v903_v56 = vmul.f32 1.442695, %v902_v51 }
 0x3f4   : > { %4034 = vpow2.f32 %v903_v56 }
 0x3f5   : > { %v4031_v57 = vpop.eup %4030 }
 0x3f6   : > { %v680_v58 = vsel %vm625_vm11, %v4031_v57, 0.0 }
 0x3f7   : > { %681 = vadd.xlane.f32.xlu0 %v680_v58  ;;  %v1013_v2 = vpop.xlane.xlu1 %1012 }
 0x3f8   : > { %v1014_v3 = vsub.f32 %v1010_v37, %v1013_v2 }
 0x3f9   : > { %v4033_v59 = vpop.eup %4032 }
 0x3fa   : > { %v793_v61 = vsel %vm625_vm11, %v4033_v59, 0.0  ;;  %v1015_v5 = vmul.f32 1.442695, %v1014_v3 }
 0x3fb   : > { %794 = vadd.xlane.f32.xlu1 %v793_v61 }
 0x3fc   : > { %4036 = vpow2.f32 %v1015_v5  ;;  %v1149_v5 = vld [vmem:[#allocation3 + $0x8] sm:$0xff] }
 0x401   : > { %v4035_v63 = vpop.eup %4034 }
 0x402   : > { %v905_v1 = vsel %vm625_vm11, %v4035_v63, 0.0 }
 0x403   : > { %906 = vadd.xlane.f32.xlu0 %v905_v1 }
 0x409   : > { %v4037_v6 = vpop.eup %4036 }
 0x40a   : > { %v1017_v7 = vsel %vm625_vm11, %v4037_v6, 0.0 }
 0x40c   : > { %799 = vrot.lane.b32.xlu1 %v4315_v60, %s4150_s17 }
 0x410   : > { %911 = vrot.lane.b32.xlu1 %v4315_v60, %s4151_s20 }
 0x419   : > { %686 = vrot.lane.b32.xlu0 %v4315_v60, %s4152_s21 }
 0x41d   : > { %1023 = vrot.lane.b32.xlu0 %v4315_v60, %s4153_s22 }
 0x421   : > { %1264 = vrot.lane.b32.xlu0 %v4371_v4, %s4870_s27  ;;  %s4154_s27 = smov 16  }
 0x425   : > { %1376 = vrot.lane.b32.xlu0 %v4371_v4, %s4874_s26  ;;  %s4156_s26 = smov 8  }
 0x429   : > { %1488 = vrot.lane.b32.xlu0 %v4371_v4, %s4872_s28  ;;  %s4892_s28 = smov 120  }
 0x434   : > { %1018 = vadd.xlane.f32.xlu1 %v1017_v7 }
 0x445   : > { %1152 = vrot.lane.b32.xlu1 %v4371_v4, %s4876_s25  ;;  %s615_s25 = scalar_lea.vmem %s4861_s7, %s4276_s30 }
 0x449   : > { %1262 = vrot.lane.b32.xlu1 %v4371_v4, %s4884_s24 }
 0x44d   : > { %1374 = vrot.lane.b32.xlu1 %v4371_v4, %s4882_s29 }
 0x451   : > { %1486 = vrot.lane.b32.xlu1 %v4371_v4, %s4878_s16  ;;  %s4880_s16 = smov 24  }
 0x480   : > { %v682_v60 = vpop.xlane.xlu0 %681 }
 0x481   : > { %4038 = vrcp.f32 %v682_v60 }
 0x484   : > { %v795_v62 = vpop.xlane.xlu1 %794 }
 0x485   : > { %4040 = vrcp.f32 %v795_v62 }
 0x488   : > { %v800_v13 = vpop.permute.xlu1 %799 }
 0x489   : > { %v805_v16 = vsel %vm691_vm12, %v800_v13, 0 }
 0x48c   : > { %v907_v8 = vpop.xlane.xlu0 %906  ;;  %v912_v18 = vpop.permute.xlu1 %911 }
 0x48d   : > { %4042 = vrcp.f32 %v907_v8  ;;  %v917_v21 = vsel %vm691_vm12, %v912_v18, 0 }
 0x48e   : > { %v4039_v9 = vpop.eup %4038 }
 0x48f   : > { %v684_v10 = vmul.f32 %v4039_v9, %v4031_v57 }
 0x490   : > { %v687_v11 = vpop.permute.xlu0 %686 }
 0x491   : > { %v693_v12 = vsel %vm691_vm12, %v687_v11, 0  ;;  %v685_v14 = vpack.c.bf16 %v684_v10, %v684_v10 }
 0x492   : > { %3693 = vmatpush3.bf16.msra.mxu0 %v693_v12  ;;  %v4041_v15 = vpop.eup %4040 }
 0x493   : > { %3704 = vmatprep.subr.bf16.mxu0 %v4141_v46  ;;  %v797_v17 = vmul.f32 %v4041_v15, %v4033_v59 }
 0x494   : > { %v1024_v23 = vpop.permute.xlu0 %1023 }
 0x495   : > { %3695 = vmatmul.mubr.msk.bf16.vlgmr.msra.gmra.mxu0 %vm625_vm11, %v685_v14  ;;  %v798_v19 = vpack.c.bf16 %v797_v17, %v797_v17  ;;  %v1029_v25 = vsel %vm691_vm12, %v1024_v23, 0 }
 0x496   : > { %3705 = vmatpush3.bf16.msra.mxu0 %v805_v16  ;;  %3706 = vmatprep.mubr.msk.bf16.mxu0 %vm4142_vm9, %v4141_v46 }
 0x497   : > { %3716 = vmatprep.subr.bf16.mxu0 %v4141_v46 }
 0x498   : > { %v1265_v32 = vpop.permute.xlu0 %1264 }
 0x499   : > { %v1270_v33 = vsel %vm625_vm11, %v1265_v32, 0 }
 0x49a   : > { %v4043_v20 = vpop.eup %4042 }
 0x49b   : > { %v909_v22 = vmul.f32 %v4043_v20, %v4035_v63 }
 0x49c   : > { %v1377_v34 = vpop.permute.xlu0 %1376 }
 0x49d   : > { %3707 = vmatmul.mubr.msk.bf16.vlgmr.msra.gmra.mxu0 %vm625_vm11, %v798_v19  ;;  %v910_v24 = vpack.c.bf16 %v909_v22, %v909_v22  ;;  %v1382_v36 = vsel %vm625_vm11, %v1377_v34, 0 }
 0x49e   : > { %3717 = vmatpush3.bf16.msra.mxu0 %v917_v21  ;;  %3718 = vmatprep.mubr.msk.bf16.mxu0 %vm4142_vm9, %v4141_v46 }
 0x49f   : > { %3728 = vmatprep.subr.bf16.mxu0 %v4141_v46 }
 0x4a0   : > { %v1489_v37 = vpop.permute.xlu0 %1488 }
 0x4a1   : > { %v1494_v39 = vsel %vm625_vm11, %v1489_v37, 0 }
 0x4a5   : > { %3719 = vmatmul.mubr.msk.bf16.vlgmr.msra.gmra.mxu0 %vm625_vm11, %v910_v24 }
 0x4a6   : > { %3729 = vmatpush3.bf16.msra.mxu0 %v1029_v25  ;;  %3730 = vmatprep.mubr.msk.bf16.mxu0 %vm4142_vm9, %v4141_v46 }
 0x4a7   : > { %3742 = vmatprep.subr.bf16.mxu0 %v4141_v46 }
 0x4bd   : > { %v1019_v26 = vpop.xlane.xlu1 %1018 }
 0x4be   : > { %4044 = vrcp.f32 %v1019_v26 }
 0x4c1   : > { %v1153_v29 = vpop.permute.xlu1 %1152 }
 0x4c2   : > { %v1158_v31 = vsel %vm625_vm11, %v1153_v29, 0 }
 0x4c5   : > { %v1263_v35 = vpop.permute.xlu1 %1262 }
 0x4c9   : > { %v1375_v38 = vpop.permute.xlu1 %1374 }
 0x4cb   : > { %v4045_v27 = vpop.eup %4044 }
 0x4cc   : > { %v1021_v28 = vmul.f32 %v4045_v27, %v4037_v6 }
 0x4cd   : > { %v1487_v40 = vpop.permute.xlu1 %1486 }
 0x4ce   : > { %v1022_v30 = vpack.c.bf16 %v1021_v28, %v1021_v28 }
 0x4d0   : > { %3731 = vmatmul.mubr.msk.bf16.vlgmr.msra.gmra.mxu0 %vm625_vm11, %v1022_v30 }
 0x4d1   : > { %3743 = vmatpush3.bf16.xpose.msra.mxu0 %v1158_v31  ;;  %3744 = vmatprep.mubr.msk.bf16.mxu0 %vm4142_vm9, %v4141_v46 }
 0x4d2   : > { %3754 = vmatprep.subr.bf16.mxu0 %v4141_v46 }
 0x4d8   : > { %3745 = vmatmul.mubr.msk.bf16.vlgmr.msra.gmra.mxu0 %vm625_vm11, %v4371_v4 }
 0x4d9   : > { %3755 = vmatpush3.bf16.xpose.msra.mxu0 %v1270_v33  ;;  %3756 = vmatprep.mubr.msk.bf16.mxu0 %vm4142_vm9, %v4141_v46 }
 0x4da   : > { %3766 = vmatprep.subr.bf16.mxu0 %v4141_v46 }
 0x4e0   : > { %3757 = vmatmul.mubr.msk.bf16.vlgmr.msra.gmra.mxu0 %vm625_vm11, %v1263_v35 }
 0x4e1   : > { %3767 = vmatpush3.bf16.xpose.msra.mxu0 %v1382_v36  ;;  %3768 = vmatprep.mubr.msk.bf16.mxu0 %vm4142_vm9, %v4141_v46 }
 0x4e2   : > { %3778 = vmatprep.subr.bf16.mxu0 %v4141_v46 }
 0x4e8   : > { %3769 = vmatmul.mubr.msk.bf16.vlgmr.msra.gmra.mxu0 %vm625_vm11, %v1375_v38 }
 0x4e9   : > { %3779 = vmatpush3.bf16.xpose.msra.mxu0 %v1494_v39  ;;  %3780 = vmatprep.mubr.msk.bf16.mxu0 %vm4142_vm9, %v4141_v46 }
 0x4ea   : > { %3790 = vmatprep.subr.bf16.mxu0 %v4141_v46 }
 0x4f0   : > { %3781 = vmatmul.mubr.msk.bf16.vlgmr.msra.gmra.mxu0 %vm625_vm11, %v1487_v40 }
 0x4f1   : > { %3794 = vmatprep.mubr.msk.bf16.mxu0 %vm4142_vm9, %v4141_v46 }
 0x555   : > { %v4429_v41 = vpop.f32.mrf.mxu0 }
 0x557   : > { %v3696_v42 = vpop.f32.mrf.mxu0 }
 0x558   : > { %v4012_v42 = vld [vmem:[%s615_s25 + $0x8] sm:$0xff]  }
 0x559   : > { %v732_v43 = vpop.f32.mrf.mxu0  ;;  %3735 = vmatpush3.bf16.msra.mxu1 %v4012_v42  ;;  %3791 = vmatpush3.bf16.msra.mxu0 %v4012_v42 }
 0x55a   : > { %3736 = vmatprep.subr.bf16.mxu1 %v4141_v46  ;;  %v4013_v43 = vld [vmem:[%s615_s25] sm:$0xff]   ;;  %3792 = vmatprep.subr.bf16.mxu0 %v4141_v46  ;;  %s4890_s25 = smov 88  }
 0x55b   : > { %v3697_v44 = vpop.f32.mrf.mxu0 }
 0x55d   : > { %v4431_v45 = vpop.f32.mrf.mxu0  ;;  %3737 = vmatpush3.bf16.msra.mxu1 %v4013_v43  ;;  %3793 = vmatpush3.bf16.msra.mxu0 %v4013_v43 }
 0x55e   : > { %3748 = vmatprep.subr.bf16.mxu1 %v4141_v46  ;;  %3806 = vmatprep.subr.bf16.mxu0 %v4141_v46 }
 0x55f   : > { %v3708_v47 = vpop.f32.mrf.mxu0 }
 0x561   : > { %v844_v48 = vpop.f32.mrf.mxu0 }
 0x563   : > { %v3709_v51 = vpop.f32.mrf.mxu0 }
 0x565   : > { %v953_v56 = vpop.f32.mrf.mxu0 }
 0x567   : > { %v3720_v57 = vpop.f32.mrf.mxu0 }
 0x569   : > { %v956_v58 = vpop.f32.mrf.mxu0 }
 0x56b   : > { %v3721_v59 = vpop.f32.mrf.mxu0 }
 0x590   : > { %v1065_v61 = vpop.f32.mrf.mxu0 }
 0x592   : > { %v3732_v63 = vpop.f32.mrf.mxu0 }
 0x594   : > { %v1068_v1 = vpop.f32.mrf.mxu0 }
 0x596   : > { %v3733_v2 = vpop.f32.mrf.mxu0 }
 0x598   : > { %v1194_v3 = vpop.f32.mrf.mxu0 }
 0x599   : > { %v1200_v6 = vmul.f32 0.35355338, %v1194_v3 }
 0x59a   : > { %v3746_v7 = vpop.f32.mrf.mxu0 }
 0x59b   : > { %v1201_v60 = vadd.f32 %v1200_v6, %v1149_v5 }
 0x59c   : > { %v1197_v62 = vpop.f32.mrf.mxu0 }
 0x59d   : > { %v1202_v8 = vsel %vm625_vm11, %v1201_v60, -inf }
 0x59e   : > { %1203 = vmax.xlane.f32.xlu0 %v1202_v8  ;;  %v3747_v9 = vpop.f32.mrf.mxu0 }
 0x5a0   : > { %v1306_v10 = vpop.f32.mrf.mxu0 }
 0x5a1   : > { %v1312_v11 = vmul.f32 0.35355338, %v1306_v10 }
 0x5a2   : > { %v3758_v12 = vpop.f32.mrf.mxu0 }
 0x5a3   : > { %v1313_v13 = vadd.f32 %v1312_v11, %v1149_v5 }
 0x5a4   : > { %v1309_v14 = vpop.f32.mrf.mxu0 }
 0x5a5   : > { %v1314_v15 = vsel %vm625_vm11, %v1313_v13, -inf }
 0x5a6   : > { %1315 = vmax.xlane.f32.xlu1 %v1314_v15  ;;  %v3759_v16 = vpop.f32.mrf.mxu0 }
 0x5a8   : > { %v1418_v17 = vpop.f32.mrf.mxu0 }
 0x5a9   : > { %v1424_v18 = vmul.f32 0.35355338, %v1418_v17 }
 0x5aa   : > { %v3770_v19 = vpop.f32.mrf.mxu0 }
 0x5ab   : > { %v1425_v20 = vadd.f32 %v1424_v18, %v1149_v5 }
 0x5ac   : > { %v1421_v21 = vpop.f32.mrf.mxu0 }
 0x5ad   : > { %v1426_v22 = vsel %vm625_vm11, %v1425_v20, -inf }
 0x5ae   : > { %1427 = vmax.xlane.f32.xlu0 %v1426_v22  ;;  %v3771_v23 = vpop.f32.mrf.mxu0 }
 0x5b0   : > { %v1530_v24 = vpop.f32.mrf.mxu0 }
 0x5b1   : > { %v1536_v25 = vmul.f32 0.35355338, %v1530_v24 }
 0x5b2   : > { %v3782_v26 = vpop.f32.mrf.mxu0 }
 0x5b3   : > { %v1537_v27 = vadd.f32 %v1536_v25, %v1149_v5 }
 0x5b4   : > { %v1533_v28 = vpop.f32.mrf.mxu0 }
 0x5b5   : > { %v1538_v29 = vsel %vm625_vm11, %v1537_v27, -inf }
 0x5b6   : > { %1539 = vmax.xlane.f32.xlu0 %v1538_v29  ;;  %v3783_v30 = vpop.f32.mrf.mxu0 }
 0x627   : > { %v1204_v31 = vpop.xlane.xlu0 %1203 }
 0x628   : > { %v1205_v32 = vsub.f32 %v1201_v60, %v1204_v31 }
 0x62a   : > { %v1206_v33 = vmul.f32 1.442695, %v1205_v32 }
 0x62c   : > { %4046 = vpow2.f32 %v1206_v33 }
 0x62f   : > { %v1316_v34 = vpop.xlane.xlu1 %1315 }
 0x630   : > { %v1317_v35 = vsub.f32 %v1313_v13, %v1316_v34 }
 0x632   : > { %v1318_v36 = vmul.f32 1.442695, %v1317_v35 }
 0x634   : > { %4048 = vpow2.f32 %v1318_v36 }
 0x637   : > { %v1428_v44 = vpop.xlane.xlu0 %1427 }
 0x638   : > { %v1429_v47 = vsub.f32 %v1425_v20, %v1428_v44 }
 0x639   : > { %v4047_v37 = vpop.eup %4046 }
 0x63a   : > { %v1208_v38 = vsel %vm625_vm11, %v4047_v37, 0.0  ;;  %v1430_v51 = vmul.f32 1.442695, %v1429_v47 }
 0x63b   : > { %1209 = vadd.xlane.f32.xlu1 %v1208_v38 }
 0x63c   : > { %4050 = vpow2.f32 %v1430_v51 }
 0x63f   : > { %v1540_v48 = vpop.xlane.xlu0 %1539 }
 0x641   : > { %v4438_v39 = vpop.eup %4048 }
 0x642   : > { %v1320_v40 = vsel %vm625_vm11, %v4438_v39, 0.0 }
 0x643   : > { %1321 = vadd.xlane.f32.xlu0 %v1320_v40 }
 0x649   : > { %v4051_v58 = vpop.eup %4050 }
 0x64a   : > { %v1432_v59 = vsel %vm625_vm11, %v4051_v58, 0.0 }
 0x64c   : > { %1076 = vrot.lane.b32.xlu1 %v953_v56, %s4154_s27  ;;  %v1541_v56 = vsub.f32 %v1537_v27, %v1540_v48 }
 0x64e   : > { %v1542_v57 = vmul.f32 1.442695, %v1541_v56 }
 0x650   : > { %1080 = vrot.lane.b32.xlu1 %v1065_v61, %s4880_s16  ;;  %4052 = vpow2.f32 %v1542_v57  ;;  %v1091_v57 = vsub.s32 1, %v4300_v53 }
 0x659   : > { %1072 = vrot.lane.b32.xlu0 %v4431_v45, %s4156_s26 }
 0x65d   : > { %v4053_v61 = vpop.eup %4052 }
 0x65e   : > { %v1544_v63 = vsel %vm625_vm11, %v4053_v61, 0.0 }
 0x674   : > { %1433 = vadd.xlane.f32.xlu1 %v1432_v59 }
 0x678   : > { %1545 = vadd.xlane.f32.xlu0 %v1544_v63 }
 0x685   : > { %1214 = vrot.lane.b32.xlu1 %v4371_v4, %s4152_s21  ;;  %s4888_s21 = smov 80  }
 0x689   : > { %1326 = vrot.lane.b32.xlu1 %v4371_v4, %s4150_s17  ;;  %s1766_s17 = scalar_lea.vmem %s4863_s9, %s4276_s30 }
 0x68d   : > { %1438 = vrot.lane.b32.xlu1 %v4371_v4, %s4151_s20  ;;  %s4887_s20 = smov 96  }
 0x691   : > { %1550 = vrot.lane.b32.xlu1 %v4371_v4, %s4153_s22  ;;  %s4889_s22 = smov 72  }
 0x6c4   : > { %v1210_v45 = vpop.xlane.xlu1 %1209 }
 0x6c5   : > { %4054 = vrcp.f32 %v1210_v45 }
 0x6c8   : > { %v1077_v1 = vpop.permute.xlu1 %1076 }
 0x6cc   : > { %v1322_v2 = vpop.xlane.xlu0 %1321  ;;  %v1081_v6 = vpop.permute.xlu1 %1080 }
 0x6cd   : > { %4056 = vrcp.f32 %v1322_v2 }
 0x6d0   : > { %v1073_v3 = vpop.permute.xlu0 %1072 }
 0x6d1   : > { %v1083_v5 = vsel %vm625_vm11, %v4429_v41, %v1073_v3 }
 0x6d2   : > { %v1085_v7 = vsel %vm1084_vm13, %v1083_v5, %v1077_v1  ;;  %v4055_v4 = vpop.eup %4054 }
 0x6d3   : > { %v1087_v60 = vsel %vm1086_vm14, %v1085_v7, %v1081_v6  ;;  %v1212_v9 = vmul.f32 %v4055_v4, %v4047_v37 }
 0x6d4   : > { %v1088_v62 = vpack.c.bf16 %v1087_v60, %v1087_v60 }
 0x6d5   : > { %v1213_v11 = vpack.c.bf16 %v1212_v9, %v1212_v9 }
 0x6d6   : > { %3739 = vmatmul.mubr.msk.bf16.vlgmr.msra.gmra.mxu1 %vm569_vm10, %v1088_v62 }
 0x6d7   : > { %3750 = vmatprep.mubr.msk.bf16.mxu1 %vm4142_vm9, %v4141_v46 }
 0x6da   : > { %v4057_v12 = vpop.eup %4056 }
 0x6db   : > { %v1324_v16 = vmul.f32 %v4057_v12, %v4438_v39 }
 0x6dd   : > { %v1325_v18 = vpack.c.bf16 %v1324_v16, %v1324_v16 }
 0x6fd   : > { %v1434_v8 = vpop.xlane.xlu1 %1433 }
 0x6fe   : > { %4058 = vrcp.f32 %v1434_v8 }
 0x701   : > { %v1215_v10 = vpop.permute.xlu1 %1214  ;;  %v1546_v13 = vpop.xlane.xlu0 %1545 }
 0x702   : > { %v1220_v41 = vsel %vm691_vm12, %v1215_v10, 0  ;;  %4060 = vrcp.f32 %v1546_v13 }
 0x703   : > { %3749 = vmatpush3.bf16.msra.mxu1 %v1220_v41 }
 0x704   : > { %3760 = vmatprep.subr.bf16.mxu1 %v4141_v46 }
 0x705   : > { %v1327_v14 = vpop.permute.xlu1 %1326 }
 0x706   : > { %v1332_v15 = vsel %vm691_vm12, %v1327_v14, 0  ;;  %3751 = vmatmul.mubr.msk.bf16.vlgmr.msra.gmra.mxu1 %vm625_vm11, %v1213_v11 }
 0x707   : > { %3761 = vmatpush3.bf16.msra.mxu1 %v1332_v15  ;;  %3762 = vmatprep.mubr.msk.bf16.mxu1 %vm4142_vm9, %v4141_v46  ;;  %v4514_v15 = vld [vmem:[%s1766_s17 + $0x8] sm:$0xff]  }
 0x708   : > { %3772 = vmatprep.subr.bf16.mxu1 %v4141_v46 }
 0x709   : > { %v1439_v17 = vpop.permute.xlu1 %1438 }
 0x70a   : > { %v1444_v20 = vsel %vm691_vm12, %v1439_v17, 0 }
 0x70b   : > { %v4059_v19 = vpop.eup %4058 }
 0x70c   : > { %v1436_v21 = vmul.f32 %v4059_v19, %v4051_v58  ;;  %v1092_v58 = vrot.slane %v4310_v55, %v1091_v57 }
 0x70d   : > { %v1551_v22 = vpop.permute.xlu1 %1550 }
 0x70e   : > { %3763 = vmatmul.mubr.msk.bf16.vlgmr.msra.gmra.mxu1 %vm625_vm11, %v1325_v18  ;;  %v1437_v23 = vpack.c.bf16 %v1436_v21, %v1436_v21  ;;  %v1556_v25 = vsel %vm691_vm12, %v1551_v22, 0  ;;  %v1777_v21 = vld [vmem:[%s4856_s2] sm:$0xff]  ;;  %v1778_v22 = vld [vmem:[%s4856_s2 + $0x8] sm:$0x3] }
 0x70f   : > { %3773 = vmatpush3.bf16.msra.mxu1 %v1444_v20  ;;  %3774 = vmatprep.mubr.msk.bf16.mxu1 %vm4142_vm9, %v4141_v46  ;;  %v4061_v24 = vpop.eup %4060  ;;  %v4519_v20 = vld [vmem:[%s1766_s17] sm:$0xff]   ;;  %s4893_s17 = smov 112  }
 0x710   : > { %3784 = vmatprep.subr.bf16.mxu1 %v4141_v46  ;;  %v1548_v26 = vmul.f32 %v4061_v24, %v4053_v61 }
 0x712   : > { %v1549_v27 = vpack.c.bf16 %v1548_v26, %v1548_v26 }
 0x716   : > { %3775 = vmatmul.mubr.msk.bf16.vlgmr.msra.gmra.mxu1 %vm625_vm11, %v1437_v23  ;;  %v1779_v23 = vpack.c.bf16 %v1778_v22, %v1777_v21 }
 0x717   : > { %3785 = vmatpush3.bf16.msra.mxu1 %v1556_v25  ;;  %3786 = vmatprep.mubr.msk.bf16.mxu1 %vm4142_vm9, %v4141_v46 }
 0x718   : > { %3798 = vmatprep.subr.bf16.mxu1 %v4141_v46 }
 0x71e   : > { %3787 = vmatmul.mubr.msk.bf16.vlgmr.msra.gmra.mxu1 %vm625_vm11, %v1549_v27 }
 0x71f   : > { %3802 = vmatprep.mubr.msk.bf16.mxu1 %vm4142_vm9, %v4141_v46 }
 0x796   : > { %v1142_v28 = vpop.f32.mrf.mxu1 }
 0x797   : > { %v1143_v59 = vadd.f32 %v1142_v28, %v1092_v58 }
 0x798   : > { %v3740_v29 = vpop.f32.mrf.mxu1 }
 0x799   : > { %v1657_v61 = vadd.f32 %v1143_v59, %v4288_v49 }
 0x79a   : > { %v1145_v30 = vpop.f32.mrf.mxu1 }
 0x79b   : > { %v1659_v63 = vsel %vm569_vm10, %v1657_v61, 0.0 }
 0x79c   : > { %v3741_v31 = vpop.f32.mrf.mxu1 }
 0x7c6   : > { %v1256_v32 = vpop.f32.mrf.mxu1 }
 0x7c8   : > { %v3752_v33 = vpop.f32.mrf.mxu1 }
 0x7ca   : > { %v1259_v34 = vpop.f32.mrf.mxu1 }
 0x7cc   : > { %v3753_v35 = vpop.f32.mrf.mxu1 }
 0x7ce   : > { %v1368_v36 = vpop.f32.mrf.mxu1 }
 0x7cf   : > { %1599 = vrot.lane.b32.xlu1 %v1368_v36, %s4156_s26  ;;  %v4544_v36 = vsub.s32 3, %v4300_v53 }
 0x7d0   : > { %v3764_v37 = vpop.f32.mrf.mxu1 }
 0x7d2   : > { %v1371_v38 = vpop.f32.mrf.mxu1 }
 0x7d4   : > { %v3765_v39 = vpop.f32.mrf.mxu1 }
 0x7d6   : > { %v1480_v40 = vpop.f32.mrf.mxu1 }
 0x7d7   : > { %1603 = vrot.lane.b32.xlu1 %v1480_v40, %s4154_s27  ;;  %v1695_v40 = vrot.slane %v4310_v55, %v4544_v36 }
 0x7d8   : > { %v3776_v42 = vpop.f32.mrf.mxu1 }
 0x7da   : > { %v1483_v43 = vpop.f32.mrf.mxu1 }
 0x7dc   : > { %v3777_v44 = vpop.f32.mrf.mxu1 }
 0x7de   : > { %v1592_v47 = vpop.f32.mrf.mxu1 }
 0x7df   : > { %1607 = vrot.lane.b32.xlu1 %v1592_v47, %s4880_s16  ;;  %s1699_s16 = scalar_lea.vmem %s4862_s8, %s4276_s30 }
 0x7e0   : > { %v3788_v48 = vpop.f32.mrf.mxu1  ;;  %v4016_v24 = vld [vmem:[%s1699_s16 + $0x8] sm:$0xff]   ;;  %v4017_v25 = vld [vmem:[%s1699_s16] sm:$0xff]   ;;  %s4886_s16 = smov 104  }
 0x7e1   : > { %3799 = vmatpush3.bf16.msra.mxu1 %v4016_v24  ;;  %v1782_v48 = vsub.s32 5, %v4300_v53 }
 0x7e2   : > { %v1595_v51 = vpop.f32.mrf.mxu1  ;;  %3800 = vmatprep.subr.bf16.mxu1 %v4141_v46 }
 0x7e3   : > { %v4561_v51 = vrot.slane %v4310_v55, %v1782_v48 }
 0x7e4   : > { %v3789_v56 = vpop.f32.mrf.mxu1 }
 0x7e5   : > { %3801 = vmatpush3.bf16.msra.mxu1 %v4017_v25 }
 0x7e6   : > { %3814 = vmatprep.subr.bf16.mxu1 %v4141_v46 }
 0x803   : > { %1660 = vadd.xlane.f32.xlu1 %v1659_v63 }
 0x841   : > { %v1600_v45 = vpop.permute.xlu1 %1599 }
 0x842   : > { %v1610_v2 = vsel %vm625_vm11, %v1256_v32, %v1600_v45  ;;  %v4539_v32 = vsub.s32 2, %v4300_v53 }
 0x844   : > { %v1689_v35 = vrot.slane %v4310_v55, %v4539_v32 }
 0x849   : > { %v1604_v1 = vpop.permute.xlu1 %1603 }
 0x84a   : > { %v1611_v3 = vsel %vm1084_vm13, %v1610_v2, %v1604_v1 }
 0x851   : > { %v1608_v5 = vpop.permute.xlu1 %1607 }
 0x852   : > { %v1612_v6 = vsel %vm1086_vm14, %v1611_v3, %v1608_v5  ;;  %v4575_v3 = vsub.s32 4, %v4300_v53 }
 0x853   : > { %v1613_v7 = vpack.c.bf16 %v1612_v6, %v1612_v6 }
 0x854   : > { %v1708_v5 = vrot.slane %v4310_v55, %v4575_v3 }
 0x855   : > { %3795 = vmatmul.mubr.msk.bf16.vlgmr.msra.gmra.mxu0 %vm569_vm10, %v1613_v7 }
 0x856   : > { %3810 = vmatprep.mubr.msk.bf16.mxu0 %vm4142_vm9, %v4141_v46  ;;  %3807 = vmatpush3.bf16.msra.mxu0 %v4514_v15 }
 0x857   : > { %3808 = vmatprep.subr.bf16.mxu0 %v4141_v46 }
 0x85a   : > { %3809 = vmatpush3.bf16.msra.mxu0 %v4519_v20 }
 0x85b   : > { %3820 = vmatprep.subr.bf16.mxu0 %v4141_v46 }
 0x85d   : > { %3811 = vmatmul.mubr.msk.bf16.vlgmr.msra.gmra.mxu0 %vm569_vm10, %v1779_v23 }
 0x85e   : > { %3822 = vmatprep.mubr.msk.bf16.mxu0 %vm4142_vm9, %v4141_v46 }
 0x88c   : > { %v1661_v49 = vpop.xlane.xlu1 %1660 }
 0x88d   : > { %v1666_v60 = vmul.f32 0.03125, %v1661_v49 }
 0x88f   : > { %v1668_v4 = vsub.f32 %v1657_v61, %v1666_v60 }
 0x891   : > { %v1670_v12 = vmul.f32 %v1668_v4, %v1668_v4 }
 0x893   : > { %v1672_v14 = vsel %vm569_vm10, %v1670_v12, 0.0 }
 0x915   : > { %v1651_v62 = vpop.f32.mrf.mxu0 }
 0x916   : > { %v1652_v8 = vadd.f32 %v1651_v62, %v1092_v58 }
 0x917   : > { %v3796_v9 = vpop.f32.mrf.mxu0 }
 0x918   : > { %v1658_v10 = vadd.f32 %v1652_v8, %v4290_v50 }
 0x919   : > { %v1654_v41 = vpop.f32.mrf.mxu0 }
 0x91a   : > { %v1662_v11 = vsel %vm569_vm10, %v1658_v10, 0.0 }
 0x91b   : > { %1663 = vadd.xlane.f32.xlu0 %v1662_v11  ;;  %v3797_v13 = vpop.f32.mrf.mxu0 }
 0x91d   : > { %v1833_v56 = vpop.f32.mrf.mxu0 }
 0x91e   : > { %v1834_v59 = vadd.f32 %v1833_v56, %v4561_v51 }
 0x91f   : > { %1673 = vadd.xlane.f32.xlu0 %v1672_v14  ;;  %v3812_v58 = vpop.f32.mrf.mxu0 }
 0x921   : > { %v1836_v61 = vpop.f32.mrf.mxu0 }
 0x922   : > { %v1837_v63 = vadd.f32 %v1836_v61, %v4561_v51 }
 0x923   : > { %v3813_v45 = vpop.f32.mrf.mxu0 }
 0x924   : > { %v4565_v1 = vpack.c.bf16 %v1837_v63, %v1834_v59 }
 0x926   : > { %v1846_v2 = vsel %vm625_vm11, %v4565_v1, 0 }
 0x9a4   : > { %v1664_v50 = vpop.xlane.xlu0 %1663 }
 0x9a5   : > { %v1667_v16 = vmul.f32 0.03125, %v1664_v50 }
 0x9a7   : > { %v1669_v17 = vsub.f32 %v1658_v10, %v1667_v16 }
 0x9a8   : > { %v1674_v26 = vpop.xlane.xlu0 %1673 }
 0x9a9   : > { %v1671_v18 = vmul.f32 %v1669_v17, %v1669_v17  ;;  %v1678_v27 = vmul.f32 0.03125, %v1674_v26 }
 0x9ab   : > { %v1675_v19 = vsel %vm569_vm10, %v1671_v18, 0.0  ;;  %v1680_v28 = vadd.f32 1e-12, %v1678_v27 }
 0x9ac   : > { %1676 = vadd.xlane.f32.xlu0 %v1675_v19 }
 0x9ad   : > { %4062 = vrsqrt.f32 %v1680_v28 }
 0x9ba   : > { %v4063_v33 = vpop.eup %4062 }
 0x9bb   : > { %v1684_v34 = vmul.f32 %v4063_v33, %v1668_v4 }
 0x9bd   : > { %v1690_v39 = vmul.f32 %v1689_v35, %v1684_v34 }
 0x9bf   : > { %v4548_v43 = vadd.f32 %v1695_v40, %v1690_v39 }
 0x9c2   : > { %1955 = vrot.lane.b32.xlu0 %v4565_v1, %s4884_s24 }
 0x9c6   : > { %2066 = vrot.lane.b32.xlu0 %v4565_v1, %s4882_s29 }
 0xa35   : > { %v1677_v29 = vpop.xlane.xlu0 %1676 }
 0xa36   : > { %v1679_v30 = vmul.f32 0.03125, %v1677_v29 }
 0xa38   : > { %v1681_v31 = vadd.f32 1e-12, %v1679_v30 }
 0xa39   : > { %v1956_v62 = vpop.permute.xlu0 %1955 }
 0xa3a   : > { %4064 = vrsqrt.f32 %v1681_v31  ;;  %v1961_v8 = vsel %vm625_vm11, %v1956_v62, 0 }
 0xa3d   : > { %v2067_v55 = vpop.permute.xlu0 %2066 }
 0xa3e   : > { %v2072_v12 = vsel %vm625_vm11, %v2067_v55, 0 }
 0xa47   : > { %v4065_v37 = vpop.eup %4064 }
 0xa48   : > { %v1685_v38 = vmul.f32 %v4065_v37, %v1669_v17 }
 0xa4a   : > { %v1691_v42 = vmul.f32 %v1689_v35, %v1685_v38 }
 0xa4c   : > { %v4550_v44 = vadd.f32 %v1695_v40, %v1691_v42 }
 0xa4e   : > { %v1704_v47 = vpack.c.bf16 %v4550_v44, %v4548_v43 }
 0xa50   : > { %3803 = vmatmul.mubr.msk.bf16.vlgmr.msra.gmra.mxu1 %vm569_vm10, %v1704_v47 }
 0xa51   : > { %3816 = vmatprep.mubr.msk.bf16.mxu1 %vm4142_vm9, %v4141_v46  ;;  %3815 = vmatpush3.bf16.xpose.msra.mxu1 %v1846_v2 }
 0xa52   : > { %3826 = vmatprep.subr.bf16.mxu1 %v4141_v46 }
 0xb10   : > { %v1758_v6 = vpop.f32.mrf.mxu1 }
 0xb11   : > { %v1759_v7 = vadd.f32 %v1758_v6, %v1708_v5 }
 0xb12   : > { %v3804_v49 = vpop.f32.mrf.mxu1 }
 0xb13   : > { %v1840_v60 = vpack.c.bf16 %v1759_v7, %v1759_v7 }
 0xb14   : > { %v1761_v4 = vpop.f32.mrf.mxu1 }
 0xb15   : > { %v4580_v9 = vadd.f32 %v1761_v4, %v1708_v5  ;;  %2064 = vrot.lane.b32.xlu0 %v1840_v60, %s4882_s29  ;;  %1953 = vrot.lane.b32.xlu1 %v1840_v60, %s4884_s24  ;;  %s1772_s24 = scalar_lea.vmem %s4864_s10, %s4276_s30  ;;  %s4891_s29 = smov 24  }
 0xb16   : > { %3817 = vmatmul.mubr.msk.bf16.vlgmr.msra.gmra.mxu1 %vm625_vm11, %v1840_v60  ;;  %v3805_v10 = vpop.f32.mrf.mxu1 }
 0xb17   : > { %3827 = vmatpush3.bf16.xpose.msra.mxu1 %v1961_v8  ;;  %3828 = vmatprep.mubr.msk.bf16.mxu1 %vm4142_vm9, %v4141_v46 }
 0xb18   : > { %3838 = vmatprep.subr.bf16.mxu1 %v4141_v46 }
 0xb19   : > { %2177 = vrot.lane.b32.xlu0 %v4565_v1, %s4886_s16 }
 0xb1d   : > { %2175 = vrot.lane.b32.xlu0 %v1840_v60, %s4886_s16 }
 0xb87   : > { %v2065_v41 = vpop.permute.xlu0 %2064  ;;  %v1954_v11 = vpop.permute.xlu1 %1953 }
 0xb88   : > { %3829 = vmatmul.mubr.msk.bf16.vlgmr.msra.gmra.mxu1 %vm625_vm11, %v1954_v11 }
 0xb89   : > { %3839 = vmatpush3.bf16.xpose.msra.mxu1 %v2072_v12  ;;  %3840 = vmatprep.mubr.msk.bf16.mxu1 %vm4142_vm9, %v4141_v46 }
 0xb8a   : > { %3850 = vmatprep.subr.bf16.mxu1 %v4141_v46 }
 0xb8b   : > { %v2178_v13 = vpop.permute.xlu0 %2177 }
 0xb8c   : > { %v2183_v14 = vsel %vm625_vm11, %v2178_v13, 0 }
 0xb8f   : > { %v2176_v50 = vpop.permute.xlu0 %2175 }
 0xb90   : > { %3841 = vmatmul.mubr.msk.bf16.vlgmr.msra.gmra.mxu1 %vm625_vm11, %v2065_v41 }
 0xb91   : > { %3851 = vmatpush3.bf16.xpose.msra.mxu1 %v2183_v14  ;;  %3852 = vmatprep.mubr.msk.bf16.mxu1 %vm4142_vm9, %v4141_v46 }
 0xb92   : > { %3862 = vmatprep.subr.bf16.mxu1 %v4141_v46 }
 0xb98   : > { %3853 = vmatmul.mubr.msk.bf16.vlgmr.msra.gmra.mxu1 %vm625_vm11, %v2176_v50 }
 0xb99   : > { %3866 = vmatprep.mubr.msk.bf16.mxu1 %vm4142_vm9, %v4141_v46 }
 0xbd6   : > { %v1882_v16 = vpop.f32.mrf.mxu1 }
 0xbd7   : > { %v1888_v17 = vmul.f32 0.35355338, %v1882_v16 }
 0xbd8   : > { %v3818_v18 = vpop.f32.mrf.mxu1 }
 0xbd9   : > { %v1890_v19 = vsel %vm1889_vm15, %v1888_v17, -inf }
 0xbda   : > { %1891 = vmax.xlane.f32.xlu0 %v1890_v19  ;;  %v1885_v21 = vpop.f32.mrf.mxu1 }
 0xbdc   : > { %v3819_v22 = vpop.f32.mrf.mxu1 }
 0xc48   : > { %v1997_v23 = vpop.f32.mrf.mxu1 }
 0xc49   : > { %v2003_v24 = vmul.f32 0.35355338, %v1997_v23 }
 0xc4a   : > { %v3830_v25 = vpop.f32.mrf.mxu1 }
 0xc4b   : > { %v2004_v26 = vsel %vm1889_vm15, %v2003_v24, -inf }
 0xc4c   : > { %2005 = vmax.xlane.f32.xlu1 %v2004_v26  ;;  %v2000_v27 = vpop.f32.mrf.mxu1 }
 0xc4e   : > { %v3831_v28 = vpop.f32.mrf.mxu1 }
 0xc50   : > { %v2108_v29 = vpop.f32.mrf.mxu1 }
 0xc51   : > { %v2114_v30 = vmul.f32 0.35355338, %v2108_v29 }
 0xc52   : > { %v3842_v31 = vpop.f32.mrf.mxu1 }
 0xc53   : > { %v2115_v33 = vsel %vm1889_vm15, %v2114_v30, -inf }
 0xc54   : > { %2116 = vmax.xlane.f32.xlu0 %v2115_v33  ;;  %v2111_v34 = vpop.f32.mrf.mxu1 }
 0xc56   : > { %v3843_v35 = vpop.f32.mrf.mxu1 }
 0xc58   : > { %v2219_v37 = vpop.f32.mrf.mxu1 }
 0xc59   : > { %v2225_v38 = vmul.f32 0.35355338, %v2219_v37 }
 0xc5a   : > { %v3854_v39 = vpop.f32.mrf.mxu1 }
 0xc5b   : > { %v2226_v40 = vsel %vm1889_vm15, %v2225_v38, -inf  ;;  %v3531_v39 = vld [vmem:[%s4856_s2 + $0x10] sm:$0xff] }
 0xc5c   : > { %2227 = vmax.xlane.f32.xlu0 %v2226_v40  ;;  %v2222_v42 = vpop.f32.mrf.mxu1  ;;  %v3532_v40 = vld [vmem:[%s4856_s2 + $0x18] sm:$0x3] }
 0xc5d   : > { %v2364_v42 = vpack.c.bf16 %v3532_v40, %v3531_v39 }
 0xc5e   : > { %v3855_v47 = vpop.f32.mrf.mxu1 }
 0xc63   : > { %v1892_v56 = vpop.xlane.xlu0 %1891 }
 0xc64   : > { %v1893_v58 = vsub.f32 %v1888_v17, %v1892_v56 }
 0xc66   : > { %v1894_v59 = vmul.f32 1.442695, %v1893_v58 }
 0xc68   : > { %4066 = vpow2.f32 %v1894_v59  ;;  %v4657_v59 = vld [vmem:[%s1772_s24 + $0x8] sm:$0xff]  }
 0xc69   : > { %3863 = vmatpush3.bf16.msra.mxu1 %v4657_v59 }
 0xc6a   : > { %3864 = vmatprep.subr.bf16.mxu1 %v4141_v46 }
 0xc75   : > { %v4067_v61 = vpop.eup %4066 }
 0xc76   : > { %v1896_v63 = vsel %vm1889_vm15, %v4067_v61, 0.0 }
 0xc77   : > { %1897 = vadd.xlane.f32.xlu1 %v1896_v63 }
 0xc88   : > { %1903 = vrot.lane.b32.xlu1 %v4565_v1, %s4887_s20 }
 0xcd5   : > { %v2006_v45 = vpop.xlane.xlu1 %2005 }
 0xcd6   : > { %v2007_v2 = vsub.f32 %v2003_v24, %v2006_v45 }
 0xcd8   : > { %v2008_v5 = vmul.f32 1.442695, %v2007_v2 }
 0xcda   : > { %4068 = vpow2.f32 %v2008_v5 }
 0xcdd   : > { %v2117_v6 = vpop.xlane.xlu0 %2116 }
 0xcde   : > { %v2118_v7 = vsub.f32 %v2114_v30, %v2117_v6 }
 0xce0   : > { %v2119_v49 = vmul.f32 1.442695, %v2118_v7 }
 0xce2   : > { %4070 = vpow2.f32 %v2119_v49 }
 0xce5   : > { %v2228_v60 = vpop.xlane.xlu0 %2227 }
 0xce6   : > { %v2229_v62 = vsub.f32 %v2225_v38, %v2228_v60 }
 0xce7   : > { %v4069_v4 = vpop.eup %4068 }
 0xce8   : > { %v2230_v8 = vmul.f32 1.442695, %v2229_v62  ;;  %v2010_v10 = vsel %vm1889_vm15, %v4069_v4, 0.0 }
 0xce9   : > { %2011 = vadd.xlane.f32.xlu0 %v2010_v10 }
 0xcea   : > { %4072 = vpow2.f32 %v2230_v8 }
 0xcef   : > { %v4071_v55 = vpop.eup %4070 }
 0xcf0   : > { %v2121_v41 = vsel %vm1889_vm15, %v4071_v55, 0.0 }
 0xcf1   : > { %2122 = vadd.xlane.f32.xlu1 %v2121_v41 }
 0xcf7   : > { %v4073_v11 = vpop.eup %4072 }
 0xcf8   : > { %v2232_v12 = vsel %vm1889_vm15, %v4073_v11, 0.0 }
 0xcf9   : > { %2233 = vadd.xlane.f32.xlu0 %v2232_v12 }
 0xd00   : > { %v1898_v13 = vpop.xlane.xlu1 %1897 }
 0xd01   : > { %4074 = vrcp.f32 %v1898_v13 }
 0xd02   : > { %2127 = vrot.lane.b32.xlu1 %v4565_v1, %s4888_s21 }
 0xd04   : > { %v1904_v14 = vpop.permute.xlu1 %1903 }
 0xd05   : > { %v1910_v50 = vsel %vm1908_vm0, %v1904_v14, 0 }
 0xd06   : > { %3821 = vmatpush3.bf16.msra.mxu0 %v1910_v50  ;;  %2238 = vrot.lane.b32.xlu1 %v4565_v1, %s4889_s22 }
 0xd07   : > { %3832 = vmatprep.subr.bf16.mxu0 %v4141_v46 }
 0xd0e   : > { %v4075_v16 = vpop.eup %4074 }
 0xd0f   : > { %2016 = vrot.lane.b32.xlu0 %v4565_v1, %s4890_s25  ;;  %v1900_v17 = vmul.f32 %v4075_v16, %v4067_v61 }
 0xd11   : > { %v1901_v18 = vpack.c.bf16 %v1900_v17, %v1900_v17 }
 0xd13   : > { %3823 = vmatmul.mubr.msk.bf16.vlgmr.msra.gmra.mxu0 %vm1889_vm15, %v1901_v18 }
 0xd14   : > { %3834 = vmatprep.mubr.msk.bf16.mxu0 %vm4142_vm9, %v4141_v46 }
 0xd72   : > { %v2012_v19 = vpop.xlane.xlu0 %2011 }
 0xd73   : > { %4076 = vrcp.f32 %v2012_v19 }
 0xd7a   : > { %v2123_v21 = vpop.xlane.xlu1 %2122 }
 0xd7b   : > { %4078 = vrcp.f32 %v2123_v21 }
 0xd7e   : > { %v2128_v27 = vpop.permute.xlu1 %2127 }
 0xd7f   : > { %v2133_v29 = vsel %vm1908_vm0, %v2128_v27, 0 }
 0xd80   : > { %v4077_v22 = vpop.eup %4076 }
 0xd81   : > { %v2014_v24 = vmul.f32 %v4077_v22, %v4069_v4  ;;  %v2409_v4 = vpack.c.bf16 %v4580_v9, %v4580_v9 }
 0xd82   : > { %v2234_v23 = vpop.xlane.xlu0 %2233  ;;  %v2239_v31 = vpop.permute.xlu1 %2238 }
 0xd83   : > { %4080 = vrcp.f32 %v2234_v23  ;;  %v2015_v1 = vpack.c.bf16 %v2014_v24, %v2014_v24  ;;  %v2244_v35 = vsel %vm1908_vm0, %v2239_v31, 0 }
 0xd86   : > { %v2017_v25 = vpop.permute.xlu0 %2016 }
 0xd87   : > { %v2022_v26 = vsel %vm1908_vm0, %v2017_v25, 0 }
 0xd88   : > { %3833 = vmatpush3.bf16.msra.mxu0 %v2022_v26  ;;  %v4079_v28 = vpop.eup %4078 }
 0xd89   : > { %3844 = vmatprep.subr.bf16.mxu0 %v4141_v46  ;;  %v2125_v30 = vmul.f32 %v4079_v28, %v4071_v55 }
 0xd8b   : > { %3835 = vmatmul.mubr.msk.bf16.vlgmr.msra.gmra.mxu0 %vm1889_vm15, %v2015_v1  ;;  %v2126_v33 = vpack.c.bf16 %v2125_v30, %v2125_v30 }
 0xd8c   : > { %3845 = vmatpush3.bf16.msra.mxu0 %v2133_v29  ;;  %3846 = vmatprep.mubr.msk.bf16.mxu0 %vm4142_vm9, %v4141_v46 }
 0xd8d   : > { %3856 = vmatprep.subr.bf16.mxu0 %v4141_v46 }
 0xd90   : > { %v4081_v34 = vpop.eup %4080 }
 0xd91   : > { %v2236_v37 = vmul.f32 %v4081_v34, %v4073_v11 }
 0xd93   : > { %3847 = vmatmul.mubr.msk.bf16.vlgmr.msra.gmra.mxu0 %vm1889_vm15, %v2126_v33  ;;  %v2237_v38 = vpack.c.bf16 %v2236_v37, %v2236_v37 }
 0xd94   : > { %3857 = vmatpush3.bf16.msra.mxu0 %v2244_v35  ;;  %3858 = vmatprep.mubr.msk.bf16.mxu0 %vm4142_vm9, %v4141_v46 }
 0xd95   : > { %3870 = vmatprep.subr.bf16.mxu0 %v4141_v46 }
 0xd9b   : > { %3859 = vmatmul.mubr.msk.bf16.vlgmr.msra.gmra.mxu0 %vm1889_vm15, %v2237_v38 }
 0xd9c   : > { %3871 = vmatpush3.bf16.msra.mxu0 %v4514_v15  ;;  %3874 = vmatprep.mubr.msk.bf16.mxu0 %vm4142_vm9, %v4141_v46 }
 0xd9d   : > { %3872 = vmatprep.subr.bf16.mxu0 %v4141_v46 }
 0xda0   : > { %3873 = vmatpush3.bf16.msra.mxu0 %v4519_v20  ;;  %v4660_v20 = vld [vmem:[%s1772_s24] sm:$0xff]  }
 0xda1   : > { %3884 = vmatprep.subr.bf16.mxu0 %v4141_v46  ;;  %3865 = vmatpush3.bf16.msra.mxu1 %v4660_v20 }
 0xda2   : > { %3878 = vmatprep.subr.bf16.mxu1 %v4141_v46 }
 0xda3   : > { %3875 = vmatmul.mubr.msk.bf16.vlgmr.msra.gmra.mxu0 %vm569_vm10, %v2364_v42 }
 0xda4   : > { %3886 = vmatprep.mubr.msk.bf16.mxu0 %vm4142_vm9, %v4141_v46 }
 0xdd3   : > { %v1946_v15 = vpop.f32.mrf.mxu0 }
 0xdd5   : > { %v3824_v47 = vpop.f32.mrf.mxu0 }
 0xdd7   : > { %v1949_v56 = vpop.f32.mrf.mxu0 }
 0xdd9   : > { %v3825_v58 = vpop.f32.mrf.mxu0 }
 0xe4b   : > { %v2058_v61 = vpop.f32.mrf.mxu0 }
 0xe4c   : > { %2287 = vrot.lane.b32.xlu0 %v2058_v61, %s4156_s26 }
 0xe4d   : > { %v3836_v63 = vpop.f32.mrf.mxu0 }
 0xe4f   : > { %v2061_v45 = vpop.f32.mrf.mxu0 }
 0xe51   : > { %v3837_v2 = vpop.f32.mrf.mxu0 }
 0xe53   : > { %v2169_v5 = vpop.f32.mrf.mxu0 }
 0xe54   : > { %2291 = vrot.lane.b32.xlu1 %v2169_v5, %s4154_s27 }
 0xe55   : > { %v3848_v6 = vpop.f32.mrf.mxu0 }
 0xe57   : > { %v2172_v7 = vpop.f32.mrf.mxu0 }
 0xe59   : > { %v3849_v49 = vpop.f32.mrf.mxu0 }
 0xe5b   : > { %v2280_v60 = vpop.f32.mrf.mxu0 }
 0xe5c   : > { %2295 = vrot.lane.b32.xlu0 %v2280_v60, %s4891_s29 }
 0xe5d   : > { %v3860_v62 = vpop.f32.mrf.mxu0 }
 0xe5f   : > { %v2283_v8 = vpop.f32.mrf.mxu0 }
 0xe60   : > { %2520 = vrot.lane.b32.xlu0 %v2409_v4, %s4892_s28 }
 0xe61   : > { %v3861_v10 = vpop.f32.mrf.mxu0 }
 0xe63   : > { %v2402_v55 = vpop.f32.mrf.mxu0 }
 0xe64   : > { %2631 = vrot.lane.b32.xlu0 %v2409_v4, %s4893_s17  ;;  %v2403_v12 = vadd.f32 %v2402_v55, %v4561_v51 }
 0xe65   : > { %v3876_v41 = vpop.f32.mrf.mxu0 }
 0xe67   : > { %v2405_v11 = vpop.f32.mrf.mxu0 }
 0xe68   : > { %v2406_v13 = vadd.f32 %v2405_v11, %v4561_v51  ;;  %2742 = vrot.lane.b32.xlu0 %v2409_v4, %s4886_s16 }
 0xe69   : > { %v3877_v14 = vpop.f32.mrf.mxu0 }
 0xe6a   : > { %v4675_v50 = vpack.c.bf16 %v2406_v13, %v2403_v12 }
 0xe6c   : > { %2522 = vrot.lane.b32.xlu1 %v4675_v50, %s4892_s28  ;;  %v2415_v22 = vsel %vm625_vm11, %v4675_v50, 0 }
 0xe70   : > { %2633 = vrot.lane.b32.xlu1 %v4675_v50, %s4893_s17 }
 0xe74   : > { %2744 = vrot.lane.b32.xlu1 %v4675_v50, %s4886_s16  ;;  %s2953_s16 = scalar_lea.vmem %s4865_s11, %s4276_s30  ;;  %s3571_s30 = sshll.u32 %s4245_s19, 6 }
 0xebe   : > { %v2288_v9 = vpop.permute.xlu0 %2287 }
 0xebf   : > { %v2298_v17 = vsel %vm625_vm11, %v1946_v15, %v2288_v9 }
 0xec6   : > { %v2292_v16 = vpop.permute.xlu1 %2291 }
 0xec7   : > { %v2299_v51 = vsel %vm1084_vm13, %v2298_v17, %v2292_v16 }
 0xece   : > { %v2296_v18 = vpop.permute.xlu0 %2295 }
 0xecf   : > { %v2300_v19 = vsel %vm1086_vm14, %v2299_v51, %v2296_v18 }
 0xed0   : > { %v2301_v21 = vpack.c.bf16 %v2300_v19, %v2300_v19 }
 0xed2   : > { %3867 = vmatmul.mubr.msk.bf16.vlgmr.msra.gmra.mxu1 %vm569_vm10, %v2301_v21  ;;  %v2521_v26 = vpop.permute.xlu0 %2520 }
 0xed3   : > { %3879 = vmatpush3.bf16.xpose.msra.mxu1 %v2415_v22  ;;  %3880 = vmatprep.mubr.msk.bf16.mxu1 %vm4142_vm9, %v4141_v46 }
 0xed4   : > { %3890 = vmatprep.subr.bf16.mxu1 %v4141_v46 }
 0xed6   : > { %v2632_v28 = vpop.permute.xlu0 %2631 }
 0xeda   : > { %3881 = vmatmul.mubr.msk.bf16.vlgmr.msra.gmra.mxu1 %vm625_vm11, %v2409_v4  ;;  %v2743_v30 = vpop.permute.xlu0 %2742 }
 0xedb   : > { %3892 = vmatprep.mubr.msk.bf16.mxu1 %vm4142_vm9, %v4141_v46 }
 0xede   : > { %v2523_v23 = vpop.permute.xlu1 %2522 }
 0xedf   : > { %v2528_v24 = vsel %vm625_vm11, %v2523_v23, 0 }
 0xee0   : > { %3891 = vmatpush3.bf16.xpose.msra.mxu1 %v2528_v24 }
 0xee1   : > { %3902 = vmatprep.subr.bf16.mxu1 %v4141_v46 }
 0xee2   : > { %v2634_v25 = vpop.permute.xlu1 %2633 }
 0xee3   : > { %v2639_v27 = vsel %vm625_vm11, %v2634_v25, 0 }
 0xee6   : > { %v2745_v1 = vpop.permute.xlu1 %2744 }
 0xee7   : > { %3893 = vmatmul.mubr.msk.bf16.vlgmr.msra.gmra.mxu1 %vm625_vm11, %v2521_v26  ;;  %v2750_v29 = vsel %vm625_vm11, %v2745_v1, 0 }
 0xee8   : > { %3903 = vmatpush3.bf16.xpose.msra.mxu1 %v2639_v27  ;;  %3904 = vmatprep.mubr.msk.bf16.mxu1 %vm4142_vm9, %v4141_v46 }
 0xee9   : > { %3914 = vmatprep.subr.bf16.mxu1 %v4141_v46 }
 0xeef   : > { %3905 = vmatmul.mubr.msk.bf16.vlgmr.msra.gmra.mxu1 %vm625_vm11, %v2632_v28 }
 0xef0   : > { %3915 = vmatpush3.bf16.xpose.msra.mxu1 %v2750_v29  ;;  %3916 = vmatprep.mubr.msk.bf16.mxu1 %vm4142_vm9, %v4141_v46 }
 0xef1   : > { %3926 = vmatprep.subr.bf16.mxu1 %v4141_v46 }
 0xef7   : > { %3917 = vmatmul.mubr.msk.bf16.vlgmr.msra.gmra.mxu1 %vm625_vm11, %v2743_v30 }
 0xef8   : > { %3927 = vmatpush3.bf16.msra.mxu1 %v4657_v59  ;;  %3930 = vmatprep.mubr.msk.bf16.mxu1 %vm4142_vm9, %v4141_v46 }
 0xef9   : > { %3928 = vmatprep.subr.bf16.mxu1 %v4141_v46 }
 0xefc   : > { %3929 = vmatpush3.bf16.msra.mxu1 %v4660_v20 }
 0xefd   : > { %3942 = vmatprep.subr.bf16.mxu1 %v4141_v46 }
 0xf92   : > { %v4714_v31 = vpop.f32.mrf.mxu1 }
 0xf94   : > { %v3868_v33 = vpop.f32.mrf.mxu1 }
 0xf96   : > { %v2358_v34 = vpop.f32.mrf.mxu1 }
 0xf98   : > { %v3869_v35 = vpop.f32.mrf.mxu1 }
 0xf9a   : > { %v2451_v37 = vpop.f32.mrf.mxu1 }
 0xf9b   : > { %v2457_v38 = vmul.f32 0.35355338, %v2451_v37 }
 0xf9c   : > { %v3882_v39 = vpop.f32.mrf.mxu1 }
 0xf9d   : > { %v2458_v40 = vsel %vm1889_vm15, %v2457_v38, -inf }
 0xf9e   : > { %2459 = vmax.xlane.f32.xlu1 %v2458_v40  ;;  %v2454_v42 = vpop.f32.mrf.mxu1 }
 0xfa0   : > { %v3883_v15 = vpop.f32.mrf.mxu1 }
 0xfa7   : > { %v2564_v47 = vpop.f32.mrf.mxu1 }
 0xfa8   : > { %v2570_v56 = vmul.f32 0.35355338, %v2564_v47 }
 0xfa9   : > { %v3894_v58 = vpop.f32.mrf.mxu1 }
 0xfaa   : > { %v2571_v59 = vsel %vm1889_vm15, %v2570_v56, -inf }
 0xfab   : > { %2572 = vmax.xlane.f32.xlu0 %v2571_v59  ;;  %v2567_v20 = vpop.f32.mrf.mxu1 }
 0xfad   : > { %v3895_v61 = vpop.f32.mrf.mxu1 }
 0xfaf   : > { %v2675_v63 = vpop.f32.mrf.mxu1 }
 0xfb0   : > { %v2681_v45 = vmul.f32 0.35355338, %v2675_v63 }
 0xfb1   : > { %v3906_v2 = vpop.f32.mrf.mxu1 }
 0xfb2   : > { %v2682_v5 = vsel %vm1889_vm15, %v2681_v45, -inf }
 0xfb3   : > { %2683 = vmax.xlane.f32.xlu0 %v2682_v5  ;;  %v2678_v6 = vpop.f32.mrf.mxu1 }
 0xfb5   : > { %v3907_v7 = vpop.f32.mrf.mxu1 }
 0xfb7   : > { %v2786_v49 = vpop.f32.mrf.mxu1 }
 0xfb8   : > { %v2792_v60 = vmul.f32 0.35355338, %v2786_v49 }
 0xfb9   : > { %v3918_v62 = vpop.f32.mrf.mxu1 }
 0xfba   : > { %v2793_v4 = vsel %vm1889_vm15, %v2792_v60, -inf }
 0xfbb   : > { %2794 = vmax.xlane.f32.xlu1 %v2793_v4  ;;  %v2789_v8 = vpop.f32.mrf.mxu1 }
 0xfbd   : > { %v3919_v10 = vpop.f32.mrf.mxu1 }
0x1027   : > { %v2460_v55 = vpop.xlane.xlu1 %2459 }
0x1028   : > { %v2461_v41 = vsub.f32 %v2457_v38, %v2460_v55 }
0x102a   : > { %v2462_v11 = vmul.f32 1.442695, %v2461_v41 }
0x102c   : > { %4082 = vpow2.f32 %v2462_v11 }
0x1034   : > { %v2573_v12 = vpop.xlane.xlu0 %2572 }
0x1035   : > { %v2574_v13 = vsub.f32 %v2570_v56, %v2573_v12 }
0x1037   : > { %v2575_v14 = vmul.f32 1.442695, %v2574_v13 }
0x1039   : > { %v4083_v9 = vpop.eup %4082  ;;  %4084 = vpow2.f32 %v2575_v14 }
0x103a   : > { %v2464_v16 = vsel %vm1889_vm15, %v4083_v9, 0.0 }
0x103b   : > { %2465 = vadd.xlane.f32.xlu0 %v2464_v16 }
0x103c   : > { %v2684_v17 = vpop.xlane.xlu0 %2683 }
0x103d   : > { %v2685_v51 = vsub.f32 %v2681_v45, %v2684_v17  ;;  %v2304_v17 = vsub.s32 6, %v4300_v53 }
0x103f   : > { %v2686_v18 = vmul.f32 1.442695, %v2685_v51 }
0x1041   : > { %4086 = vpow2.f32 %v2686_v18  ;;  %v4110_v18 = vld [vmem:[%s4306_s23] sm:$0xff] }
0x1044   : > { %v2795_v24 = vpop.xlane.xlu1 %2794 }
0x1045   : > { %v2796_v25 = vsub.f32 %v2792_v60, %v2795_v24 }
0x1046   : > { %v4085_v19 = vpop.eup %4084 }
0x1047   : > { %v2577_v21 = vsel %vm1889_vm15, %v4085_v19, 0.0  ;;  %v2797_v26 = vmul.f32 1.442695, %v2796_v25 }
0x1048   : > { %2578 = vadd.xlane.f32.xlu1 %v2577_v21 }
0x1049   : > { %4088 = vpow2.f32 %v2797_v26 }
0x104e   : > { %v4087_v22 = vpop.eup %4086 }
0x104f   : > { %v2688_v23 = vsel %vm1889_vm15, %v4087_v22, 0.0 }
0x1050   : > { %2689 = vadd.xlane.f32.xlu0 %v2688_v23 }
0x1056   : > { %v4089_v27 = vpop.eup %4088 }
0x1057   : > { %v2799_v1 = vsel %vm1889_vm15, %v4089_v27, 0.0 }
0x1059   : > { %2583 = vrot.lane.b32.xlu1 %v4675_v50, %s4890_s25 }
0x1066   : > { %2471 = vrot.lane.b32.xlu0 %v4675_v50, %s4887_s20 }
0x106a   : > { %2805 = vrot.lane.b32.xlu0 %v4675_v50, %s4889_s22 }
0x107d   : > { %2800 = vadd.xlane.f32.xlu1 %v2799_v1 }
0x108e   : > { %2694 = vrot.lane.b32.xlu1 %v4675_v50, %s4888_s21 }
0x10c4   : > { %v2466_v28 = vpop.xlane.xlu0 %2465 }
0x10c5   : > { %4090 = vrcp.f32 %v2466_v28 }
0x10d1   : > { %v2579_v29 = vpop.xlane.xlu1 %2578 }
0x10d2   : > { %4092 = vrcp.f32 %v2579_v29  ;;  %v4091_v30 = vpop.eup %4090 }
0x10d3   : > { %v2468_v34 = vmul.f32 %v4091_v30, %v4083_v9 }
0x10d5   : > { %v2584_v38 = vpop.permute.xlu1 %2583  ;;  %v2469_v39 = vpack.c.bf16 %v2468_v34, %v2468_v34 }
0x10d6   : > { %v2589_v42 = vsel %vm1908_vm0, %v2584_v38, 0 }
0x10d9   : > { %v2690_v33 = vpop.xlane.xlu0 %2689 }
0x10da   : > { %4094 = vrcp.f32 %v2690_v33 }
0x10dd   : > { %v2472_v35 = vpop.permute.xlu0 %2471 }
0x10de   : > { %v2477_v37 = vsel %vm1908_vm0, %v2472_v35, 0 }
0x10df   : > { %3885 = vmatpush3.bf16.msra.mxu0 %v2477_v37  ;;  %v4093_v40 = vpop.eup %4092 }
0x10e0   : > { %3896 = vmatprep.subr.bf16.mxu0 %v4141_v46  ;;  %v2581_v50 = vmul.f32 %v4093_v40, %v4085_v19  ;;  %v2305_v19 = vrot.slane %v4110_v18, %v2304_v17 }
0x10e1   : > { %v2806_v61 = vpop.permute.xlu0 %2805 }
0x10e2   : > { %3887 = vmatmul.mubr.msk.bf16.vlgmr.msra.gmra.mxu0 %vm1889_vm15, %v2469_v39  ;;  %v2582_v15 = vpack.c.bf16 %v2581_v50, %v2581_v50  ;;  %v2811_v45 = vsel %vm1908_vm0, %v2806_v61, 0  ;;  %v2356_v21 = vadd.f32 %v4714_v31, %v2305_v19 }
0x10e3   : > { %3897 = vmatpush3.bf16.msra.mxu0 %v2589_v42  ;;  %3898 = vmatprep.mubr.msk.bf16.mxu0 %vm4142_vm9, %v4141_v46 }
0x10e4   : > { %3908 = vmatprep.subr.bf16.mxu0 %v4141_v46 }
0x10e7   : > { %v4095_v47 = vpop.eup %4094 }
0x10e8   : > { %v2692_v58 = vmul.f32 %v4095_v47, %v4087_v22  ;;  %v2912_v22 = vadd.f32 %v2356_v21, %v4548_v43 }
0x10ea   : > { %3899 = vmatmul.mubr.msk.bf16.vlgmr.msra.gmra.mxu0 %vm1889_vm15, %v2582_v15  ;;  %v2693_v63 = vpack.c.bf16 %v2692_v58, %v2692_v58  ;;  %v2914_v23 = vsel %vm569_vm10, %v2912_v22, 0.0 }
0x10eb   : > { %3910 = vmatprep.mubr.msk.bf16.mxu0 %vm4142_vm9, %v4141_v46 }
0x1106   : > { %v2801_v56 = vpop.xlane.xlu1 %2800 }
0x1107   : > { %4096 = vrcp.f32 %v2801_v56 }
0x110a   : > { %v2695_v59 = vpop.permute.xlu1 %2694 }
0x110b   : > { %v2700_v20 = vsel %vm1908_vm0, %v2695_v59, 0 }
0x110c   : > { %3909 = vmatpush3.bf16.msra.mxu0 %v2700_v20  ;;  %v4020_v20 = vld [vmem:[%s2953_s16 + $0x8] sm:$0xff]  }
0x110d   : > { %3920 = vmatprep.subr.bf16.mxu0 %v4141_v46 }
0x110f   : > { %3911 = vmatmul.mubr.msk.bf16.vlgmr.msra.gmra.mxu0 %vm1889_vm15, %v2693_v63 }
0x1110   : > { %3921 = vmatpush3.bf16.msra.mxu0 %v2811_v45  ;;  %3922 = vmatprep.mubr.msk.bf16.mxu0 %vm4142_vm9, %v4141_v46 }
0x1111   : > { %3934 = vmatprep.subr.bf16.mxu0 %v4141_v46 }
0x1114   : > { %v4097_v2 = vpop.eup %4096 }
0x1115   : > { %v2803_v5 = vmul.f32 %v4097_v2, %v4089_v27 }
0x1117   : > { %v2804_v6 = vpack.c.bf16 %v2803_v5, %v2803_v5 }
0x1119   : > { %3923 = vmatmul.mubr.msk.bf16.vlgmr.msra.gmra.mxu0 %vm1889_vm15, %v2804_v6 }
0x111a   : > { %3938 = vmatprep.mubr.msk.bf16.mxu0 %vm4142_vm9, %v4141_v46  ;;  %3935 = vmatpush3.bf16.msra.mxu0 %v4020_v20 }
0x111b   : > { %3936 = vmatprep.subr.bf16.mxu0 %v4141_v46 }
0x11a2   : > { %v2513_v7 = vpop.f32.mrf.mxu0 }
0x11a4   : > { %v3888_v49 = vpop.f32.mrf.mxu0 }
0x11a6   : > { %v2516_v60 = vpop.f32.mrf.mxu0 }
0x11a8   : > { %v3889_v62 = vpop.f32.mrf.mxu0 }
0x11aa   : > { %v2625_v4 = vpop.f32.mrf.mxu0 }
0x11ab   : > { %2854 = vrot.lane.b32.xlu1 %v2625_v4, %s4156_s26  ;;  %v4777_v4 = vld [vmem:[%s4306_s23 + $0x8] sm:$0xff]  ;;  %s3038_s23 = scalar_lea.vmem %s4866_s12, %s3571_s30 }
0x11ac   : > { %v3900_v8 = vpop.f32.mrf.mxu0  ;;  %v4025_v17 = vld [vmem:[%s3038_s23 + $0x20] sm:$0xff]  }
0x11ad   : > { %v4029_v21 = vld [vmem:[%s3038_s23] sm:$0xff]  }
0x11ae   : > { %v2628_v10 = vpop.f32.mrf.mxu0 }
0x11af   : > { %v2949_v10 = vrot.slane %v4777_v4, %v555_v54  ;;  %v4023_v54 = vld [vmem:[%s3038_s23 + $0x30] sm:$0xff]  }
0x11b0   : > { %v3901_v55 = vpop.f32.mrf.mxu0 }
0x11cf   : > { %v2736_v41 = vpop.f32.mrf.mxu0 }
0x11d0   : > { %2858 = vrot.lane.b32.xlu0 %v2736_v41, %s4154_s27 }
0x11d1   : > { %v3912_v11 = vpop.f32.mrf.mxu0 }
0x11d3   : > { %v2739_v12 = vpop.f32.mrf.mxu0 }
0x11d5   : > { %v3913_v13 = vpop.f32.mrf.mxu0 }
0x11d9   : > { %v2847_v14 = vpop.f32.mrf.mxu0 }
0x11da   : > { %2862 = vrot.lane.b32.xlu1 %v2847_v14, %s4891_s29 }
0x11db   : > { %v3924_v9 = vpop.f32.mrf.mxu0 }
0x11dc   : > { %v4022_v9 = vld [vmem:[%s3038_s23 + $0x38] sm:$0xff]  }
0x11dd   : > { %v2850_v16 = vpop.f32.mrf.mxu0 }
0x11de   : > { %v4024_v16 = vld [vmem:[%s3038_s23 + $0x28] sm:$0xff]  }
0x11df   : > { %v3925_v51 = vpop.f32.mrf.mxu0 }
0x11e0   : > { %v4026_v51 = vld [vmem:[%s3038_s23 + $0x18] sm:$0xff]  }
0x11ef   : > { %2915 = vadd.xlane.f32.xlu0 %v2914_v23 }
0x121d   : > { %v2855_v24 = vpop.permute.xlu1 %2854 }
0x121e   : > { %v2865_v26 = vsel %vm625_vm11, %v2513_v7, %v2855_v24  ;;  %v2942_v7 = vsub.s32 7, %v4300_v53 }
0x1220   : > { %v2943_v62 = vrot.slane %v4110_v18, %v2942_v7  ;;  %v4027_v18 = vld [vmem:[%s3038_s23 + $0x10] sm:$0xff]  }
0x1242   : > { %v2859_v25 = vpop.permute.xlu0 %2858 }
0x1243   : > { %v2866_v27 = vsel %vm1084_vm13, %v2865_v26, %v2859_v25 }
0x124c   : > { %v2863_v1 = vpop.permute.xlu1 %2862 }
0x124d   : > { %v2867_v28 = vsel %vm1086_vm14, %v2866_v27, %v2863_v1 }
0x124e   : > { %v2868_v29 = vpack.c.bf16 %v2867_v28, %v2867_v28 }
0x1250   : > { %3931 = vmatmul.mubr.msk.bf16.vlgmr.msra.gmra.mxu1 %vm569_vm10, %v2868_v29 }
0x1251   : > { %3958 = vmatprep.mubr.msk.bf16.mxu1 %vm4142_vm9, %v4141_v46  ;;  %3943 = vmatpush3.bf16.msra.mxu1 %v4022_v9 }
0x1252   : > { %3944 = vmatprep.subr.bf16.mxu1 %v4141_v46 }
0x1255   : > { %3945 = vmatpush3.bf16.msra.mxu1 %v4023_v54 }
0x1256   : > { %3946 = vmatprep.subr.bf16.mxu1 %v4141_v46 }
0x1259   : > { %3947 = vmatpush3.bf16.msra.mxu1 %v4024_v16 }
0x125a   : > { %3948 = vmatprep.subr.bf16.mxu1 %v4141_v46 }
0x125d   : > { %3949 = vmatpush3.bf16.msra.mxu1 %v4025_v17 }
0x125e   : > { %3950 = vmatprep.subr.bf16.mxu1 %v4141_v46 }
0x1261   : > { %3951 = vmatpush3.bf16.msra.mxu1 %v4026_v51 }
0x1262   : > { %3952 = vmatprep.subr.bf16.mxu1 %v4141_v46 }
0x1265   : > { %3953 = vmatpush3.bf16.msra.mxu1 %v4027_v18  ;;  %v3180_v18 = vrot.slane %v4777_v4, %v4544_v36 }
0x1266   : > { %3954 = vmatprep.subr.bf16.mxu1 %v4141_v46 }
0x1278   : > { %v2916_v31 = vpop.xlane.xlu0 %2915 }
0x1279   : > { %v2920_v43 = vmul.f32 0.03125, %v2916_v31 }
0x127b   : > { %v2922_v30 = vsub.f32 %v2912_v22, %v2920_v43  ;;  %v2962_v22 = vrot.slane %v4777_v4, %v1091_v57 }
0x127d   : > { %v2924_v33 = vmul.f32 %v2922_v30, %v2922_v30 }
0x127f   : > { %v2926_v34 = vsel %vm569_vm10, %v2924_v33, 0.0 }
0x1280   : > { %2927 = vadd.xlane.f32.xlu0 %v2926_v34 }
0x1309   : > { %v2928_v61 = vpop.xlane.xlu0 %2927 }
0x130a   : > { %v2932_v63 = vmul.f32 0.03125, %v2928_v61 }
0x130c   : > { %v2934_v45 = vadd.f32 1e-12, %v2932_v63 }
0x130e   : > { %4098 = vrsqrt.f32 %v2934_v45 }
0x1310   : > { %v2906_v35 = vpop.f32.mrf.mxu1 }
0x1311   : > { %v2907_v37 = vadd.f32 %v2906_v35, %v2305_v19  ;;  %v4028_v19 = vld [vmem:[%s3038_s23 + $0x8] sm:$0xff]  }
0x1312   : > { %v3932_v38 = vpop.f32.mrf.mxu1  ;;  %3955 = vmatpush3.bf16.msra.mxu1 %v4028_v19 }
0x1313   : > { %v2913_v39 = vadd.f32 %v2907_v37, %v4550_v44  ;;  %v4021_v44 = vld [vmem:[%s2953_s16] sm:$0xff]   ;;  %3956 = vmatprep.subr.bf16.mxu1 %v4141_v46 }
0x1314   : > { %v2909_v40 = vpop.f32.mrf.mxu1  ;;  %3937 = vmatpush3.bf16.msra.mxu0 %v4021_v44 }
0x1315   : > { %v2917_v42 = vsel %vm569_vm10, %v2913_v39, 0.0 }
0x1316   : > { %2918 = vadd.xlane.f32.xlu1 %v2917_v42  ;;  %v3933_v50 = vpop.f32.mrf.mxu1  ;;  %3957 = vmatpush3.bf16.msra.mxu1 %v4029_v21  ;;  %v3186_v21 = vrot.slane %v4777_v4, %v4575_v3 }
0x131b   : > { %v4099_v49 = vpop.eup %4098 }
0x131c   : > { %v2938_v60 = vmul.f32 %v4099_v49, %v2922_v30 }
0x131e   : > { %v2944_v41 = vmul.f32 %v2943_v62, %v2938_v60 }
0x1320   : > { %v2950_v12 = vadd.f32 %v2949_v10, %v2944_v41 }
0x139f   : > { %v2919_v15 = vpop.xlane.xlu1 %2918 }
0x13a0   : > { %v2921_v47 = vmul.f32 0.03125, %v2919_v15 }
0x13a2   : > { %v2923_v56 = vsub.f32 %v2913_v39, %v2921_v47 }
0x13a4   : > { %v2925_v58 = vmul.f32 %v2923_v56, %v2923_v56 }
0x13a6   : > { %v2929_v59 = vsel %vm569_vm10, %v2925_v58, 0.0  ;;  %v3059_v58 = vrot.slane %v4777_v4, %v4539_v32 }
0x13a7   : > { %2930 = vadd.xlane.f32.xlu0 %v2929_v59 }
0x1430   : > { %v2931_v2 = vpop.xlane.xlu0 %2930 }
0x1431   : > { %v2933_v5 = vmul.f32 0.03125, %v2931_v2 }
0x1433   : > { %v2935_v6 = vadd.f32 1e-12, %v2933_v5 }
0x1435   : > { %4100 = vrsqrt.f32 %v2935_v6 }
0x1442   : > { %v4101_v8 = vpop.eup %4100 }
0x1443   : > { %v2939_v55 = vmul.f32 %v4101_v8, %v2923_v56 }
0x1445   : > { %v2945_v11 = vmul.f32 %v2943_v62, %v2939_v55 }
0x1447   : > { %v4782_v13 = vadd.f32 %v2949_v10, %v2945_v11 }
0x1449   : > { %v2958_v14 = vpack.c.bf16 %v4782_v13, %v2950_v12 }
0x144b   : > { %3939 = vmatmul.mubr.msk.bf16.vlgmr.msra.gmra.mxu0 %vm569_vm10, %v2958_v14 }
0x150b   : > { %v3012_v23 = vpop.f32.mrf.mxu0 }
0x150c   : > { %v3013_v24 = vadd.f32 %v3012_v23, %v2962_v22 }
0x150d   : > { %v3940_v25 = vpop.f32.mrf.mxu0 }
0x150e   : > { %v3019_v26 = vmul.f32 %v3013_v24, %v3013_v24 }
0x150f   : > { %v3015_v27 = vpop.f32.mrf.mxu0 }
0x1510   : > { %v3021_v1 = vmul.f32 %v3019_v26, %v3013_v24  ;;  %v3016_v28 = vadd.f32 %v3015_v27, %v2962_v22 }
0x1511   : > { %v3941_v29 = vpop.f32.mrf.mxu0 }
0x1512   : > { %v3023_v31 = vmul.f32 0.044715, %v3021_v1  ;;  %v3020_v43 = vmul.f32 %v3016_v28, %v3016_v28 }
0x1514   : > { %v3025_v30 = vadd.f32 %v3023_v31, %v3013_v24  ;;  %v3022_v33 = vmul.f32 %v3020_v43, %v3016_v28 }
0x1516   : > { %v3027_v34 = vmul.f32 0.7978846, %v3025_v30  ;;  %v3024_v46 = vmul.f32 0.044715, %v3022_v33 }
0x1518   : > { %4102 = vtanh.f32 %v3027_v34  ;;  %v3026_v35 = vadd.f32 %v3024_v46, %v3016_v28 }
0x151a   : > { %v3028_v37 = vmul.f32 0.7978846, %v3026_v35 }
0x151c   : > { %4104 = vtanh.f32 %v3028_v37 }
0x1525   : > { %v4103_v38 = vpop.eup %4102 }
0x1526   : > { %v3031_v57 = vadd.f32 1.0, %v4103_v38 }
0x1528   : > { %v3033_v40 = vmul.f32 0.5, %v3031_v57 }
0x1529   : > { %v4105_v39 = vpop.eup %4104 }
0x152a   : > { %v3032_v42 = vadd.f32 1.0, %v4105_v39  ;;  %v3035_v15 = vmul.f32 %v3033_v40, %v3013_v24 }
0x152c   : > { %v3034_v50 = vmul.f32 0.5, %v3032_v42 }
0x152e   : > { %v3036_v47 = vmul.f32 %v3034_v50, %v3016_v28 }
0x1530   : > { %v3055_v56 = vpack.c.bf16 %v3036_v47, %v3035_v15 }
0x1532   : > { %3959 = vmatmul.mubr.bf16.vlgmr.msra.gmra.mxu1 %v3055_v56 }
0x15f2   : > { %v3142_v59 = vpop.f32.mrf.mxu1 }
0x15f3   : > { %v3143_v20 = vadd.f32 %v3142_v59, %v3059_v58 }
0x15f4   : > { %v3960_v44 = vpop.f32.mrf.mxu1 }
0x15f5   : > { %v3149_v61 = vadd.f32 %v3143_v20, %v2950_v12 }
0x15f6   : > { %v3145_v63 = vpop.f32.mrf.mxu1 }
0x15f7   : > { %v3146_v45 = vadd.f32 %v3145_v63, %v3059_v58  ;;  %v3151_v2 = vsel %vm569_vm10, %v3149_v61, 0.0 }
0x15f8   : > { %3152 = vadd.xlane.f32.xlu1 %v3151_v2  ;;  %v3961_v5 = vpop.f32.mrf.mxu1 }
0x15f9   : > { %v3150_v6 = vadd.f32 %v3146_v45, %v4782_v13 }
0x15fb   : > { %v3154_v7 = vsel %vm569_vm10, %v3150_v6, 0.0 }
0x15fc   : > { %3155 = vadd.xlane.f32.xlu0 %v3154_v7 }
0x1681   : > { %v3153_v49 = vpop.xlane.xlu1 %3152 }
0x1682   : > { %v3157_v60 = vmul.f32 0.03125, %v3153_v49 }
0x1684   : > { %v3159_v62 = vsub.f32 %v3149_v61, %v3157_v60 }
0x1685   : > { %v3156_v8 = vpop.xlane.xlu0 %3155 }
0x1686   : > { %v3158_v10 = vmul.f32 0.03125, %v3156_v8  ;;  %v3161_v55 = vmul.f32 %v3159_v62, %v3159_v62 }
0x1688   : > { %v3160_v41 = vsub.f32 %v3150_v6, %v3158_v10  ;;  %v3163_v11 = vsel %vm569_vm10, %v3161_v55, 0.0 }
0x1689   : > { %3164 = vadd.xlane.f32.xlu1 %v3163_v11 }
0x168a   : > { %v3162_v12 = vmul.f32 %v3160_v41, %v3160_v41 }
0x168c   : > { %v3166_v14 = vsel %vm569_vm10, %v3162_v12, 0.0 }
0x168d   : > { %3167 = vadd.xlane.f32.xlu0 %v3166_v14 }
0x1712   : > { %v3165_v9 = vpop.xlane.xlu1 %3164 }
0x1713   : > { %v3169_v54 = vmul.f32 0.03125, %v3165_v9 }
0x1715   : > { %v3171_v13 = vadd.f32 1e-12, %v3169_v54 }
0x1716   : > { %v3168_v16 = vpop.xlane.xlu0 %3167 }
0x1717   : > { %4106 = vrsqrt.f32 %v3171_v13  ;;  %v3170_v17 = vmul.f32 0.03125, %v3168_v16 }
0x1719   : > { %v3172_v51 = vadd.f32 1e-12, %v3170_v17 }
0x171b   : > { %4108 = vrsqrt.f32 %v3172_v51 }
0x1724   : > { %v4107_v19 = vpop.eup %4106 }
0x1725   : > { %v3175_v22 = vmul.f32 %v4107_v19, %v3159_v62 }
0x1727   : > { %v3181_v23 = vmul.f32 %v3180_v18, %v3175_v22 }
0x1728   : > { %v4109_v24 = vpop.eup %4108 }
0x1729   : > { %v3187_v25 = vadd.f32 %v3186_v21, %v3181_v23  ;;  %v3176_v26 = vmul.f32 %v4109_v24, %v3160_v41 }
0x172b   : > { %3189 = vst.msk [vmem:[#allocation2] sm:$0xff] %vm569_vm10, %v3187_v25  ;;  %v3182_v27 = vmul.f32 %v3180_v18, %v3176_v26  ;;  %3194 = sbr.rel (%p3556_p4) target bundleno = 7161 (0x1bf9), region = 88 }
0x172d   : > { %v3188_v1 = vadd.f32 %v3186_v21, %v3182_v27 }
0x172f   : > { %3190 = vst.msk [vmem:[#allocation2 + $0x8] sm:$0xff] %vm569_vm10, %v3188_v1 }
0x1730   : > { %v4111_v28 = vld [vmem:[%s4867_s13 + $0x8] sm:$0xff]   ;;  %v4157_v29 = vmov 0.0   ;;  %v4112_v4 = vld [vmem:[%s4867_s13] sm:$0xff]   ;;  %vm4158_vm1 = vmmov 0   ;;  %v3199_v31 = vpack.c.bf16 %v3188_v1, %v3187_v25  ;;  %v3203_v43 = vrot.slane %v4252_v0, %v4539_v32 }
0x1731   : > { %3962 = vmatprep.subr.bf16.mxu0 %v4157_v29  ;;  %3970 = vmatprep.subr.bf16.mxu1 %v4157_v29  ;;  %v4113_v14 = vld [vmem:[%s4868_s14 + $0x8] sm:$0xff]   ;;  %v4114_v9 = vld [vmem:[%s4868_s14] sm:$0xff]   ;;  %v3307_v22 = vrot.slane %v4252_v0, %v4544_v36  ;;  %v3313_v26 = vrot.slane %v4252_v0, %v4575_v3 }
0x1732   : > { %3963 = vmatpush3.bf16.msra.mxu0 %v4111_v28  ;;  %3966 = vmatprep.mubr.msk.bf16.mxu0 %vm4158_vm1, %v4157_v29 }
0x1733   : > { %3964 = vmatprep.subr.bf16.mxu0 %v4157_v29  ;;  %3974 = vmatprep.mubr.msk.bf16.mxu1 %vm4158_vm1, %v4157_v29 }
0x1734   : > { %3971 = vmatpush3.bf16.msra.mxu1 %v4113_v14 }
0x1735   : > { %3972 = vmatprep.subr.bf16.mxu1 %v4157_v29 }
0x1736   : > { %3965 = vmatpush3.bf16.msra.mxu0 %v4112_v4  ;;  %v3324_v4 = vrot.slane %v4252_v0, %v1782_v48 }
0x1738   : > { %3973 = vmatpush3.bf16.msra.mxu1 %v4114_v9 }
0x1739   : > { %3967 = vmatmul.mubr.msk.bf16.vlgmr.msra.gmra.mxu0 %vm569_vm10, %v3199_v31 }
0x17f9   : > { %v3253_v30 = vpop.f32.mrf.mxu0 }
0x17fa   : > { %v3254_v33 = vadd.f32 %v3253_v30, %v3203_v43 }
0x17fb   : > { %v3968_v34 = vpop.f32.mrf.mxu0 }
0x17fc   : > { %v3260_v46 = vmul.f32 %v3254_v33, %v3254_v33 }
0x17fd   : > { %v3256_v35 = vpop.f32.mrf.mxu0 }
0x17fe   : > { %v3262_v37 = vmul.f32 %v3260_v46, %v3254_v33  ;;  %v3257_v38 = vadd.f32 %v3256_v35, %v3203_v43 }
0x17ff   : > { %v3969_v57 = vpop.f32.mrf.mxu0 }
0x1800   : > { %v3264_v39 = vmul.f32 0.044715, %v3262_v37  ;;  %v3261_v40 = vmul.f32 %v3257_v38, %v3257_v38 }
0x1802   : > { %v3266_v42 = vadd.f32 %v3264_v39, %v3254_v33  ;;  %v3263_v50 = vmul.f32 %v3261_v40, %v3257_v38 }
0x1804   : > { %v3265_v15 = vmul.f32 0.044715, %v3263_v50  ;;  %v3268_v47 = vmul.f32 0.7978846, %v3266_v42 }
0x1806   : > { %v3267_v56 = vadd.f32 %v3265_v15, %v3257_v38  ;;  %4115 = vtanh.f32 %v3268_v47  ;;  %v3401_v47 = vld [vmem:[%s4857_s3] sm:$0xff] }
0x1808   : > { %v3269_v58 = vmul.f32 0.7978846, %v3267_v56 }
0x180a   : > { %4117 = vtanh.f32 %v3269_v58 }
0x1813   : > { %v4116_v59 = vpop.eup %4115 }
0x1814   : > { %v3272_v32 = vadd.f32 1.0, %v4116_v59 }
0x1816   : > { %v3274_v20 = vmul.f32 0.5, %v3272_v32  ;;  %v3402_v32 = vld [vmem:[%s4857_s3 + $0x8] sm:$0xff] }
0x1817   : > { %v4118_v44 = vpop.eup %4117 }
0x1818   : > { %v3276_v61 = vmul.f32 %v3274_v20, %v3254_v33  ;;  %v3273_v63 = vadd.f32 1.0, %v4118_v44 }
0x181a   : > { %v3278_v45 = vsel %vm569_vm10, %v3276_v61, 0.0  ;;  %v3275_v2 = vmul.f32 0.5, %v3273_v63 }
0x181b   : > { %3279 = vadd.xlane.f32.xlu0 %v3278_v45 }
0x181c   : > { %v3277_v5 = vmul.f32 %v3275_v2, %v3257_v38 }
0x181e   : > { %v3281_v6 = vsel %vm569_vm10, %v3277_v5, 0.0 }
0x181f   : > { %3282 = vadd.xlane.f32.xlu0 %v3281_v6 }
0x18a4   : > { %v3280_v7 = vpop.xlane.xlu0 %3279 }
0x18a5   : > { %v3284_v49 = vmul.f32 0.03125, %v3280_v7 }
0x18a7   : > { %v3286_v60 = vsub.f32 %v3276_v61, %v3284_v49 }
0x18a8   : > { %v3283_v62 = vpop.xlane.xlu0 %3282 }
0x18a9   : > { %v3285_v8 = vmul.f32 0.03125, %v3283_v62  ;;  %v3288_v10 = vmul.f32 %v3286_v60, %v3286_v60  ;;  %v3431_v62 = vand.u32 127, %v553_v52 }
0x18ab   : > { %v3287_v55 = vsub.f32 %v3277_v5, %v3285_v8  ;;  %v3290_v41 = vsel %vm569_vm10, %v3288_v10, 0.0  ;;  %vm3435_vm2 = vcmp.eq.s32.totalorder %v3431_v62, 1  ;;  %vm3432_vm3 = vcmp.eq.s32.totalorder %v3431_v62, 0 }
0x18ac   : > { %3291 = vadd.xlane.f32.xlu1 %v3290_v41 }
0x18ad   : > { %v3289_v11 = vmul.f32 %v3287_v55, %v3287_v55 }
0x18af   : > { %v3293_v12 = vsel %vm569_vm10, %v3289_v11, 0.0 }
0x18b0   : > { %3294 = vadd.xlane.f32.xlu1 %v3293_v12 }
0x1935   : > { %v3292_v54 = vpop.xlane.xlu1 %3291 }
0x1936   : > { %v3296_v13 = vmul.f32 0.03125, %v3292_v54 }
0x1938   : > { %v3298_v16 = vadd.f32 1e-12, %v3296_v13 }
0x1939   : > { %v3295_v17 = vpop.xlane.xlu1 %3294 }
0x193a   : > { %4119 = vrsqrt.f32 %v3298_v16  ;;  %v3297_v51 = vmul.f32 0.03125, %v3295_v17 }
0x193c   : > { %v3299_v18 = vadd.f32 1e-12, %v3297_v51 }
0x193e   : > { %4121 = vrsqrt.f32 %v3299_v18 }
0x1947   : > { %v4120_v19 = vpop.eup %4119 }
0x1948   : > { %v3302_v21 = vmul.f32 %v4120_v19, %v3286_v60 }
0x194a   : > { %v3308_v25 = vmul.f32 %v3307_v22, %v3302_v21 }
0x194b   : > { %v4122_v23 = vpop.eup %4121 }
0x194c   : > { %v3303_v24 = vmul.f32 %v4122_v23, %v3287_v55  ;;  %v3314_v1 = vadd.f32 %v3313_v26, %v3308_v25 }
0x194e   : > { %v3309_v27 = vmul.f32 %v3307_v22, %v3303_v24 }
0x1950   : > { %v3315_v28 = vadd.f32 %v3313_v26, %v3309_v27 }
0x1952   : > { %v3320_v29 = vpack.c.bf16 %v3315_v28, %v3314_v1 }
0x1954   : > { %3975 = vmatmul.mubr.msk.bf16.vlgmr.msra.gmra.mxu1 %vm569_vm10, %v3320_v29 }
0x1a14   : > { %v3374_v31 = vpop.f32.mrf.mxu1 }
0x1a15   : > { %v3375_v43 = vadd.f32 %v3374_v31, %v3324_v4 }
0x1a16   : > { %v3976_v30 = vpop.f32.mrf.mxu1 }
0x1a17   : > { %3381 = vmax.xlane.f32.xlu0 %v3375_v43 }
0x1a18   : > { %v3377_v36 = vpop.f32.mrf.mxu1 }
0x1a19   : > { %v3378_v33 = vadd.f32 %v3377_v36, %v3324_v4 }
0x1a1a   : > { %v3977_v34 = vpop.f32.mrf.mxu1 }
0x1a1b   : > { %3383 = vmax.xlane.f32.xlu1 %v3378_v33 }
0x1aa0   : > { %v3382_v46 = vpop.xlane.xlu0 %3381 }
0x1aa1   : > { %v3385_v3 = vsub.f32 %v3375_v43, %v3382_v46 }
0x1aa3   : > { %v3387_v35 = vmul.f32 1.442695, %v3385_v3 }
0x1aa4   : > { %v3384_v37 = vpop.xlane.xlu1 %3383 }
0x1aa5   : > { %4123 = vpow2.f32 %v3387_v35  ;;  %v3386_v38 = vsub.f32 %v3378_v33, %v3384_v37 }
0x1aa7   : > { %v3389_v57 = vmul.f32 1.442695, %v3386_v38 }
0x1aa9   : > { %4125 = vpow2.f32 %v3389_v57 }
0x1ab2   : > { %v4124_v39 = vpop.eup %4123 }
0x1ab3   : > { %3391 = vadd.xlane.f32.xlu0 %v4124_v39 }
0x1ab6   : > { %v4126_v53 = vpop.eup %4125 }
0x1ab7   : > { %3393 = vadd.xlane.f32.xlu1 %v4126_v53 }
0x1b3c   : > { %v3392_v0 = vpop.xlane.xlu0 %3391 }
0x1b3d   : > { %4127 = vlog2.f32 %v3392_v0 }
0x1b40   : > { %v3394_v48 = vpop.xlane.xlu1 %3393 }
0x1b41   : > { %4129 = vlog2.f32 %v3394_v48 }
0x1b4a   : > { %v4128_v40 = vpop.eup %4127 }
0x1b4b   : > { %v3396_v42 = vmul.f32 0.6931472, %v4128_v40 }
0x1b4d   : > { %v3399_v50 = vsub.f32 %v3385_v3, %v3396_v42 }
0x1b4e   : > { %v4130_v15 = vpop.eup %4129 }
0x1b4f   : > { %3415 = vadd.xlane.f32.xlu0 %v3399_v50  ;;  %v3398_v56 = vmul.f32 0.6931472, %v4130_v15  ;;  %v3407_v58 = vmul.f32 %v3401_v47, %v3399_v50 }
0x1b51   : > { %v3400_v59 = vsub.f32 %v3386_v38, %v3398_v56 }
0x1b53   : > { %3409 = vadd.xlane.f32.xlu0 %v3407_v58  ;;  %3417 = vadd.xlane.f32.xlu1 %v3400_v59  ;;  %v3408_v20 = vmul.f32 %v3402_v32, %v3400_v59 }
0x1b57   : > { %3411 = vadd.xlane.f32.xlu1 %v3408_v20  ;;  %3403 = vadd.xlane.f32.xlu0 %v3401_v47 }
0x1b5b   : > { %3405 = vadd.xlane.f32.xlu1 %v3402_v32 }
0x1bd8   : > { %v3416_v44 = vpop.xlane.xlu0 %3415 }
0x1bd9   : > { %v3420_v61 = vmul.f32 0.0078125, %v3416_v44 }
0x1bdb   : > { %v3422_v63 = vsub.f32 0.0, %v3420_v61 }
0x1bdc   : > { %v3410_v45 = vpop.xlane.xlu0 %3409  ;;  %v3418_v2 = vpop.xlane.xlu1 %3417 }
0x1bdd   : > { %v3413_v5 = vsub.f32 0.0, %v3410_v45  ;;  %v3421_v6 = vmul.f32 0.0078125, %v3418_v2  ;;  %v3426_v7 = vmul.f32 0.1, %v3422_v63 }
0x1bdf   : > { %v3424_v49 = vmul.f32 0.9, %v3413_v5  ;;  %v3423_v60 = vsub.f32 0.0, %v3421_v6 }
0x1be0   : > { %v3412_v8 = vpop.xlane.xlu1 %3411  ;;  %v3404_v41 = vpop.xlane.xlu0 %3403 }
0x1be1   : > { %v3414_v10 = vsub.f32 0.0, %v3412_v8  ;;  %v3428_v55 = vadd.f32 %v3426_v7, %v3424_v49  ;;  %v3427_v11 = vmul.f32 0.1, %v3423_v60  ;;  %v3436_v13 = vsel %vm3435_vm2, %v3404_v41, 0.0 }
0x1be3   : > { %v3425_v12 = vmul.f32 0.9, %v3414_v10  ;;  %v3433_v9 = vmul.f32 %v3428_v55, %v3404_v41 }
0x1be4   : > { %v3406_v14 = vpop.xlane.xlu1 %3405 }
0x1be5   : > { %v3429_v54 = vadd.f32 %v3427_v11, %v3425_v12  ;;  %v3437_v16 = vsel %vm3435_vm2, %v3406_v14, 0.0  ;;  %v3438_v51 = vsel %vm3432_vm3, %v3433_v9, %v3436_v13 }
0x1be7   : > { %v3434_v17 = vmul.f32 %v3429_v54, %v3406_v14 }
0x1be9   : > { %v3439_v18 = vsel %vm3432_vm3, %v3434_v17, %v3437_v16 }
0x1bea   : > { %v3440_v19 = vadd.f32 %v3439_v18, %v3438_v51 }
0x1bec   : > { %v3441_v21 = vrot.slane %v3440_v19, 4 }
0x1bee   : > { %v3442_v22 = vadd.f32 %v3441_v21, %v3440_v19 }
0x1bf0   : > { %v3443_v52 = vrot.slane %v3442_v22, 2 }
0x1bf2   : > { %v3444_v23 = vadd.f32 %v3443_v52, %v3442_v22 }
0x1bf4   : > { %v3445_v24 = vrot.slane %v3444_v23, 1 }
0x1bf6   : > { %v3446_v25 = vadd.f32 %v3445_v24, %v3444_v23 }
0x1bf8   : > { %3447 = vst [vmem:[%s4869_s15] sm:$0x1] %v3446_v25 }
0x1bf9 PF: > { %s25_s18 = sadd.s32 1, %s4137_s18  }
0x1bfa   : > { %p22_p5 = scmp.ge.s32.totalorder %s25_s18, 4  }
0x1bfc   :  { %24 = sbr.rel (!%p22_p5) target bundleno = 1 (0x1), region = 122 }

</bundles_post_ra>
